<compile_context>
chip_gen: v6e
topology: v6e:2x2x1
jax: 0.10.0
libtpu: 0.0.40
codegen_flags: <defaults>
</compile_context>

<pallas_src>
import functools

import jax
import jax.numpy as jnp
from jax.experimental import pallas as pl
from jax.experimental.pallas import tpu as pltpu


_LANE = 128


def _round_up(x, m):
    return (x + m - 1) // m * m


def _vmem_limit_bytes():
    # Generation-aware scoped-VMEM cap: ~5/8 of physical VMEM leaves headroom
    # for Mosaic-internal scratch and double-buffer slack
    # (v7x: 64 MiB -> 40 MiB, v5e/v6e: 128 MiB -> 80 MiB).
    try:
        cap = int(pltpu.get_tpu_info().vmem_capacity_bytes)
    except Exception:
        cap = 64 * 1024 * 1024
    return int(max(32 * 1024 * 1024, min(cap * 5 // 8, 96 * 1024 * 1024)))


_VMEM_LIMIT = _vmem_limit_bytes()


def _pick_row_tile(Ho, Wo, target_rows=4096):
    """Largest TM dividing Ho with TM*Wo <= target_rows and TM*Wo % 8 == 0."""
    best = None
    for tm in range(1, Ho + 1):
        if Ho % tm:
            continue
        if tm * Wo > target_rows:
            break
        if (tm * Wo) % 8 == 0:
            best = tm
    # Fallback: whole image (block == full dim is always a legal block shape).
    return best if best is not None else Ho


def _pick_m_tile(total, target_rows=8192):
    """Largest multiple-of-8 divisor of `total` that is <= target_rows."""
    best = None
    for t in range(8, min(total, target_rows) + 1, 8):
        if total % t == 0:
            best = t
    return best if best is not None else total


@functools.partial(jax.jit, static_argnames=("kernel_size", "padding"))
def conv_bn_relu_forward(x, weight, bias, gamma, beta,
                         kernel_size=3, padding=1, eps=1e-5):
    """x: (N, Cin, H, W) f32; weight: (Cout, Cin, K, K); bias/gamma/beta: (Cout,).

    Returns (N, Cout, Ho, Wo) f32 with Ho = H + 2*padding - K + 1 (stride 1).
    """
    del bias  # cancels exactly under training-mode BatchNorm (see header)
    # TODO(synk): stride != 1 is not implemented (module default stride=1).
    N, C, H, W = x.shape
    O = weight.shape[0]
    K = kernel_size
    pad = padding
    Ho = H + 2 * pad - K + 1
    Wo = W + 2 * pad - K + 1
    HWo = Ho * Wo
    M = N * HWo
    KKC = K * K * C
    # 128 fills the v5e MXU; 256 avoids half-idle columns on v6e/v7x for big O.
    lane_mult = 256 if O >= 256 else _LANE
    O_pad = _round_up(O, lane_mult)

    TM = _pick_row_tile(Ho, Wo)            # rows of Ho per kernel-1 grid step
    n_rt = Ho // TM
    Hp, Wp = H + 2 * pad, W + 2 * pad

    # ---- host-side layout prep (one cheap pass over x and w) ----
    # NCHW -> NHWC, bf16 (MXU input dtype), zero-pad spatially.
    xp = jnp.pad(jnp.transpose(x, (0, 2, 3, 1)).astype(jnp.bfloat16),
                 ((0, 0), (pad, pad), (pad, pad), (0, 0)))
    # OIHW -> (K*K*C, O_pad) bf16, (ky, kx, cin) ordering to match the patch.
    w2 = jnp.transpose(weight, (2, 3, 1, 0)).reshape(KKC, O)
    w2 = jnp.pad(w2, ((0, 0), (0, O_pad - O))).astype(jnp.bfloat16)

    # -------- kernel 1: conv via fused-tap im2col matmul + BN partials -------
    def conv_stats_kernel(xp_ref, w_ref, y_ref, sum_ref, ssq_ref, patch_ref):
        row0 = pl.program_id(1) * TM
        # In-kernel im2col into a bf16 VMEM scratch: K*K shifted views of the
        # resident padded image, tap-major along the contraction axis.
        for dy in range(K):
            for dx in range(K):
                j = dy * K + dx
                patch_ref[:, :, j * C:(j + 1) * C] = (
                    xp_ref[0, pl.ds(row0 + dy, TM), dx:dx + Wo, :])
        patch = patch_ref[...].reshape(TM * Wo, KKC)
        # Single MXU matmul with contraction depth K*K*C (f32 accumulation).
        acc = jnp.dot(patch, w_ref[...], preferred_element_type=jnp.float32)
        y_ref[0] = acc.astype(jnp.bfloat16)
        # Per-(image, row-tile) BN partials; reduced in the wrapper so every
        # grid axis stays "parallel".
        sum_ref[0] = jnp.sum(acc, axis=0, keepdims=True)
        ssq_ref[0] = jnp.sum(acc * acc, axis=0, keepdims=True)

    y, sums, ssqs = pl.pallas_call(
        conv_stats_kernel,
        out_shape=(
            jax.ShapeDtypeStruct((N, HWo, O_pad), jnp.bfloat16),
            jax.ShapeDtypeStruct((N * n_rt, 1, O_pad), jnp.float32),
            jax.ShapeDtypeStruct((N * n_rt, 1, O_pad), jnp.float32),
        ),
        grid_spec=pltpu.PrefetchScalarGridSpec(
            num_scalar_prefetch=0,
            grid=(N, n_rt),
            in_specs=[
                # Indexed by n only: constant block index across the row-tile
                # axis => image stays resident, no re-DMA per row tile.
                pl.BlockSpec((1, Hp, Wp, C), lambda n, r: (n, 0, 0, 0)),
                pl.BlockSpec((KKC, O_pad), lambda n, r: (0, 0)),
            ],
            out_specs=[
                pl.BlockSpec((1, TM * Wo, O_pad), lambda n, r: (n, r, 0)),
                pl.BlockSpec((1, 1, O_pad), lambda n, r: (n * n_rt + r, 0, 0)),
                pl.BlockSpec((1, 1, O_pad), lambda n, r: (n * n_rt + r, 0, 0)),
            ],
            scratch_shapes=[pltpu.VMEM((TM, Wo, KKC), jnp.bfloat16)],
        ),
        compiler_params=pltpu.CompilerParams(
            dimension_semantics=("parallel", "parallel"),
            vmem_limit_bytes=_VMEM_LIMIT),
    )(xp, w2)

    # ---- BN training-mode statistics + affine coefficients (tiny glue) ----
    ch_sum = jnp.sum(sums, axis=0)                       # (1, O_pad)
    ch_ssq = jnp.sum(ssqs, axis=0)                       # (1, O_pad)
    mean = ch_sum / M
    # E[x^2]-E[x]^2 in f32 can cancel; clamp keeps rsqrt finite.
    # TODO(synk): two-pass variance if strict parity with PyTorch BN is needed.
    var = jnp.maximum(ch_ssq / M - mean * mean, 0.0)
    gamma_p = jnp.pad(gamma.astype(jnp.float32), (0, O_pad - O)).reshape(1, O_pad)
    beta_p = jnp.pad(beta.astype(jnp.float32), (0, O_pad - O)).reshape(1, O_pad)
    scale = gamma_p * jax.lax.rsqrt(var + eps)
    shift = beta_p - mean * scale

    # -------- kernel 2: fused BN affine + ReLU, tiled over flattened M -------
    y2 = y.reshape(N * HWo, O_pad)        # contiguous: free reshape
    TM2 = _pick_m_tile(N * HWo)

    def bn_relu_kernel(y_ref, scale_ref, shift_ref, o_ref):
        o_ref[...] = jnp.maximum(
            y_ref[...].astype(jnp.float32) * scale_ref[...] + shift_ref[...],
            0.0)

    out = pl.pallas_call(
        bn_relu_kernel,
        out_shape=jax.ShapeDtypeStruct((N * HWo, O_pad), jnp.float32),
        grid_spec=pltpu.PrefetchScalarGridSpec(
            num_scalar_prefetch=0,
            grid=(N * HWo // TM2,),
            in_specs=[
                pl.BlockSpec((TM2, O_pad), lambda i: (i, 0)),
                pl.BlockSpec((1, O_pad), lambda i: (0, 0)),
                pl.BlockSpec((1, O_pad), lambda i: (0, 0)),
            ],
            out_specs=pl.BlockSpec((TM2, O_pad), lambda i: (i, 0)),
        ),
        compiler_params=pltpu.CompilerParams(
            dimension_semantics=("parallel",),
            vmem_limit_bytes=_VMEM_LIMIT),
    )(y2, scale, shift)

    # Back to PyTorch NCHW layout, dropping the channel lane-padding.
    # TODO(synk): emit NHWC directly if the consumer accepts it; this final
    # transpose is an extra full read+write of the output in XLA.
    out = out.reshape(N, Ho, Wo, O_pad)[..., :O]
    return jnp.transpose(out, (0, 3, 1, 2))


def _reference(x, weight, bias, gamma, beta, eps=1e-5):
    y = jax.lax.conv_general_dilated(
        x, weight, window_strides=(1, 1), padding=((1, 1), (1, 1)),
        dimension_numbers=("NCHW", "OIHW", "NCHW"))
    y = y + bias.reshape(1, -1, 1, 1)
    mean = y.mean(axis=(0, 2, 3), keepdims=True)
    var = y.var(axis=(0, 2, 3), keepdims=True)
    y = (y - mean) / jnp.sqrt(var + eps)
    y = y * gamma.reshape(1, -1, 1, 1) + beta.reshape(1, -1, 1, 1)
    return jnp.maximum(y, 0.0)


if __name__ == "__main__":
    key = jax.random.PRNGKey(0)
    k_x, k_w, k_b = jax.random.split(key, 3)

    N, C_in, C_out, H, W, K = 2, 4, 8, 16, 16, 3

    x = jax.random.normal(k_x, (N, C_in, H, W), dtype=jnp.float32)
    fan_in = C_in * K * K
    weight = jax.random.uniform(k_w, (C_out, C_in, K, K), jnp.float32,
                                minval=-1.0, maxval=1.0) / jnp.sqrt(fan_in)
    bias = jax.random.uniform(k_b, (C_out,), jnp.float32,
                              minval=-1.0, maxval=1.0) / jnp.sqrt(fan_in)
    gamma = jnp.ones((C_out,), jnp.float32)    # BatchNorm2d default weight
    beta = jnp.zeros((C_out,), jnp.float32)    # BatchNorm2d default bias

    out = conv_bn_relu_forward(x, weight, bias, gamma, beta,
                               kernel_size=K, padding=1)
    out = jax.block_until_ready(out)

    ref = _reference(x, weight, bias, gamma, beta)
    assert out.shape == (N, C_out, H, W)
    # bf16 MXU operands + bf16 intermediate y (f32 accumulation / stats) =>
    # slightly looser tolerance than a pure-f32 pipeline.
    assert jnp.allclose(out, ref, atol=3e-2, rtol=3e-2), "mismatch vs reference"

    print("KERNEL_OK")
</pallas_src>

<mosaic_0001>
module attributes {stable_mosaic.version = 11 : i64} {
  func.func @bn_relu_kernel(%arg0: i32, %arg1: memref<512x128xbf16, #tpu.memory_space<vmem>>, %arg2: memref<1x128xf32, #tpu.memory_space<vmem>>, %arg3: memref<1x128xf32, #tpu.memory_space<vmem>>, %arg4: memref<512x128xf32, #tpu.memory_space<vmem>>) attributes {dimension_semantics = [#tpu.dimension_semantics<parallel>], iteration_bounds = array<i64: 1>, scalar_prefetch = 0 : i64, scratch_operands = 0 : i64, tpu.core_type = #tpu.core_type<tc>, window_params = [{transform_indices = @transform_0, window_bounds = array<i64: 512, 128>}, {pipeline_mode = #tpu.pipeline_mode<synchronous>, transform_indices = @transform_1, window_bounds = array<i64: 1, 128>}, {pipeline_mode = #tpu.pipeline_mode<synchronous>, transform_indices = @transform_2, window_bounds = array<i64: 1, 128>}, {transform_indices = @transform_3, window_bounds = array<i64: 512, 128>}]} {
    %c0 = arith.constant 0 : index
    %c0_0 = arith.constant 0 : index
    %0 = vector.load %arg1[%c0, %c0_0] : memref<512x128xbf16, #tpu.memory_space<vmem>>, vector<512x128xbf16>
    %1 = arith.extf %0 : vector<512x128xbf16> to vector<512x128xf32>
    %c0_1 = arith.constant 0 : index
    %c0_2 = arith.constant 0 : index
    %2 = vector.load %arg2[%c0_1, %c0_2] : memref<1x128xf32, #tpu.memory_space<vmem>>, vector<1x128xf32>
    %3 = vector.broadcast %2 : vector<1x128xf32> to vector<512x128xf32>
    %4 = arith.mulf %1, %3 : vector<512x128xf32>
    %c0_3 = arith.constant 0 : index
    %c0_4 = arith.constant 0 : index
    %5 = vector.load %arg3[%c0_3, %c0_4] : memref<1x128xf32, #tpu.memory_space<vmem>>, vector<1x128xf32>
    %6 = vector.broadcast %5 : vector<1x128xf32> to vector<512x128xf32>
    %7 = arith.addf %4, %6 : vector<512x128xf32>
    %cst = arith.constant 0.000000e+00 : f32
    %8 = vector.broadcast %cst : f32 to vector<512x128xf32>
    %9 = arith.maximumf %7, %8 : vector<512x128xf32>
    %c0_5 = arith.constant 0 : index
    %c0_6 = arith.constant 0 : index
    %10 = vector.load %arg4[%c0_5, %c0_6] : memref<512x128xf32, #tpu.memory_space<vmem>>, vector<512x128xf32>
    tpu.vector_store %arg4[%c0_5, %c0_6], %9 {strides = array<i32>} : memref<512x128xf32, #tpu.memory_space<vmem>>, vector<512x128xf32>,
    return
  }
  func.func @transform_0(%arg0: i32) -> (i32, i32) {
    %c0_i32 = arith.constant 0 : i32
    %c0_i32_0 = arith.constant 0 : i32
    return %arg0, %c0_i32 : i32, i32
  }
  func.func @transform_1(%arg0: i32) -> (i32, i32) {
    %c0_i32 = arith.constant 0 : i32
    %c0_i32_0 = arith.constant 0 : i32
    %c0_i32_1 = arith.constant 0 : i32
    return %c0_i32, %c0_i32_0 : i32, i32
  }
  func.func @transform_2(%arg0: i32) -> (i32, i32) {
    %c0_i32 = arith.constant 0 : i32
    %c0_i32_0 = arith.constant 0 : i32
    %c0_i32_1 = arith.constant 0 : i32
    return %c0_i32, %c0_i32_0 : i32, i32
  }
  func.func @transform_3(%arg0: i32) -> (i32, i32) {
    %c0_i32 = arith.constant 0 : i32
    %c0_i32_0 = arith.constant 0 : i32
    return %arg0, %c0_i32 : i32, i32
  }
}

module attributes {stable_mosaic.version = 11 : i64} {
  func.func @conv_stats_kernel(%arg0: i32, %arg1: i32, %arg2: memref<1x18x18x4xbf16, #tpu.memory_space<vmem>>, %arg3: memref<36x128xbf16, #tpu.memory_space<vmem>>, %arg4: memref<1x256x128xbf16, #tpu.memory_space<vmem>>, %arg5: memref<1x1x128xf32, #tpu.memory_space<vmem>>, %arg6: memref<1x1x128xf32, #tpu.memory_space<vmem>>, %arg7: memref<16x16x36xbf16, #tpu.memory_space<vmem>>) attributes {dimension_semantics = [#tpu.dimension_semantics<parallel>, #tpu.dimension_semantics<parallel>], iteration_bounds = array<i64: 2, 1>, scalar_prefetch = 0 : i64, scratch_operands = 1 : i64, tpu.core_type = #tpu.core_type<tc>, window_params = [{transform_indices = @transform_0, window_bounds = array<i64: 1, 18, 18, 4>}, {pipeline_mode = #tpu.pipeline_mode<synchronous>, transform_indices = @transform_1, window_bounds = array<i64: 36, 128>}, {transform_indices = @transform_2, window_bounds = array<i64: 1, 256, 128>}, {transform_indices = @transform_3, window_bounds = array<i64: 1, 1, 128>}, {transform_indices = @transform_4, window_bounds = array<i64: 1, 1, 128>}]} {
    %c16_i32 = arith.constant 16 : i32
    %0 = arith.muli %arg1, %c16_i32 : i32
    %c0_i32 = arith.constant 0 : i32
    %1 = arith.addi %0, %c0_i32 : i32
    %c0 = arith.constant 0 : index
    %2 = arith.index_cast %1 : i32 to index
    %c0_0 = arith.constant 0 : index
    %c0_1 = arith.constant 0 : index
    %3 = vector.load %arg2[%c0, %2, %c0_0, %c0_1] : memref<1x18x18x4xbf16, #tpu.memory_space<vmem>>, vector<1x16x16x4xbf16>
    %4 = vector.shape_cast %3 : vector<1x16x16x4xbf16> to vector<16x16x4xbf16>
    %c0_2 = arith.constant 0 : index
    %c0_3 = arith.constant 0 : index
    %c0_4 = arith.constant 0 : index
    %5 = vector.load %arg7[%c0_2, %c0_3, %c0_4] : memref<16x16x36xbf16, #tpu.memory_space<vmem>>, vector<16x16x4xbf16>
    tpu.vector_store %arg7[%c0_2, %c0_3, %c0_4], %4 {strides = array<i32>} : memref<16x16x36xbf16, #tpu.memory_space<vmem>>, vector<16x16x4xbf16>,
    %c0_i32_5 = arith.constant 0 : i32
    %6 = arith.addi %0, %c0_i32_5 : i32
    %c0_6 = arith.constant 0 : index
    %7 = arith.index_cast %6 : i32 to index
    %c1 = arith.constant 1 : index
    %c0_7 = arith.constant 0 : index
    %8 = vector.load %arg2[%c0_6, %7, %c1, %c0_7] : memref<1x18x18x4xbf16, #tpu.memory_space<vmem>>, vector<1x16x16x4xbf16>
    %9 = vector.shape_cast %8 : vector<1x16x16x4xbf16> to vector<16x16x4xbf16>
    %c0_8 = arith.constant 0 : index
    %c0_9 = arith.constant 0 : index
    %c4 = arith.constant 4 : index
    %10 = vector.load %arg7[%c0_8, %c0_9, %c4] : memref<16x16x36xbf16, #tpu.memory_space<vmem>>, vector<16x16x4xbf16>
    tpu.vector_store %arg7[%c0_8, %c0_9, %c4], %9 {strides = array<i32>} : memref<16x16x36xbf16, #tpu.memory_space<vmem>>, vector<16x16x4xbf16>,
    %c0_i32_10 = arith.constant 0 : i32
    %11 = arith.addi %0, %c0_i32_10 : i32
    %c0_11 = arith.constant 0 : index
    %12 = arith.index_cast %11 : i32 to index
    %c2 = arith.constant 2 : index
    %c0_12 = arith.constant 0 : index
    %13 = vector.load %arg2[%c0_11, %12, %c2, %c0_12] : memref<1x18x18x4xbf16, #tpu.memory_space<vmem>>, vector<1x16x16x4xbf16>
    %14 = vector.shape_cast %13 : vector<1x16x16x4xbf16> to vector<16x16x4xbf16>
    %c0_13 = arith.constant 0 : index
    %c0_14 = arith.constant 0 : index
    %c8 = arith.constant 8 : index
    %15 = vector.load %arg7[%c0_13, %c0_14, %c8] : memref<16x16x36xbf16, #tpu.memory_space<vmem>>, vector<16x16x4xbf16>
    tpu.vector_store %arg7[%c0_13, %c0_14, %c8], %14 {strides = array<i32>} : memref<16x16x36xbf16, #tpu.memory_space<vmem>>, vector<16x16x4xbf16>,
    %c1_i32 = arith.constant 1 : i32
    %16 = arith.addi %0, %c1_i32 : i32
    %c0_15 = arith.constant 0 : index
    %17 = arith.index_cast %16 : i32 to index
    %c0_16 = arith.constant 0 : index
    %c0_17 = arith.constant 0 : index
    %18 = vector.load %arg2[%c0_15, %17, %c0_16, %c0_17] : memref<1x18x18x4xbf16, #tpu.memory_space<vmem>>, vector<1x16x16x4xbf16>
    %19 = vector.shape_cast %18 : vector<1x16x16x4xbf16> to vector<16x16x4xbf16>
    %c0_18 = arith.constant 0 : index
    %c0_19 = arith.constant 0 : index
    %c12 = arith.constant 12 : index
    %20 = vector.load %arg7[%c0_18, %c0_19, %c12] : memref<16x16x36xbf16, #tpu.memory_space<vmem>>, vector<16x16x4xbf16>
    tpu.vector_store %arg7[%c0_18, %c0_19, %c12], %19 {strides = array<i32>} : memref<16x16x36xbf16, #tpu.memory_space<vmem>>, vector<16x16x4xbf16>,
    %c1_i32_20 = arith.constant 1 : i32
    %21 = arith.addi %0, %c1_i32_20 : i32
    %c0_21 = arith.constant 0 : index
    %22 = arith.index_cast %21 : i32 to index
    %c1_22 = arith.constant 1 : index
    %c0_23 = arith.constant 0 : index
    %23 = vector.load %arg2[%c0_21, %22, %c1_22, %c0_23] : memref<1x18x18x4xbf16, #tpu.memory_space<vmem>>, vector<1x16x16x4xbf16>
    %24 = vector.shape_cast %23 : vector<1x16x16x4xbf16> to vector<16x16x4xbf16>
    %c0_24 = arith.constant 0 : index
    %c0_25 = arith.constant 0 : index
    %c16 = arith.constant 16 : index
    %25 = vector.load %arg7[%c0_24, %c0_25, %c16] : memref<16x16x36xbf16, #tpu.memory_space<vmem>>, vector<16x16x4xbf16>
    tpu.vector_store %arg7[%c0_24, %c0_25, %c16], %24 {strides = array<i32>} : memref<16x16x36xbf16, #tpu.memory_space<vmem>>, vector<16x16x4xbf16>,
    %c1_i32_26 = arith.constant 1 : i32
    %26 = arith.addi %0, %c1_i32_26 : i32
    %c0_27 = arith.constant 0 : index
    %27 = arith.index_cast %26 : i32 to index
    %c2_28 = arith.constant 2 : index
    %c0_29 = arith.constant 0 : index
    %28 = vector.load %arg2[%c0_27, %27, %c2_28, %c0_29] : memref<1x18x18x4xbf16, #tpu.memory_space<vmem>>, vector<1x16x16x4xbf16>
    %29 = vector.shape_cast %28 : vector<1x16x16x4xbf16> to vector<16x16x4xbf16>
    %c0_30 = arith.constant 0 : index
    %c0_31 = arith.constant 0 : index
    %c20 = arith.constant 20 : index
    %30 = vector.load %arg7[%c0_30, %c0_31, %c20] : memref<16x16x36xbf16, #tpu.memory_space<vmem>>, vector<16x16x4xbf16>
    tpu.vector_store %arg7[%c0_30, %c0_31, %c20], %29 {strides = array<i32>} : memref<16x16x36xbf16, #tpu.memory_space<vmem>>, vector<16x16x4xbf16>,
    %c2_i32 = arith.constant 2 : i32
    %31 = arith.addi %0, %c2_i32 : i32
    %c0_32 = arith.constant 0 : index
    %32 = arith.index_cast %31 : i32 to index
    %c0_33 = arith.constant 0 : index
    %c0_34 = arith.constant 0 : index
    %33 = vector.load %arg2[%c0_32, %32, %c0_33, %c0_34] : memref<1x18x18x4xbf16, #tpu.memory_space<vmem>>, vector<1x16x16x4xbf16>
    %34 = vector.shape_cast %33 : vector<1x16x16x4xbf16> to vector<16x16x4xbf16>
    %c0_35 = arith.constant 0 : index
    %c0_36 = arith.constant 0 : index
    %c24 = arith.constant 24 : index
    %35 = vector.load %arg7[%c0_35, %c0_36, %c24] : memref<16x16x36xbf16, #tpu.memory_space<vmem>>, vector<16x16x4xbf16>
    tpu.vector_store %arg7[%c0_35, %c0_36, %c24], %34 {strides = array<i32>} : memref<16x16x36xbf16, #tpu.memory_space<vmem>>, vector<16x16x4xbf16>,
    %c2_i32_37 = arith.constant 2 : i32
    %36 = arith.addi %0, %c2_i32_37 : i32
    %c0_38 = arith.constant 0 : index
    %37 = arith.index_cast %36 : i32 to index
    %c1_39 = arith.constant 1 : index
    %c0_40 = arith.constant 0 : index
    %38 = vector.load %arg2[%c0_38, %37, %c1_39, %c0_40] : memref<1x18x18x4xbf16, #tpu.memory_space<vmem>>, vector<1x16x16x4xbf16>
    %39 = vector.shape_cast %38 : vector<1x16x16x4xbf16> to vector<16x16x4xbf16>
    %c0_41 = arith.constant 0 : index
    %c0_42 = arith.constant 0 : index
    %c28 = arith.constant 28 : index
    %40 = vector.load %arg7[%c0_41, %c0_42, %c28] : memref<16x16x36xbf16, #tpu.memory_space<vmem>>, vector<16x16x4xbf16>
    tpu.vector_store %arg7[%c0_41, %c0_42, %c28], %39 {strides = array<i32>} : memref<16x16x36xbf16, #tpu.memory_space<vmem>>, vector<16x16x4xbf16>,
    %c2_i32_43 = arith.constant 2 : i32
    %41 = arith.addi %0, %c2_i32_43 : i32
    %c0_44 = arith.constant 0 : index
    %42 = arith.index_cast %41 : i32 to index
    %c2_45 = arith.constant 2 : index
    %c0_46 = arith.constant 0 : index
    %43 = vector.load %arg2[%c0_44, %42, %c2_45, %c0_46] : memref<1x18x18x4xbf16, #tpu.memory_space<vmem>>, vector<1x16x16x4xbf16>
    %44 = vector.shape_cast %43 : vector<1x16x16x4xbf16> to vector<16x16x4xbf16>
    %c0_47 = arith.constant 0 : index
    %c0_48 = arith.constant 0 : index
    %c32 = arith.constant 32 : index
    %45 = vector.load %arg7[%c0_47, %c0_48, %c32] : memref<16x16x36xbf16, #tpu.memory_space<vmem>>, vector<16x16x4xbf16>
    tpu.vector_store %arg7[%c0_47, %c0_48, %c32], %44 {strides = array<i32>} : memref<16x16x36xbf16, #tpu.memory_space<vmem>>, vector<16x16x4xbf16>,
    %c0_49 = arith.constant 0 : index
    %c0_50 = arith.constant 0 : index
    %c0_51 = arith.constant 0 : index
    %46 = vector.load %arg7[%c0_49, %c0_50, %c0_51] : memref<16x16x36xbf16, #tpu.memory_space<vmem>>, vector<16x16x36xbf16>
    %47 = vector.shape_cast %46 : vector<16x16x36xbf16> to vector<256x36xbf16>
    %c0_52 = arith.constant 0 : index
    %c0_53 = arith.constant 0 : index
    %48 = vector.load %arg3[%c0_52, %c0_53] : memref<36x128xbf16, #tpu.memory_space<vmem>>, vector<36x128xbf16>
    %cst = arith.constant dense<0.000000e+00> : vector<256x128xf32>
    %49 = tpu.matmul %47, %48, %cst {dimension_numbers = #tpu.dot_dimension_numbers<[1], [0], [0], [1], [0, 0, 1, 1], [], []>} : vector<256x36xbf16>, vector<36x128xbf16>, vector<256x128xf32> -> vector<256x128xf32>
    %50 = arith.truncf %49 : vector<256x128xf32> to vector<256x128xbf16>
    %c0_54 = arith.constant 0 : index
    %c0_55 = arith.constant 0 : index
    %c0_56 = arith.constant 0 : index
    %51 = vector.load %arg4[%c0_54, %c0_55, %c0_56] : memref<1x256x128xbf16, #tpu.memory_space<vmem>>, vector<1x256x128xbf16>
    %52 = vector.shape_cast %51 : vector<1x256x128xbf16> to vector<256x128xbf16>
    %53 = vector.shape_cast %50 : vector<256x128xbf16> to vector<1x256x128xbf16>
    tpu.vector_store %arg4[%c0_54, %c0_55, %c0_56], %53 {strides = array<i32>} : memref<1x256x128xbf16, #tpu.memory_space<vmem>>, vector<1x256x128xbf16>,
    %cst_57 = arith.constant dense<0.000000e+00> : vector<128xf32>
    %54 = vector.multi_reduction <add>, %49, %cst_57 [0] : vector<256x128xf32> to vector<128xf32>
    %55 = vector.shape_cast %54 : vector<128xf32> to vector<1x128xf32>
    %c0_58 = arith.constant 0 : index
    %c0_59 = arith.constant 0 : index
    %c0_60 = arith.constant 0 : index
    %56 = vector.load %arg5[%c0_58, %c0_59, %c0_60] : memref<1x1x128xf32, #tpu.memory_space<vmem>>, vector<1x1x128xf32>
    %57 = vector.shape_cast %56 : vector<1x1x128xf32> to vector<1x128xf32>
    %58 = vector.shape_cast %55 : vector<1x128xf32> to vector<1x1x128xf32>
    tpu.vector_store %arg5[%c0_58, %c0_59, %c0_60], %58 {strides = array<i32>} : memref<1x1x128xf32, #tpu.memory_space<vmem>>, vector<1x1x128xf32>,
    %59 = arith.mulf %49, %49 : vector<256x128xf32>
    %cst_61 = arith.constant dense<0.000000e+00> : vector<128xf32>
    %60 = vector.multi_reduction <add>, %59, %cst_61 [0] : vector<256x128xf32> to vector<128xf32>
    %61 = vector.shape_cast %60 : vector<128xf32> to vector<1x128xf32>
    %c0_62 = arith.constant 0 : index
    %c0_63 = arith.constant 0 : index
    %c0_64 = arith.constant 0 : index
    %62 = vector.load %arg6[%c0_62, %c0_63, %c0_64] : memref<1x1x128xf32, #tpu.memory_space<vmem>>, vector<1x1x128xf32>
    %63 = vector.shape_cast %62 : vector<1x1x128xf32> to vector<1x128xf32>
    %64 = vector.shape_cast %61 : vector<1x128xf32> to vector<1x1x128xf32>
    tpu.vector_store %arg6[%c0_62, %c0_63, %c0_64], %64 {strides = array<i32>} : memref<1x1x128xf32, #tpu.memory_space<vmem>>, vector<1x1x128xf32>,
    return
  }
  func.func @transform_0(%arg0: i32, %arg1: i32) -> (i32, i32, i32, i32) {
    %c0_i32 = arith.constant 0 : i32
    %c0_i32_0 = arith.constant 0 : i32
    %c0_i32_1 = arith.constant 0 : i32
    %c0_i32_2 = arith.constant 0 : i32
    return %arg0, %c0_i32, %c0_i32_0, %c0_i32_1 : i32, i32, i32, i32
  }
  func.func @transform_1(%arg0: i32, %arg1: i32) -> (i32, i32) {
    %c0_i32 = arith.constant 0 : i32
    %c0_i32_0 = arith.constant 0 : i32
    %c0_i32_1 = arith.constant 0 : i32
    return %c0_i32, %c0_i32_0 : i32, i32
  }
  func.func @transform_2(%arg0: i32, %arg1: i32) -> (i32, i32, i32) {
    %c0_i32 = arith.constant 0 : i32
    %c0_i32_0 = arith.constant 0 : i32
    return %arg0, %arg1, %c0_i32 : i32, i32, i32
  }
  func.func @transform_3(%arg0: i32, %arg1: i32) -> (i32, i32, i32) {
    %c1_i32 = arith.constant 1 : i32
    %0 = arith.muli %arg0, %c1_i32 : i32
    %1 = arith.addi %0, %arg1 : i32
    %c0_i32 = arith.constant 0 : i32
    %c0_i32_0 = arith.constant 0 : i32
    %c0_i32_1 = arith.constant 0 : i32
    return %1, %c0_i32, %c0_i32_0 : i32, i32, i32
  }
  func.func @transform_4(%arg0: i32, %arg1: i32) -> (i32, i32, i32) {
    %c1_i32 = arith.constant 1 : i32
    %0 = arith.muli %arg0, %c1_i32 : i32
    %1 = arith.addi %0, %arg1 : i32
    %c0_i32 = arith.constant 0 : i32
    %c0_i32_0 = arith.constant 0 : i32
    %c0_i32_1 = arith.constant 0 : i32
    return %1, %c0_i32, %c0_i32_0 : i32, i32, i32
  }
}

</mosaic_0001>

<bundles_post_ra>
// kernel: conv_bn_relu_forward.3
= control target key start
LH: loop header
LB: loop body
LE: loop exit
PB: predicated region body
PF: predicated region fallthrough
CT: control target
= control target key end

     0   :  { %s1023_s0 = inlined_call_operand.vmem [shape: bf16[512,128], index: 0, kind: input, shape index: {}]   ;;  %s1024_s1 = inlined_call_operand.vmem [shape: f32[1,128], index: 1, kind: input, shape index: {}]   ;;  %s1025_s2 = inlined_call_operand.vmem [shape: f32[1,128], index: 2, kind: input, shape index: {}]   ;;  %s1026_s3 = inlined_call_operand.vmem [shape: f32[512,128], index: 3, kind: output, shape index: {}]  }
   0x1   :  { %v419_v0 = vld [vmem:[%s1023_s0] sm:$0xff]   ;;  %v546_v4 = vld [vmem:[%s1023_s0 + $0x8] sm:$0xff]   ;;  %v547_v5 = vld [vmem:[%s1023_s0 + $0x10] sm:$0xff]  }
   0x2   :  { %v603_v1 = vld [vmem:[%s1024_s1] ss:$0 sm:$0xff]  ;;  %v420_v2 = vunpack.c.l.bf16 %v419_v0  ;;  %v421_v3 = vunpack.c.h.bf16 %v419_v0  ;;  %v548_v6 = vld [vmem:[%s1023_s0 + $0x18] sm:$0xff]   ;;  %v424_v8 = vunpack.c.l.bf16 %v546_v4  ;;  %v425_v9 = vunpack.c.h.bf16 %v546_v4  ;;  %v550_v33 = vld [vmem:[%s1023_s0 + $0x28] sm:$0xff]  }
   0x3   :  { %v617_v7 = vld [vmem:[%s1025_s2] ss:$0 sm:$0xff]  ;;  %v428_v10 = vunpack.c.l.bf16 %v547_v5  ;;  %v429_v11 = vunpack.c.h.bf16 %v547_v5  ;;  %v432_v14 = vunpack.c.l.bf16 %v548_v6  ;;  %v433_v15 = vunpack.c.h.bf16 %v548_v6  ;;  %v551_v34 = vld [vmem:[%s1023_s0 + $0x30] sm:$0xff]   ;;  %v552_v39 = vld [vmem:[%s1023_s0 + $0x38] sm:$0xff]  }
   0x4   :  { %v149_v12 = vmul.f32 %v420_v2, %v603_v1  ;;  %v150_v13 = vmul.f32 %v421_v3, %v603_v1  ;;  %v151_v16 = vmul.f32 %v424_v8, %v603_v1  ;;  %v152_v17 = vmul.f32 %v425_v9, %v603_v1  ;;  %v549_v28 = vld [vmem:[%s1023_s0 + $0x20] sm:$0xff]   ;;  %v554_v6 = vld [vmem:[%s1023_s0 + $0x48] sm:$0xff]   ;;  %v555_v8 = vld [vmem:[%s1023_s0 + $0x50] sm:$0xff]  }
   0x5   :  { %v153_v18 = vmul.f32 %v428_v10, %v603_v1  ;;  %v154_v19 = vmul.f32 %v429_v11, %v603_v1  ;;  %v155_v22 = vmul.f32 %v432_v14, %v603_v1  ;;  %v156_v23 = vmul.f32 %v433_v15, %v603_v1  ;;  %v553_v0 = vld [vmem:[%s1023_s0 + $0x40] sm:$0xff]  }
   0x6   :  { %v220_v20 = vadd.f32 %v617_v7, %v149_v12  ;;  %v221_v21 = vadd.f32 %v617_v7, %v150_v13  ;;  %v222_v24 = vadd.f32 %v617_v7, %v151_v16  ;;  %v223_v25 = vadd.f32 %v617_v7, %v152_v17  ;;  %v556_v13 = vld [vmem:[%s1023_s0 + $0x58] sm:$0xff]  }
   0x7   :  { %v224_v26 = vadd.f32 %v617_v7, %v153_v18  ;;  %v225_v27 = vadd.f32 %v617_v7, %v154_v19  ;;  %v226_v31 = vadd.f32 %v617_v7, %v155_v22  ;;  %v227_v32 = vadd.f32 %v617_v7, %v156_v23 }
   0x8   :  { %v284_v29 = vmax.f32 %v220_v20, 0.0  ;;  %v285_v30 = vmax.f32 %v221_v21, 0.0  ;;  %v286_v35 = vmax.f32 %v222_v24, 0.0  ;;  %v287_v36 = vmax.f32 %v223_v25, 0.0 }
   0x9   :  { %v288_v37 = vmax.f32 %v224_v26, 0.0  ;;  %v289_v38 = vmax.f32 %v225_v27, 0.0  ;;  %v290_v40 = vmax.f32 %v226_v31, 0.0  ;;  %v291_v41 = vmax.f32 %v227_v32, 0.0 }
   0xa   :  { %348 = vst [vmem:[%s1026_s3] sm:$0xff] %v284_v29  ;;  %349 = vst [vmem:[%s1026_s3 + $0x8] sm:$0xff] %v285_v30  ;;  %v436_v42 = vunpack.c.l.bf16 %v549_v28  ;;  %v437_v43 = vunpack.c.h.bf16 %v549_v28  ;;  %v440_v44 = vunpack.c.l.bf16 %v550_v33  ;;  %v441_v45 = vunpack.c.h.bf16 %v550_v33 }
   0xb   :  { %350 = vst [vmem:[%s1026_s3 + $0x10] sm:$0xff] %v286_v35  ;;  %351 = vst [vmem:[%s1026_s3 + $0x18] sm:$0xff] %v287_v36  ;;  %v444_v46 = vunpack.c.l.bf16 %v551_v34  ;;  %v445_v47 = vunpack.c.h.bf16 %v551_v34  ;;  %v448_v50 = vunpack.c.l.bf16 %v552_v39  ;;  %v449_v51 = vunpack.c.h.bf16 %v552_v39 }
   0xc   :  { %352 = vst [vmem:[%s1026_s3 + $0x20] sm:$0xff] %v288_v37  ;;  %353 = vst [vmem:[%s1026_s3 + $0x28] sm:$0xff] %v289_v38  ;;  %v157_v48 = vmul.f32 %v436_v42, %v603_v1  ;;  %v158_v49 = vmul.f32 %v437_v43, %v603_v1  ;;  %v159_v52 = vmul.f32 %v440_v44, %v603_v1  ;;  %v452_v16 = vunpack.c.l.bf16 %v553_v0  ;;  %v557_v38 = vld [vmem:[%s1023_s0 + $0x60] sm:$0xff]   ;;  %v558_v43 = vld [vmem:[%s1023_s0 + $0x68] sm:$0xff]  }
   0xd   :  { %354 = vst [vmem:[%s1026_s3 + $0x30] sm:$0xff] %v290_v40  ;;  %355 = vst [vmem:[%s1026_s3 + $0x38] sm:$0xff] %v291_v41  ;;  %v160_v53 = vmul.f32 %v441_v45, %v603_v1  ;;  %v161_v54 = vmul.f32 %v444_v46, %v603_v1  ;;  %v162_v55 = vmul.f32 %v445_v47, %v603_v1  ;;  %v453_v17 = vunpack.c.h.bf16 %v553_v0  ;;  %v559_v44 = vld [vmem:[%s1023_s0 + $0x70] sm:$0xff]  }
   0xe   :  { %v228_v56 = vadd.f32 %v617_v7, %v157_v48  ;;  %v229_v57 = vadd.f32 %v617_v7, %v158_v49  ;;  %v163_v58 = vmul.f32 %v448_v50, %v603_v1  ;;  %v164_v59 = vmul.f32 %v449_v51, %v603_v1  ;;  %v560_v49 = vld [vmem:[%s1023_s0 + $0x78] sm:$0xff]  }
   0xf   :  { %v230_v60 = vadd.f32 %v617_v7, %v159_v52  ;;  %v231_v61 = vadd.f32 %v617_v7, %v160_v53  ;;  %v232_v62 = vadd.f32 %v617_v7, %v161_v54  ;;  %v233_v63 = vadd.f32 %v617_v7, %v162_v55 }
  0x10   :  { %v292_v2 = vmax.f32 %v228_v56, 0.0  ;;  %v293_v3 = vmax.f32 %v229_v57, 0.0  ;;  %v234_v4 = vadd.f32 %v617_v7, %v163_v58  ;;  %v235_v5 = vadd.f32 %v617_v7, %v164_v59 }
  0x11   :  { %v294_v9 = vmax.f32 %v230_v60, 0.0  ;;  %v295_v10 = vmax.f32 %v231_v61, 0.0  ;;  %v296_v11 = vmax.f32 %v232_v62, 0.0  ;;  %v297_v12 = vmax.f32 %v233_v63, 0.0 }
  0x12   :  { %356 = vst [vmem:[%s1026_s3 + $0x40] sm:$0xff] %v292_v2  ;;  %357 = vst [vmem:[%s1026_s3 + $0x48] sm:$0xff] %v293_v3  ;;  %v298_v14 = vmax.f32 %v234_v4, 0.0  ;;  %v299_v15 = vmax.f32 %v235_v5, 0.0  ;;  %v456_v18 = vunpack.c.l.bf16 %v554_v6  ;;  %v457_v19 = vunpack.c.h.bf16 %v554_v6 }
  0x13   :  { %358 = vst [vmem:[%s1026_s3 + $0x50] sm:$0xff] %v294_v9  ;;  %359 = vst [vmem:[%s1026_s3 + $0x58] sm:$0xff] %v295_v10  ;;  %v460_v20 = vunpack.c.l.bf16 %v555_v8  ;;  %v461_v21 = vunpack.c.h.bf16 %v555_v8  ;;  %v165_v22 = vmul.f32 %v452_v16, %v603_v1  ;;  %v166_v23 = vmul.f32 %v453_v17, %v603_v1  ;;  %v562_v17 = vld [vmem:[%s1023_s0 + $0x88] sm:$0xff]  }
  0x14   :  { %360 = vst [vmem:[%s1026_s3 + $0x60] sm:$0xff] %v296_v11  ;;  %361 = vst [vmem:[%s1026_s3 + $0x68] sm:$0xff] %v297_v12  ;;  %v464_v24 = vunpack.c.l.bf16 %v556_v13  ;;  %v465_v25 = vunpack.c.h.bf16 %v556_v13  ;;  %v167_v26 = vmul.f32 %v456_v18, %v603_v1  ;;  %v168_v27 = vmul.f32 %v457_v19, %v603_v1  ;;  %v561_v12 = vld [vmem:[%s1023_s0 + $0x80] sm:$0xff]   ;;  %v563_v18 = vld [vmem:[%s1023_s0 + $0x90] sm:$0xff]  }
  0x15   :  { %362 = vst [vmem:[%s1026_s3 + $0x70] sm:$0xff] %v298_v14  ;;  %363 = vst [vmem:[%s1026_s3 + $0x78] sm:$0xff] %v299_v15  ;;  %v169_v28 = vmul.f32 %v460_v20, %v603_v1  ;;  %v170_v29 = vmul.f32 %v461_v21, %v603_v1  ;;  %v236_v30 = vadd.f32 %v617_v7, %v165_v22  ;;  %v468_v52 = vunpack.c.l.bf16 %v557_v38 }
  0x16   :  { %v237_v31 = vadd.f32 %v617_v7, %v166_v23  ;;  %v171_v32 = vmul.f32 %v464_v24, %v603_v1  ;;  %v172_v33 = vmul.f32 %v465_v25, %v603_v1  ;;  %v238_v34 = vadd.f32 %v617_v7, %v167_v26  ;;  %v564_v23 = vld [vmem:[%s1023_s0 + $0x98] sm:$0xff]  }
  0x17   :  { %v239_v35 = vadd.f32 %v617_v7, %v168_v27  ;;  %v240_v36 = vadd.f32 %v617_v7, %v169_v28  ;;  %v241_v37 = vadd.f32 %v617_v7, %v170_v29  ;;  %v300_v39 = vmax.f32 %v236_v30, 0.0 }
  0x18   :  { %v301_v40 = vmax.f32 %v237_v31, 0.0  ;;  %v242_v41 = vadd.f32 %v617_v7, %v171_v32  ;;  %v243_v42 = vadd.f32 %v617_v7, %v172_v33  ;;  %v302_v45 = vmax.f32 %v238_v34, 0.0 }
  0x19   :  { %v303_v46 = vmax.f32 %v239_v35, 0.0  ;;  %v304_v47 = vmax.f32 %v240_v36, 0.0  ;;  %v305_v48 = vmax.f32 %v241_v37, 0.0  ;;  %364 = vst [vmem:[%s1026_s3 + $0x80] sm:$0xff] %v300_v39  ;;  %v469_v53 = vunpack.c.h.bf16 %v557_v38 }
  0x1a   :  { %365 = vst [vmem:[%s1026_s3 + $0x88] sm:$0xff] %v301_v40  ;;  %v306_v50 = vmax.f32 %v242_v41, 0.0  ;;  %v307_v51 = vmax.f32 %v243_v42, 0.0  ;;  %366 = vst [vmem:[%s1026_s3 + $0x90] sm:$0xff] %v302_v45  ;;  %v472_v54 = vunpack.c.l.bf16 %v558_v43  ;;  %v473_v55 = vunpack.c.h.bf16 %v558_v43 }
  0x1b   :  { %367 = vst [vmem:[%s1026_s3 + $0x98] sm:$0xff] %v303_v46  ;;  %368 = vst [vmem:[%s1026_s3 + $0xa0] sm:$0xff] %v304_v47  ;;  %v476_v56 = vunpack.c.l.bf16 %v559_v44  ;;  %v477_v57 = vunpack.c.h.bf16 %v559_v44  ;;  %v173_v58 = vmul.f32 %v468_v52, %v603_v1  ;;  %v174_v59 = vmul.f32 %v469_v53, %v603_v1  ;;  %v566_v53 = vld [vmem:[%s1023_s0 + $0xa8] sm:$0xff]  }
  0x1c   :  { %369 = vst [vmem:[%s1026_s3 + $0xa8] sm:$0xff] %v305_v48  ;;  %370 = vst [vmem:[%s1026_s3 + $0xb0] sm:$0xff] %v306_v50  ;;  %v480_v60 = vunpack.c.l.bf16 %v560_v49  ;;  %v481_v61 = vunpack.c.h.bf16 %v560_v49  ;;  %v175_v62 = vmul.f32 %v472_v54, %v603_v1  ;;  %v176_v63 = vmul.f32 %v473_v55, %v603_v1  ;;  %v565_v48 = vld [vmem:[%s1023_s0 + $0xa0] sm:$0xff]   ;;  %v567_v54 = vld [vmem:[%s1023_s0 + $0xb0] sm:$0xff]  }
  0x1d   :  { %371 = vst [vmem:[%s1026_s3 + $0xb8] sm:$0xff] %v307_v51  ;;  %v177_v0 = vmul.f32 %v476_v56, %v603_v1  ;;  %v178_v2 = vmul.f32 %v477_v57, %v603_v1  ;;  %v244_v3 = vadd.f32 %v617_v7, %v173_v58  ;;  %v245_v4 = vadd.f32 %v617_v7, %v174_v59  ;;  %v568_v59 = vld [vmem:[%s1023_s0 + $0xb8] sm:$0xff]  }
  0x1e   :  { %v179_v5 = vmul.f32 %v480_v60, %v603_v1  ;;  %v180_v6 = vmul.f32 %v481_v61, %v603_v1  ;;  %v246_v8 = vadd.f32 %v617_v7, %v175_v62  ;;  %v247_v9 = vadd.f32 %v617_v7, %v176_v63 }
  0x1f   :  { %v248_v10 = vadd.f32 %v617_v7, %v177_v0  ;;  %v249_v11 = vadd.f32 %v617_v7, %v178_v2  ;;  %v308_v13 = vmax.f32 %v244_v3, 0.0  ;;  %v309_v14 = vmax.f32 %v245_v4, 0.0 }
  0x20   :  { %v250_v15 = vadd.f32 %v617_v7, %v179_v5  ;;  %v251_v16 = vadd.f32 %v617_v7, %v180_v6  ;;  %v310_v19 = vmax.f32 %v246_v8, 0.0  ;;  %v311_v20 = vmax.f32 %v247_v9, 0.0 }
  0x21   :  { %v312_v21 = vmax.f32 %v248_v10, 0.0  ;;  %v313_v22 = vmax.f32 %v249_v11, 0.0  ;;  %372 = vst [vmem:[%s1026_s3 + $0xc0] sm:$0xff] %v308_v13  ;;  %373 = vst [vmem:[%s1026_s3 + $0xc8] sm:$0xff] %v309_v14  ;;  %v484_v26 = vunpack.c.l.bf16 %v561_v12  ;;  %v485_v27 = vunpack.c.h.bf16 %v561_v12 }
  0x22   :  { %v314_v24 = vmax.f32 %v250_v15, 0.0  ;;  %v315_v25 = vmax.f32 %v251_v16, 0.0  ;;  %374 = vst [vmem:[%s1026_s3 + $0xd0] sm:$0xff] %v310_v19  ;;  %375 = vst [vmem:[%s1026_s3 + $0xd8] sm:$0xff] %v311_v20  ;;  %v488_v28 = vunpack.c.l.bf16 %v562_v17  ;;  %v489_v29 = vunpack.c.h.bf16 %v562_v17 }
  0x23   :  { %376 = vst [vmem:[%s1026_s3 + $0xe0] sm:$0xff] %v312_v21  ;;  %377 = vst [vmem:[%s1026_s3 + $0xe8] sm:$0xff] %v313_v22  ;;  %v492_v30 = vunpack.c.l.bf16 %v563_v18  ;;  %v493_v31 = vunpack.c.h.bf16 %v563_v18  ;;  %v181_v32 = vmul.f32 %v484_v26, %v603_v1  ;;  %v182_v33 = vmul.f32 %v485_v27, %v603_v1  ;;  %v569_v22 = vld [vmem:[%s1023_s0 + $0xc0] sm:$0xff]   ;;  %v570_v27 = vld [vmem:[%s1023_s0 + $0xc8] sm:$0xff]  }
  0x24   :  { %378 = vst [vmem:[%s1026_s3 + $0xf0] sm:$0xff] %v314_v24  ;;  %379 = vst [vmem:[%s1026_s3 + $0xf8] sm:$0xff] %v315_v25  ;;  %v496_v34 = vunpack.c.l.bf16 %v564_v23  ;;  %v497_v35 = vunpack.c.h.bf16 %v564_v23  ;;  %v183_v36 = vmul.f32 %v488_v28, %v603_v1  ;;  %v184_v37 = vmul.f32 %v489_v29, %v603_v1  ;;  %v571_v28 = vld [vmem:[%s1023_s0 + $0xd0] sm:$0xff]  }
  0x25   :  { %v185_v38 = vmul.f32 %v492_v30, %v603_v1  ;;  %v186_v39 = vmul.f32 %v493_v31, %v603_v1  ;;  %v252_v40 = vadd.f32 %v617_v7, %v181_v32  ;;  %v253_v41 = vadd.f32 %v617_v7, %v182_v33  ;;  %v572_v33 = vld [vmem:[%s1023_s0 + $0xd8] sm:$0xff]  }
  0x26   :  { %v187_v42 = vmul.f32 %v496_v34, %v603_v1  ;;  %v188_v43 = vmul.f32 %v497_v35, %v603_v1  ;;  %v254_v44 = vadd.f32 %v617_v7, %v183_v36  ;;  %v255_v45 = vadd.f32 %v617_v7, %v184_v37 }
  0x27   :  { %v256_v46 = vadd.f32 %v617_v7, %v185_v38  ;;  %v257_v47 = vadd.f32 %v617_v7, %v186_v39  ;;  %v316_v49 = vmax.f32 %v252_v40, 0.0  ;;  %v317_v50 = vmax.f32 %v253_v41, 0.0 }
  0x28   :  { %v258_v51 = vadd.f32 %v617_v7, %v187_v42  ;;  %v259_v52 = vadd.f32 %v617_v7, %v188_v43  ;;  %v318_v55 = vmax.f32 %v254_v44, 0.0  ;;  %v319_v56 = vmax.f32 %v255_v45, 0.0 }
  0x29   :  { %v320_v57 = vmax.f32 %v256_v46, 0.0  ;;  %v321_v58 = vmax.f32 %v257_v47, 0.0  ;;  %380 = vst [vmem:[%s1026_s3 + $0x100] sm:$0xff] %v316_v49  ;;  %381 = vst [vmem:[%s1026_s3 + $0x108] sm:$0xff] %v317_v50  ;;  %v500_v62 = vunpack.c.l.bf16 %v565_v48  ;;  %v501_v63 = vunpack.c.h.bf16 %v565_v48 }
  0x2a   :  { %v322_v60 = vmax.f32 %v258_v51, 0.0  ;;  %v323_v61 = vmax.f32 %v259_v52, 0.0  ;;  %382 = vst [vmem:[%s1026_s3 + $0x110] sm:$0xff] %v318_v55  ;;  %383 = vst [vmem:[%s1026_s3 + $0x118] sm:$0xff] %v319_v56  ;;  %v504_v0 = vunpack.c.l.bf16 %v566_v53  ;;  %v505_v2 = vunpack.c.h.bf16 %v566_v53 }
  0x2b   :  { %384 = vst [vmem:[%s1026_s3 + $0x120] sm:$0xff] %v320_v57  ;;  %385 = vst [vmem:[%s1026_s3 + $0x128] sm:$0xff] %v321_v58  ;;  %v508_v3 = vunpack.c.l.bf16 %v567_v54  ;;  %v509_v4 = vunpack.c.h.bf16 %v567_v54  ;;  %v189_v5 = vmul.f32 %v500_v62, %v603_v1  ;;  %v190_v6 = vmul.f32 %v501_v63, %v603_v1  ;;  %v573_v58 = vld [vmem:[%s1023_s0 + $0xe0] sm:$0xff]   ;;  %v574_v63 = vld [vmem:[%s1023_s0 + $0xe8] sm:$0xff]  }
  0x2c   :  { %386 = vst [vmem:[%s1026_s3 + $0x130] sm:$0xff] %v322_v60  ;;  %387 = vst [vmem:[%s1026_s3 + $0x138] sm:$0xff] %v323_v61  ;;  %v512_v8 = vunpack.c.l.bf16 %v568_v59  ;;  %v513_v9 = vunpack.c.h.bf16 %v568_v59  ;;  %v191_v10 = vmul.f32 %v504_v0, %v603_v1  ;;  %v192_v11 = vmul.f32 %v505_v2, %v603_v1  ;;  %v575_v0 = vld [vmem:[%s1023_s0 + $0xf0] sm:$0xff]  }
  0x2d   :  { %v193_v12 = vmul.f32 %v508_v3, %v603_v1  ;;  %v194_v13 = vmul.f32 %v509_v4, %v603_v1  ;;  %v260_v14 = vadd.f32 %v617_v7, %v189_v5  ;;  %v261_v15 = vadd.f32 %v617_v7, %v190_v6  ;;  %v576_v6 = vld [vmem:[%s1023_s0 + $0xf8] sm:$0xff]  }
  0x2e   :  { %v195_v16 = vmul.f32 %v512_v8, %v603_v1  ;;  %v196_v17 = vmul.f32 %v513_v9, %v603_v1  ;;  %v262_v18 = vadd.f32 %v617_v7, %v191_v10  ;;  %v263_v19 = vadd.f32 %v617_v7, %v192_v11 }
  0x2f   :  { %v264_v20 = vadd.f32 %v617_v7, %v193_v12  ;;  %v265_v21 = vadd.f32 %v617_v7, %v194_v13  ;;  %v324_v23 = vmax.f32 %v260_v14, 0.0  ;;  %v325_v24 = vmax.f32 %v261_v15, 0.0 }
  0x30   :  { %v266_v25 = vadd.f32 %v617_v7, %v195_v16  ;;  %v267_v26 = vadd.f32 %v617_v7, %v196_v17  ;;  %v326_v29 = vmax.f32 %v262_v18, 0.0  ;;  %v327_v30 = vmax.f32 %v263_v19, 0.0 }
  0x31   :  { %v328_v31 = vmax.f32 %v264_v20, 0.0  ;;  %v329_v32 = vmax.f32 %v265_v21, 0.0  ;;  %388 = vst [vmem:[%s1026_s3 + $0x140] sm:$0xff] %v324_v23  ;;  %389 = vst [vmem:[%s1026_s3 + $0x148] sm:$0xff] %v325_v24  ;;  %v516_v36 = vunpack.c.l.bf16 %v569_v22  ;;  %v517_v37 = vunpack.c.h.bf16 %v569_v22 }
  0x32   :  { %v330_v34 = vmax.f32 %v266_v25, 0.0  ;;  %v331_v35 = vmax.f32 %v267_v26, 0.0  ;;  %390 = vst [vmem:[%s1026_s3 + $0x150] sm:$0xff] %v326_v29  ;;  %391 = vst [vmem:[%s1026_s3 + $0x158] sm:$0xff] %v327_v30  ;;  %v520_v38 = vunpack.c.l.bf16 %v570_v27  ;;  %v521_v39 = vunpack.c.h.bf16 %v570_v27 }
  0x33   :  { %392 = vst [vmem:[%s1026_s3 + $0x160] sm:$0xff] %v328_v31  ;;  %393 = vst [vmem:[%s1026_s3 + $0x168] sm:$0xff] %v329_v32  ;;  %v524_v40 = vunpack.c.l.bf16 %v571_v28  ;;  %v525_v41 = vunpack.c.h.bf16 %v571_v28  ;;  %v197_v42 = vmul.f32 %v516_v36, %v603_v1  ;;  %v198_v43 = vmul.f32 %v517_v37, %v603_v1 }
  0x34   :  { %394 = vst [vmem:[%s1026_s3 + $0x170] sm:$0xff] %v330_v34  ;;  %395 = vst [vmem:[%s1026_s3 + $0x178] sm:$0xff] %v331_v35  ;;  %v528_v44 = vunpack.c.l.bf16 %v572_v33  ;;  %v529_v45 = vunpack.c.h.bf16 %v572_v33  ;;  %v199_v46 = vmul.f32 %v520_v38, %v603_v1  ;;  %v200_v47 = vmul.f32 %v521_v39, %v603_v1 }
  0x35   :  { %v201_v48 = vmul.f32 %v524_v40, %v603_v1  ;;  %v202_v49 = vmul.f32 %v525_v41, %v603_v1  ;;  %v268_v50 = vadd.f32 %v617_v7, %v197_v42  ;;  %v269_v51 = vadd.f32 %v617_v7, %v198_v43 }
  0x36   :  { %v203_v52 = vmul.f32 %v528_v44, %v603_v1  ;;  %v204_v53 = vmul.f32 %v529_v45, %v603_v1  ;;  %v270_v54 = vadd.f32 %v617_v7, %v199_v46  ;;  %v271_v55 = vadd.f32 %v617_v7, %v200_v47 }
  0x37   :  { %v272_v56 = vadd.f32 %v617_v7, %v201_v48  ;;  %v273_v57 = vadd.f32 %v617_v7, %v202_v49  ;;  %v332_v59 = vmax.f32 %v268_v50, 0.0  ;;  %v333_v60 = vmax.f32 %v269_v51, 0.0 }
  0x38   :  { %v274_v61 = vadd.f32 %v617_v7, %v203_v52  ;;  %v275_v62 = vadd.f32 %v617_v7, %v204_v53  ;;  %v334_v2 = vmax.f32 %v270_v54, 0.0  ;;  %v335_v3 = vmax.f32 %v271_v55, 0.0 }
  0x39   :  { %v336_v4 = vmax.f32 %v272_v56, 0.0  ;;  %v337_v5 = vmax.f32 %v273_v57, 0.0  ;;  %396 = vst [vmem:[%s1026_s3 + $0x180] sm:$0xff] %v332_v59  ;;  %397 = vst [vmem:[%s1026_s3 + $0x188] sm:$0xff] %v333_v60  ;;  %v532_v10 = vunpack.c.l.bf16 %v573_v58  ;;  %v533_v11 = vunpack.c.h.bf16 %v573_v58 }
  0x3a   :  { %v338_v8 = vmax.f32 %v274_v61, 0.0  ;;  %v339_v9 = vmax.f32 %v275_v62, 0.0  ;;  %398 = vst [vmem:[%s1026_s3 + $0x190] sm:$0xff] %v334_v2  ;;  %399 = vst [vmem:[%s1026_s3 + $0x198] sm:$0xff] %v335_v3  ;;  %v536_v12 = vunpack.c.l.bf16 %v574_v63  ;;  %v537_v13 = vunpack.c.h.bf16 %v574_v63 }
  0x3b   :  { %400 = vst [vmem:[%s1026_s3 + $0x1a0] sm:$0xff] %v336_v4  ;;  %401 = vst [vmem:[%s1026_s3 + $0x1a8] sm:$0xff] %v337_v5  ;;  %v540_v14 = vunpack.c.l.bf16 %v575_v0  ;;  %v541_v15 = vunpack.c.h.bf16 %v575_v0  ;;  %v205_v16 = vmul.f32 %v532_v10, %v603_v1  ;;  %v206_v17 = vmul.f32 %v533_v11, %v603_v1 }
  0x3c   :  { %402 = vst [vmem:[%s1026_s3 + $0x1b0] sm:$0xff] %v338_v8  ;;  %403 = vst [vmem:[%s1026_s3 + $0x1b8] sm:$0xff] %v339_v9  ;;  %v544_v18 = vunpack.c.l.bf16 %v576_v6  ;;  %v545_v19 = vunpack.c.h.bf16 %v576_v6  ;;  %v207_v20 = vmul.f32 %v536_v12, %v603_v1  ;;  %v208_v21 = vmul.f32 %v537_v13, %v603_v1 }
  0x3d   :  { %v209_v22 = vmul.f32 %v540_v14, %v603_v1  ;;  %v210_v23 = vmul.f32 %v541_v15, %v603_v1  ;;  %v276_v24 = vadd.f32 %v617_v7, %v205_v16  ;;  %v277_v25 = vadd.f32 %v617_v7, %v206_v17 }
  0x3e   :  { %v211_v26 = vmul.f32 %v544_v18, %v603_v1  ;;  %v212_v27 = vmul.f32 %v545_v19, %v603_v1  ;;  %v278_v28 = vadd.f32 %v617_v7, %v207_v20  ;;  %v279_v29 = vadd.f32 %v617_v7, %v208_v21 }
  0x3f   :  { %v280_v30 = vadd.f32 %v617_v7, %v209_v22  ;;  %v281_v31 = vadd.f32 %v617_v7, %v210_v23  ;;  %v340_v32 = vmax.f32 %v276_v24, 0.0  ;;  %v341_v33 = vmax.f32 %v277_v25, 0.0 }
  0x40   :  { %v282_v34 = vadd.f32 %v617_v7, %v211_v26  ;;  %v283_v35 = vadd.f32 %v617_v7, %v212_v27  ;;  %v342_v36 = vmax.f32 %v278_v28, 0.0  ;;  %v343_v37 = vmax.f32 %v279_v29, 0.0 }
  0x41   :  { %v344_v38 = vmax.f32 %v280_v30, 0.0  ;;  %v345_v39 = vmax.f32 %v281_v31, 0.0  ;;  %404 = vst [vmem:[%s1026_s3 + $0x1c0] sm:$0xff] %v340_v32  ;;  %405 = vst [vmem:[%s1026_s3 + $0x1c8] sm:$0xff] %v341_v33 }
  0x42   :  { %v346_v1 = vmax.f32 %v282_v34, 0.0  ;;  %v347_v40 = vmax.f32 %v283_v35, 0.0  ;;  %406 = vst [vmem:[%s1026_s3 + $0x1d0] sm:$0xff] %v342_v36  ;;  %407 = vst [vmem:[%s1026_s3 + $0x1d8] sm:$0xff] %v343_v37 }
  0x43   :  { %408 = vst [vmem:[%s1026_s3 + $0x1e0] sm:$0xff] %v344_v38  ;;  %409 = vst [vmem:[%s1026_s3 + $0x1e8] sm:$0xff] %v345_v39 }
  0x44   :  { %410 = vst [vmem:[%s1026_s3 + $0x1f0] sm:$0xff] %v346_v1  ;;  %411 = vst [vmem:[%s1026_s3 + $0x1f8] sm:$0xff] %v347_v40 }

// kernel: conv_bn_relu_forward.2
= control target key start
LH: loop header
LB: loop body
LE: loop exit
PB: predicated region body
PF: predicated region fallthrough
CT: control target
= control target key end

     0   :  { %s4856_s15 = smov 0   ;;  %s4858_s16 = smov 0   ;;  %s6359_s0 = inlined_call_operand.vmem [shape: bf16[2,18,18,4], index: 0, kind: input, shape index: {}]   ;;  %s6360_s1 = inlined_call_operand.vmem [shape: bf16[36,128], index: 1, kind: input, shape index: {}]   ;;  %s6361_s2 = inlined_call_operand.vmem [shape: bf16[2,256,128], index: 2, kind: output, shape index: {0}]   ;;  %s6362_s3 = inlined_call_operand.vmem [shape: f32[2,1,128], index: 3, kind: output, shape index: {1}]   ;;  %s6363_s4 = inlined_call_operand.vmem [shape: f32[2,1,128], index: 4, kind: output, shape index: {2}]  }
   0x1   :  { %s4860_s17 = smov 0  }
   0x2 LB: > { %s27_s18 = sadd.s32 1, %s4817_s16  ;;  %p4177_p0 = scmp.ge.s32.totalorder %s4821_s17, 1  ;;  %s4821_s17 = sphi %s4860_s17, %s15_s17   ;;  %s4817_s16 = sphi %s4858_s16, %s6369_s16   ;;  %s4813_s15 = sphi %s4856_s15, %s6368_s15  }
   0x3   : > { %p29_p1 = scmp.ge.s32.totalorder %s27_s18, 2  ;;  %p185_p2 = scmp.lt.s32.totalorder %s4821_s17, 3 }
   0x5   : > { %s6371_s18 = smov (%p29_p1, %s27_s18), 0  ;;  %p186_p3 = pnand %p4177_p0, %p185_p2 }
   0x6   : > { %p223_p4 = scmp.lt.s32.totalorder (!%p186_p3), %s4813_s15, 1  ;;  %s4823_s23 = smov (!%p186_p3), 4  }
   0x7   : > { %189 = sbr.rel (%p186_p3) target bundleno = 878 (0x36e), region = 28  ;;  %s4824_s24 = smov (!%p186_p3), 8  }
   0x8   : > { %s4825_s25 = smov (!%p186_p3), 12   ;;  %s4826_s26 = smov (!%p186_p3), 16  }
   0x9   : > { %s4827_s27 = smov (!%p186_p3), 20   ;;  %s4828_s28 = smov (!%p186_p3), 24  }
   0xa   : > { %s4829_s7 = smov (!%p186_p3), 28   ;;  %s4830_s10 = smov (!%p186_p3), 32  }
   0xc   : > { %s6373_s15 = smov (!%p223_p4, %s4813_s15), 1  ;;  %vm366_vm0 = vsmask.f32 3328  ;;  %vm367_vm1 = vsmask.f32 7440  ;;  %vm285_vm3 = vcmask 27648  }
   0xd   : > { %s4747_s19 = smul.u32 216, %s6373_s15  ;;  %vm4891_vm2 = vmor %vm366_vm0, %vm367_vm1  ;;  %vm978_vm4 = vcmask 1042432   ;;  %vm979_vm5 = vcmask 1046532   ;;  %vm849_vm7 = vcmask 60448   ;;  %vm1189_vm8 = vcmask 93248   ;;  %s4554_s11 = sshll.u32 %s6373_s15, 7 }
   0xe   : > { %vm5035_vm6 = vmor %vm978_vm4, %vm979_vm5  ;;  %vm3593_vm9 = vcmask 1041408   ;;  %vm1386_vm10 = vcmask 126048   ;;  %vm1947_vm11 = vcmask 158848   ;;  %vm2284_vm12 = vcmask 191648   ;;  %s6266_s14 = scalar_lea.vmem %s6361_s2, %s4554_s11  ;;  %s241_s21 = scalar_lea.vmem %s6362_s3, %s6373_s15 }
   0xf   : > { %s4880_s22 = scalar_lea.vmem %s6359_s0, %s4747_s19  ;;  %vm2481_vm13 = vcmask 224448   ;;  %vm3042_vm14 = vcmask 257248   ;;  %vm3379_vm15 = vcmask 290048   ;;  %vm3544_vm0 = vcmask 293888  }
  0x10   : > { %v321_v0 = vld [vmem:[%s4880_s22 + $0xc] sm:$0xf]  ;;  %v322_v1 = vld [vmem:[%s4880_s22 + $0x10] sm:$0xf]  ;;  %v318_v2 = vld [vmem:[%s4880_s22] sm:$0xf] }
  0x11   : > { %v394_v3 = vshrl.u32 %v321_v0, 16  ;;  %v397_v4 = vshll.u32 %v321_v0, 16  ;;  %v403_v5 = vshll.u32 %v322_v1, 16  ;;  %v407_v6 = vshrl.u32 %v322_v1, 16  ;;  %v319_v7 = vld [vmem:[%s4880_s22 + $0x4] sm:$0xf] }
  0x12   : > { %v370_v8 = vshrl.u32 %v318_v2, 16  ;;  %v373_v9 = vshll.u32 %v318_v2, 16  ;;  %v379_v10 = vshll.u32 %v319_v7, 16  ;;  %v383_v11 = vshrl.u32 %v319_v7, 16  ;;  %v323_v12 = vld [vmem:[%s4880_s22 + $0x14] sm:$0x1] }
  0x13   : > { %v396_v13 = vrot.slane %v394_v3, 4  ;;  %v399_v14 = vrot.slane %v397_v4, 5  ;;  %v405_v15 = vrot.slane %v403_v5, 5  ;;  %v409_v16 = vrot.slane %v407_v6, 4  ;;  %v320_v17 = vld [vmem:[%s4880_s22 + $0x8] sm:$0x1] }
  0x14   : > { %v372_v18 = vrot.slane %v370_v8, 4  ;;  %v375_v19 = vrot.slane %v373_v9, 5  ;;  %v381_v20 = vrot.slane %v379_v10, 5  ;;  %v385_v21 = vrot.slane %v383_v11, 4  ;;  %v325_v22 = vld [vmem:[%s4880_s22 + $0x1c] sm:$0xf] }
  0x15   : > { %v400_v23 = vor.u32 %v399_v14, %v396_v13  ;;  %v410_v24 = vor.u32 %v409_v16, %v405_v15  ;;  %v413_v25 = vshll.u32 %v323_v12, 16  ;;  %v389_v26 = vshll.u32 %v320_v17, 16  ;;  %v326_v30 = vld [vmem:[%s4880_s22 + $0x20] sm:$0x1]  ;;  %v324_v33 = vld [vmem:[%s4880_s22 + $0x18] sm:$0xf] }
  0x16   : > { %v376_v28 = vor.u32 %v375_v19, %v372_v18  ;;  %v386_v29 = vor.u32 %v385_v21, %v381_v20  ;;  %v427_v31 = vshll.u32 %v325_v22, 16  ;;  %v431_v32 = vshrl.u32 %v325_v22, 16  ;;  %v328_v42 = vld [vmem:[%s4880_s22 + $0x28] sm:$0xf]  ;;  %v329_v47 = vld [vmem:[%s4880_s22 + $0x2c] sm:$0x1] }
  0x17   : > { %v401_v34 = vrot.slane %v400_v23, 4  ;;  %v411_v35 = vrot.slane %v410_v24, 4  ;;  %v415_v36 = vrot.slane %v413_v25, 5  ;;  %v391_v37 = vrot.slane %v389_v26, 5  ;;  %v327_v48 = vld [vmem:[%s4880_s22 + $0x24] sm:$0xf] }
  0x18   : > { %v377_v38 = vrot.slane %v376_v28, 4  ;;  %v387_v39 = vrot.slane %v386_v29, 4  ;;  %v429_v40 = vrot.slane %v427_v31, 5  ;;  %v433_v41 = vrot.slane %v431_v32, 4  ;;  %v331_v53 = vld [vmem:[%s4880_s22 + $0x34] sm:$0xf] }
  0x19   : > { %v406_v43 = vsel %vm4891_vm2, %v401_v34, %v405_v15  ;;  %v416_v44 = vsel %vm4891_vm2, %v411_v35, %v415_v36  ;;  %v437_v45 = vshll.u32 %v326_v30, 16  ;;  %v418_v46 = vshrl.u32 %v324_v33, 16  ;;  %v332_v62 = vld [vmem:[%s4880_s22 + $0x38] sm:$0x1]  ;;  %v330_v3 = vld [vmem:[%s4880_s22 + $0x30] sm:$0xf] }
  0x1a   : > { %757 = vrot.lane.b32.xlu1 %v406_v43, %s4823_s23  ;;  %v382_v49 = vsel %vm4891_vm2, %v377_v38, %v381_v20  ;;  %v392_v50 = vsel %vm4891_vm2, %v387_v39, %v391_v37  ;;  %v434_v51 = vor.u32 %v433_v41, %v429_v40  ;;  %v421_v52 = vshll.u32 %v324_v33, 16  ;;  %v334_v8 = vld [vmem:[%s4880_s22 + $0x40] sm:$0xf]  ;;  %v335_v17 = vld [vmem:[%s4880_s22 + $0x44] sm:$0x1] }
  0x1b   : > { %753 = vrot.lane.b32.xlu0 %v382_v49, %s4823_s23  ;;  %v439_v54 = vrot.slane %v437_v45, 5  ;;  %v420_v55 = vrot.slane %v418_v46, 4  ;;  %v451_v56 = vshll.u32 %v328_v42, 16  ;;  %v455_v57 = vshrl.u32 %v328_v42, 16  ;;  %v333_v22 = vld [vmem:[%s4880_s22 + $0x3c] sm:$0xf] }
  0x1c   : > { %v435_v58 = vrot.slane %v434_v51, 4  ;;  %v423_v59 = vrot.slane %v421_v52, 5  ;;  %v461_v60 = vshll.u32 %v329_v47, 16  ;;  %v442_v61 = vshrl.u32 %v327_v48, 16  ;;  %v337_v28 = vld [vmem:[%s4880_s22 + $0x4c] sm:$0xf] }
  0x1d   : > { %v453_v63 = vrot.slane %v451_v56, 5  ;;  %v457_v0 = vrot.slane %v455_v57, 4  ;;  %v445_v1 = vshll.u32 %v327_v48, 16  ;;  %v475_v2 = vshll.u32 %v331_v53, 16  ;;  %v338_v37 = vld [vmem:[%s4880_s22 + $0x50] sm:$0x1] }
  0x1e   : > { %759 = vrot.lane.b32.xlu1 %v416_v44, %s4823_s23  ;;  %v440_v4 = vsel %vm4891_vm2, %v435_v58, %v439_v54  ;;  %v424_v5 = vor.u32 %v423_v59, %v420_v55  ;;  %v463_v6 = vrot.slane %v461_v60, 5  ;;  %v444_v7 = vrot.slane %v442_v61, 4  ;;  %v336_v42 = vld [vmem:[%s4880_s22 + $0x48] sm:$0xf]  ;;  %v340_v47 = vld [vmem:[%s4880_s22 + $0x58] sm:$0xf] }
  0x1f   : > { %755 = vrot.lane.b32.xlu0 %v392_v50, %s4823_s23  ;;  %v458_v9 = vor.u32 %v457_v0, %v453_v63  ;;  %v447_v10 = vrot.slane %v445_v1, 5  ;;  %v477_v11 = vrot.slane %v475_v2, 5  ;;  %v479_v12 = vshrl.u32 %v331_v53, 16  ;;  %v341_v56 = vld [vmem:[%s4880_s22 + $0x5c] sm:$0x1] }
  0x20   : > { %v425_v13 = vrot.slane %v424_v5, 4  ;;  %v485_v14 = vshll.u32 %v332_v62, 16  ;;  %v466_v15 = vshrl.u32 %v330_v3, 16  ;;  %v469_v16 = vshll.u32 %v330_v3, 16  ;;  %v339_v61 = vld [vmem:[%s4880_s22 + $0x54] sm:$0xf] }
  0x21   : > { %v459_v18 = vrot.slane %v458_v9, 4  ;;  %v448_v19 = vor.u32 %v447_v10, %v444_v7  ;;  %v481_v20 = vrot.slane %v479_v12, 4  ;;  %v499_v21 = vshll.u32 %v334_v8, 16 }
  0x22   : > { %763 = vrot.lane.b32.xlu1 %v440_v4, %s4823_s23  ;;  %v430_v23 = vsel %vm4891_vm2, %v425_v13, %v429_v40  ;;  %v487_v24 = vrot.slane %v485_v14, 5  ;;  %v468_v25 = vrot.slane %v466_v15, 4  ;;  %v471_v26 = vrot.slane %v469_v16, 5  ;;  %v344_v15 = vld [vmem:[%s4880_s22 + $0x68] sm:$0x1] }
  0x23   : > { %761 = vrot.lane.b32.xlu0 %v430_v23, %s4823_s23  ;;  %v464_v29 = vsel %vm4891_vm2, %v459_v18, %v463_v6  ;;  %v449_v30 = vrot.slane %v448_v19, 4  ;;  %v482_v31 = vor.u32 %v481_v20, %v477_v11  ;;  %v501_v32 = vrot.slane %v499_v21, 5  ;;  %v343_v6 = vld [vmem:[%s4880_s22 + $0x64] sm:$0xf]  ;;  %v342_v16 = vld [vmem:[%s4880_s22 + $0x60] sm:$0xf] }
  0x24   : > { %v472_v33 = vor.u32 %v471_v26, %v468_v25  ;;  %v503_v34 = vshrl.u32 %v334_v8, 16  ;;  %v509_v35 = vshll.u32 %v335_v17, 16  ;;  %v490_v36 = vshrl.u32 %v333_v22, 16  ;;  %v346_v25 = vld [vmem:[%s4880_s22 + $0x70] sm:$0xf] }
  0x25   : > { %v454_v38 = vsel %vm4891_vm2, %v449_v30, %v453_v63  ;;  %v483_v39 = vrot.slane %v482_v31, 4  ;;  %v493_v40 = vshll.u32 %v333_v22, 16  ;;  %v523_v41 = vshll.u32 %v337_v28, 16 }
  0x26   : > { %767 = vrot.lane.b32.xlu1 %v464_v29, %s4823_s23  ;;  %v473_v43 = vrot.slane %v472_v33, 4  ;;  %v505_v44 = vrot.slane %v503_v34, 4  ;;  %v511_v45 = vrot.slane %v509_v35, 5  ;;  %v492_v46 = vrot.slane %v490_v36, 4  ;;  %v347_v35 = vld [vmem:[%s4880_s22 + $0x74] sm:$0x1] }
  0x27   : > { %765 = vrot.lane.b32.xlu0 %v454_v38, %s4823_s23  ;;  %v488_v48 = vsel %vm4891_vm2, %v483_v39, %v487_v24  ;;  %v495_v49 = vrot.slane %v493_v40, 5  ;;  %v525_v50 = vrot.slane %v523_v41, 5  ;;  %v527_v51 = vshrl.u32 %v337_v28, 16  ;;  %v345_v36 = vld [vmem:[%s4880_s22 + $0x6c] sm:$0xf] }
  0x28   : > { %v478_v52 = vsel %vm4891_vm2, %v473_v43, %v477_v11  ;;  %v506_v53 = vor.u32 %v505_v44, %v501_v32  ;;  %v533_v54 = vshll.u32 %v338_v37, 16  ;;  %v514_v55 = vshrl.u32 %v336_v42, 16 }
  0x29   : > { %v496_v57 = vor.u32 %v495_v49, %v492_v46  ;;  %v529_v58 = vrot.slane %v527_v51, 4  ;;  %v517_v59 = vshll.u32 %v336_v42, 16  ;;  %v547_v60 = vshll.u32 %v340_v47, 16 }
  0x2a   : > { %771 = vrot.lane.b32.xlu1 %v488_v48, %s4823_s23  ;;  %v507_v62 = vrot.slane %v506_v53, 4  ;;  %v535_v63 = vrot.slane %v533_v54, 5  ;;  %v516_v0 = vrot.slane %v514_v55, 4  ;;  %v551_v1 = vshrl.u32 %v340_v47, 16  ;;  %v350_v54 = vld [vmem:[%s4880_s22 + $0x80] sm:$0x1] }
  0x2b   : > { %769 = vrot.lane.b32.xlu0 %v478_v52, %s4823_s23  ;;  %v497_v2 = vrot.slane %v496_v57, 4  ;;  %v530_v3 = vor.u32 %v529_v58, %v525_v50  ;;  %v519_v4 = vrot.slane %v517_v59, 5  ;;  %v549_v5 = vrot.slane %v547_v60, 5  ;;  %v348_v55 = vld [vmem:[%s4880_s22 + $0x78] sm:$0xf] }
  0x2c   : > { %v512_v7 = vsel %vm4891_vm2, %v507_v62, %v511_v45  ;;  %v553_v8 = vrot.slane %v551_v1, 4  ;;  %v557_v9 = vshll.u32 %v341_v56, 16  ;;  %v538_v10 = vshrl.u32 %v339_v61, 16  ;;  %v349_v45 = vld [vmem:[%s4880_s22 + $0x7c] sm:$0xf] }
  0x2d   : > { %v502_v11 = vsel %vm4891_vm2, %v497_v2, %v501_v32  ;;  %v531_v12 = vrot.slane %v530_v3, 4  ;;  %v520_v13 = vor.u32 %v519_v4, %v516_v0  ;;  %v541_v14 = vshll.u32 %v339_v61, 16  ;;  %v352_v0 = vld [vmem:[%s4880_s22 + $0x88] sm:$0xf] }
  0x2e   : > { %775 = vrot.lane.b32.xlu1 %v512_v7, %s4823_s23  ;;  %v554_v17 = vor.u32 %v553_v8, %v549_v5  ;;  %v559_v18 = vrot.slane %v557_v9, 5  ;;  %v540_v19 = vrot.slane %v538_v10, 4  ;;  %v571_v20 = vshll.u32 %v343_v6, 16  ;;  %v351_v10 = vld [vmem:[%s4880_s22 + $0x84] sm:$0xf] }
  0x2f   : > { %773 = vrot.lane.b32.xlu0 %v502_v11, %s4823_s23  ;;  %v536_v21 = vsel %vm4891_vm2, %v531_v12, %v535_v63  ;;  %v521_v22 = vrot.slane %v520_v13, 4  ;;  %v543_v23 = vrot.slane %v541_v14, 5  ;;  %v575_v24 = vshrl.u32 %v343_v6, 16 }
  0x30   : > { %v555_v26 = vrot.slane %v554_v17, 4  ;;  %v573_v28 = vrot.slane %v571_v20, 5  ;;  %v581_v29 = vshll.u32 %v344_v15, 16  ;;  %v562_v30 = vshrl.u32 %v342_v16, 16 }
  0x31   : > { %v526_v31 = vsel %vm4891_vm2, %v521_v22, %v525_v50  ;;  %v544_v32 = vor.u32 %v543_v23, %v540_v19  ;;  %v577_v33 = vrot.slane %v575_v24, 4  ;;  %v565_v34 = vshll.u32 %v342_v16, 16  ;;  %v355_v19 = vld [vmem:[%s4880_s22 + $0x94] sm:$0xf]  ;;  %v356_v24 = vld [vmem:[%s4880_s22 + $0x98] sm:$0x1] }
  0x32   : > { %779 = vrot.lane.b32.xlu1 %v536_v21, %s4823_s23  ;;  %v560_v37 = vsel %vm4891_vm2, %v555_v26, %v559_v18  ;;  %v583_v38 = vrot.slane %v581_v29, 5  ;;  %v564_v39 = vrot.slane %v562_v30, 4  ;;  %v595_v40 = vshll.u32 %v346_v25, 16  ;;  %v354_v30 = vld [vmem:[%s4880_s22 + $0x90] sm:$0xf] }
  0x33   : > { %777 = vrot.lane.b32.xlu0 %v526_v31, %s4823_s23  ;;  %v545_v41 = vrot.slane %v544_v32, 4  ;;  %v578_v42 = vor.u32 %v577_v33, %v573_v28  ;;  %v567_v43 = vrot.slane %v565_v34, 5  ;;  %v599_v44 = vshrl.u32 %v346_v25, 16 }
  0x34   : > { %v597_v46 = vrot.slane %v595_v40, 5  ;;  %v605_v47 = vshll.u32 %v347_v35, 16  ;;  %v586_v48 = vshrl.u32 %v345_v36, 16  ;;  %v589_v49 = vshll.u32 %v345_v36, 16 }
  0x35   : > { %v550_v50 = vsel %vm4891_vm2, %v545_v41, %v549_v5  ;;  %v579_v51 = vrot.slane %v578_v42, 4  ;;  %v568_v52 = vor.u32 %v567_v43, %v564_v39  ;;  %v601_v53 = vrot.slane %v599_v44, 4  ;;  %v353_v5 = vld [vmem:[%s4880_s22 + $0x8c] sm:$0x1]  ;;  %v358_v39 = vld [vmem:[%s4880_s22 + $0xa0] sm:$0xf] }
  0x36   : > { %783 = vrot.lane.b32.xlu1 %v560_v37, %s4823_s23  ;;  %v607_v56 = vrot.slane %v605_v47, 5  ;;  %v588_v57 = vrot.slane %v586_v48, 4  ;;  %v591_v58 = vrot.slane %v589_v49, 5  ;;  %v619_v59 = vshll.u32 %v349_v45, 16  ;;  %v359_v48 = vld [vmem:[%s4880_s22 + $0xa4] sm:$0x1] }
  0x37   : > { %781 = vrot.lane.b32.xlu0 %v550_v50, %s4823_s23  ;;  %v584_v60 = vsel %vm4891_vm2, %v579_v51, %v583_v38  ;;  %v569_v61 = vrot.slane %v568_v52, 4  ;;  %v602_v62 = vor.u32 %v601_v53, %v597_v46  ;;  %v623_v63 = vshrl.u32 %v349_v45, 16  ;;  %v357_v49 = vld [vmem:[%s4880_s22 + $0x9c] sm:$0xf] }
  0x38   : > { %v592_v1 = vor.u32 %v591_v58, %v588_v57  ;;  %v621_v2 = vrot.slane %v619_v59, 5  ;;  %v629_v3 = vshll.u32 %v350_v54, 16  ;;  %v610_v4 = vshrl.u32 %v348_v55, 16  ;;  %v361_v58 = vld [vmem:[%s4880_s22 + $0xac] sm:$0xf] }
  0x39   : > { %v574_v6 = vsel %vm4891_vm2, %v569_v61, %v573_v28  ;;  %v603_v7 = vrot.slane %v602_v62, 4  ;;  %v625_v8 = vrot.slane %v623_v63, 4  ;;  %v613_v9 = vshll.u32 %v348_v55, 16 }
  0x3a   : > { %787 = vrot.lane.b32.xlu1 %v584_v60, %s4823_s23  ;;  %v593_v11 = vrot.slane %v592_v1, 4  ;;  %v631_v12 = vrot.slane %v629_v3, 5  ;;  %v612_v13 = vrot.slane %v610_v4, 4  ;;  %v643_v14 = vshll.u32 %v352_v0, 16  ;;  %v362_v3 = vld [vmem:[%s4880_s22 + $0xb0] sm:$0x1] }
  0x3b   : > { %785 = vrot.lane.b32.xlu0 %v574_v6, %s4823_s23  ;;  %v608_v15 = vsel %vm4891_vm2, %v603_v7, %v607_v56  ;;  %v626_v16 = vor.u32 %v625_v8, %v621_v2  ;;  %v615_v17 = vrot.slane %v613_v9, 5  ;;  %v647_v18 = vshrl.u32 %v352_v0, 16  ;;  %v360_v4 = vld [vmem:[%s4880_s22 + $0xa8] sm:$0xf] }
  0x3c   : > { %v598_v20 = vsel %vm4891_vm2, %v593_v11, %v597_v46  ;;  %v645_v21 = vrot.slane %v643_v14, 5  ;;  %v653_v22 = vshll.u32 %v353_v5, 16  ;;  %v634_v23 = vshrl.u32 %v351_v10, 16 }
  0x3d   : > { %v627_v25 = vrot.slane %v626_v16, 4  ;;  %v616_v26 = vor.u32 %v615_v17, %v612_v13  ;;  %v649_v28 = vrot.slane %v647_v18, 4  ;;  %v637_v29 = vshll.u32 %v351_v10, 16  ;;  %v364_v13 = vld [vmem:[%s4880_s22 + $0xb8] sm:$0xf] }
  0x3e   : > { %791 = vrot.lane.b32.xlu1 %v608_v15, %s4823_s23  ;;  %v655_v31 = vrot.slane %v653_v22, 5  ;;  %v636_v32 = vrot.slane %v634_v23, 4  ;;  %v667_v33 = vshll.u32 %v355_v19, 16  ;;  %v671_v34 = vshrl.u32 %v355_v19, 16  ;;  %v365_v22 = vld [vmem:[%s4880_s22 + $0xbc] sm:$0x1] }
  0x3f   : > { %789 = vrot.lane.b32.xlu0 %v598_v20, %s4823_s23  ;;  %v632_v35 = vsel %vm4891_vm2, %v627_v25, %v631_v12  ;;  %v617_v36 = vrot.slane %v616_v26, 4  ;;  %v650_v37 = vor.u32 %v649_v28, %v645_v21  ;;  %v639_v38 = vrot.slane %v637_v29, 5  ;;  %v363_v23 = vld [vmem:[%s4880_s22 + $0xb4] sm:$0xf] }
  0x40   : > { %v669_v40 = vrot.slane %v667_v33, 5  ;;  %v673_v41 = vrot.slane %v671_v34, 4  ;;  %v677_v42 = vshll.u32 %v356_v24, 16  ;;  %v658_v43 = vshrl.u32 %v354_v30, 16 }
  0x41   : > { %v622_v44 = vsel %vm4891_vm2, %v617_v36, %v621_v2  ;;  %v651_v45 = vrot.slane %v650_v37, 4  ;;  %v640_v46 = vor.u32 %v639_v38, %v636_v32  ;;  %v661_v47 = vshll.u32 %v354_v30, 16  ;;  %v883_v37 = vld [vmem:[%s4880_s22 + $0x4] sm:$0xf] }
  0x42   : > { %795 = vrot.lane.b32.xlu1 %v632_v35, %s4823_s23  ;;  %v674_v50 = vor.u32 %v673_v41, %v669_v40  ;;  %v679_v51 = vrot.slane %v677_v42, 5  ;;  %v660_v52 = vrot.slane %v658_v43, 4  ;;  %v691_v53 = vshll.u32 %v358_v39, 16 }
  0x43   : > { %793 = vrot.lane.b32.xlu0 %v622_v44, %s4823_s23  ;;  %v656_v54 = vsel %vm4891_vm2, %v651_v45, %v655_v31  ;;  %v641_v55 = vrot.slane %v640_v46, 4  ;;  %v663_v56 = vrot.slane %v661_v47, 5  ;;  %v695_v57 = vshrl.u32 %v358_v39, 16 }
  0x44   : > { %v675_v59 = vrot.slane %v674_v50, 4  ;;  %v693_v60 = vrot.slane %v691_v53, 5  ;;  %v701_v61 = vshll.u32 %v359_v48, 16  ;;  %v682_v62 = vshrl.u32 %v357_v49, 16  ;;  %v884_v48 = vld [vmem:[%s4880_s22 + $0x8] sm:$0x1] }
  0x45   : > { %v646_v63 = vsel %vm4891_vm2, %v641_v55, %v645_v21  ;;  %v664_v0 = vor.u32 %v663_v56, %v660_v52  ;;  %v697_v1 = vrot.slane %v695_v57, 4  ;;  %v685_v2 = vshll.u32 %v357_v49, 16  ;;  %v255_v56 = vld [vmem:[%s4880_s22 + $0xc] sm:$0xf] }
  0x46   : > { %799 = vrot.lane.b32.xlu1 %v656_v54, %s4823_s23  ;;  %v680_v5 = vsel %vm4891_vm2, %v675_v59, %v679_v51  ;;  %v703_v6 = vrot.slane %v701_v61, 5  ;;  %v684_v7 = vrot.slane %v682_v62, 4  ;;  %v715_v8 = vshll.u32 %v361_v58, 16  ;;  %v886_v51 = vld [vmem:[%s4880_s22 + $0x10] sm:$0xf] }
  0x47   : > { %797 = vrot.lane.b32.xlu0 %v646_v63, %s4823_s23  ;;  %v665_v9 = vrot.slane %v664_v0, 4  ;;  %v698_v10 = vor.u32 %v697_v1, %v693_v60  ;;  %v687_v11 = vrot.slane %v685_v2, 5  ;;  %v719_v12 = vshrl.u32 %v361_v58, 16  ;;  %v882_v54 = vld [vmem:[%s4880_s22] sm:$0xe] }
  0x48   : > { %v717_v14 = vrot.slane %v715_v8, 5  ;;  %v725_v15 = vshll.u32 %v362_v3, 16  ;;  %v706_v16 = vshrl.u32 %v360_v4, 16  ;;  %v709_v17 = vshll.u32 %v360_v4, 16  ;;  %288 = vst.msk [vmem:[#allocation2 + $0x8] sm:$0xf] %vm285_vm3, %v255_v56 }
  0x49   : > { %v670_v18 = vsel %vm4891_vm2, %v665_v9, %v669_v40  ;;  %v699_v19 = vrot.slane %v698_v10, 4  ;;  %v688_v20 = vor.u32 %v687_v11, %v684_v7  ;;  %v721_v21 = vrot.slane %v719_v12, 4  ;;  %v253_v61 = vld [vmem:[%s4880_s22] sm:$0xf]  ;;  %v887_v0 = vld [vmem:[%s4880_s22 + $0x14] sm:$0x1] }
  0x4a   : > { %803 = vrot.lane.b32.xlu1 %v680_v5, %s4823_s23  ;;  %v727_v24 = vrot.slane %v725_v15, 5  ;;  %v708_v25 = vrot.slane %v706_v16, 4  ;;  %v711_v26 = vrot.slane %v709_v17, 5  ;;  %v739_v28 = vshll.u32 %v364_v13, 16  ;;  %v889_v1 = vld [vmem:[%s4880_s22 + $0x1c] sm:$0xf] }
  0x4b   : > { %801 = vrot.lane.b32.xlu0 %v670_v18, %s4823_s23  ;;  %v704_v29 = vsel %vm4891_vm2, %v699_v19, %v703_v6  ;;  %v689_v30 = vrot.slane %v688_v20, 4  ;;  %v722_v31 = vor.u32 %v721_v21, %v717_v14  ;;  %v743_v32 = vshrl.u32 %v364_v13, 16  ;;  %286 = vst.msk [vmem:[#allocation2] sm:$0xf] %vm285_vm3, %v253_v61  ;;  %v885_v3 = vld [vmem:[%s4880_s22 + $0xc] sm:$0xe] }
  0x4c   : > { %v712_v33 = vor.u32 %v711_v26, %v708_v25  ;;  %v741_v34 = vrot.slane %v739_v28, 5  ;;  %v749_v35 = vshll.u32 %v365_v22, 16  ;;  %v730_v36 = vshrl.u32 %v363_v23, 16  ;;  %v256_v4 = vld [vmem:[%s4880_s22 + $0x10] sm:$0xf] }
  0x4d   : > { %v694_v38 = vsel %vm4891_vm2, %v689_v30, %v693_v60  ;;  %v723_v39 = vrot.slane %v722_v31, 4  ;;  %v745_v40 = vrot.slane %v743_v32, 4  ;;  %v733_v41 = vshll.u32 %v363_v23, 16  ;;  %v254_v5 = vld [vmem:[%s4880_s22 + $0x4] sm:$0xf] }
  0x4e   : > { %807 = vrot.lane.b32.xlu1 %v704_v29, %s4823_s23  ;;  %v713_v42 = vrot.slane %v712_v33, 4  ;;  %v751_v43 = vrot.slane %v749_v35, 5  ;;  %v732_v44 = vrot.slane %v730_v36, 4  ;;  %v983_v49 = vrot.slane %v883_v37, 5  ;;  %289 = vst.msk [vmem:[#allocation2 + $0xc] sm:$0xf] %vm285_vm3, %v256_v4 }
  0x4f   : > { %805 = vrot.lane.b32.xlu0 %v694_v38, %s4823_s23  ;;  %v728_v45 = vsel %vm4891_vm2, %v723_v39, %v727_v24  ;;  %v746_v46 = vor.u32 %v745_v40, %v741_v34  ;;  %v735_v47 = vrot.slane %v733_v41, 5  ;;  %v986_v55 = vrot.slane %v884_v48, 5  ;;  %287 = vst.msk [vmem:[#allocation2 + $0x4] sm:$0xf] %vm285_vm3, %v254_v5  ;;  %v890_v12 = vld [vmem:[%s4880_s22 + $0x20] sm:$0x1] }
  0x50   : > { %v718_v50 = vsel %vm4891_vm2, %v713_v42, %v717_v14  ;;  %v985_v59 = vrot.slane %v983_v49, 4  ;;  %v990_v60 = vrot.slane %v886_v51, 5  ;;  %v4181_v63 = vrot.slane %v882_v54, 9  ;;  %v892_v13 = vld [vmem:[%s4880_s22 + $0x28] sm:$0xf] }
  0x51   : > { %v747_v52 = vrot.slane %v746_v46, 4  ;;  %v736_v53 = vor.u32 %v735_v47, %v732_v44  ;;  %v993_v8 = vrot.slane %v887_v0, 5  ;;  %v997_v9 = vrot.slane %v889_v1, 5  ;;  %v888_v14 = vld [vmem:[%s4880_s22 + $0x18] sm:$0xe] }
  0x52   : > { %811 = vrot.lane.b32.xlu1 %v728_v45, %s4823_s23  ;;  %v987_v6 = vsel %vm5035_vm6, %v985_v59, %v986_v55  ;;  %v992_v7 = vrot.slane %v990_v60, 4  ;;  %v984_v10 = vsel %vm5035_vm6, %v4181_v63, %v983_v49  ;;  %v4182_v11 = vrot.slane %v885_v3, 9  ;;  %v258_v15 = vld [vmem:[%s4880_s22 + $0x1c] sm:$0xf]  ;;  %v257_v16 = vld [vmem:[%s4880_s22 + $0x18] sm:$0xf] }
  0x53   : > { %809 = vrot.lane.b32.xlu0 %v718_v50, %s4823_s23  ;;  %v752_v57 = vsel %vm4891_vm2, %v747_v52, %v751_v43  ;;  %v737_v58 = vrot.slane %v736_v53, 4  ;;  %291 = vst.msk [vmem:[#allocation2 + $0x14] sm:$0xf] %vm285_vm3, %v258_v15  ;;  %v999_v18 = vrot.slane %v997_v9, 4  ;;  %v1000_v19 = vrot.slane %v890_v12, 5 }
  0x54   : > { %v994_v17 = vsel %vm5035_vm6, %v992_v7, %v993_v8  ;;  %v1004_v20 = vrot.slane %v892_v13, 5  ;;  %290 = vst.msk [vmem:[#allocation2 + $0x10] sm:$0xf] %vm285_vm3, %v257_v16  ;;  %v991_v21 = vsel %vm5035_vm6, %v4182_v11, %v990_v60  ;;  %v4183_v22 = vrot.slane %v888_v14, 9  ;;  %v893_v23 = vld [vmem:[%s4880_s22 + $0x2c] sm:$0x1] }
  0x55   : > { %v742_v2 = vsel %vm4891_vm2, %v737_v58, %v741_v34  ;;  %v895_v24 = vld [vmem:[%s4880_s22 + $0x34] sm:$0xf]  ;;  %v891_v25 = vld [vmem:[%s4880_s22 + $0x24] sm:$0xe]  ;;  %v260_v26 = vld [vmem:[%s4880_s22 + $0x28] sm:$0xf]  ;;  %v1001_v29 = vsel %vm5035_vm6, %v999_v18, %v1000_v19 }
  0x56   : > { %815 = vrot.lane.b32.xlu1 %v752_v57, %s4823_s23  ;;  %293 = vst.msk [vmem:[#allocation2 + $0x1c] sm:$0xf] %vm285_vm3, %v260_v26  ;;  %v259_v28 = vld [vmem:[%s4880_s22 + $0x24] sm:$0xf]  ;;  %v1006_v30 = vrot.slane %v1004_v20, 4  ;;  %v1007_v31 = vrot.slane %v893_v23, 5  ;;  %v998_v34 = vsel %vm5035_vm6, %v4183_v22, %v997_v9 }
  0x57   : > { %813 = vrot.lane.b32.xlu0 %v742_v2, %s4823_s23  ;;  %v896_v32 = vld [vmem:[%s4880_s22 + $0x38] sm:$0x1]  ;;  %v1011_v33 = vrot.slane %v895_v24, 5  ;;  %292 = vst.msk [vmem:[#allocation2 + $0x18] sm:$0xf] %vm285_vm3, %v259_v28  ;;  %v4184_v35 = vrot.slane %v891_v25, 9 }
  0x58   : > { %v898_v36 = vld [vmem:[%s4880_s22 + $0x40] sm:$0xf]  ;;  %v262_v37 = vld [vmem:[%s4880_s22 + $0x34] sm:$0xf]  ;;  %v894_v38 = vld [vmem:[%s4880_s22 + $0x30] sm:$0xe]  ;;  %v1008_v41 = vsel %vm5035_vm6, %v1006_v30, %v1007_v31 }
  0x59   : > { %295 = vst.msk [vmem:[#allocation2 + $0x24] sm:$0xf] %vm285_vm3, %v262_v37  ;;  %v261_v39 = vld [vmem:[%s4880_s22 + $0x30] sm:$0xf]  ;;  %v899_v40 = vld [vmem:[%s4880_s22 + $0x44] sm:$0x1]  ;;  %v1005_v46 = vsel %vm5035_vm6, %v4184_v35, %v1004_v20 }
  0x5a   : > { %1095 = vrot.lane.b32.xlu1 %v987_v6, %s4824_s24  ;;  %294 = vst.msk [vmem:[#allocation2 + $0x20] sm:$0xf] %vm285_vm3, %v261_v39  ;;  %v1013_v42 = vrot.slane %v1011_v33, 4  ;;  %v1014_v43 = vrot.slane %v896_v32, 5  ;;  %v1018_v44 = vrot.slane %v898_v36, 5  ;;  %v4185_v47 = vrot.slane %v894_v38, 9 }
  0x5b   : > { %1093 = vrot.lane.b32.xlu0 %v984_v10, %s4824_s24  ;;  %v264_v45 = vld [vmem:[%s4880_s22 + $0x40] sm:$0xf]  ;;  %v901_v48 = vld [vmem:[%s4880_s22 + $0x4c] sm:$0xf]  ;;  %v263_v49 = vld [vmem:[%s4880_s22 + $0x3c] sm:$0xf] }
  0x5c   : > { %297 = vst.msk [vmem:[#allocation2 + $0x2c] sm:$0xf] %vm285_vm3, %v264_v45  ;;  %v897_v50 = vld [vmem:[%s4880_s22 + $0x3c] sm:$0xe]  ;;  %296 = vst.msk [vmem:[#allocation2 + $0x28] sm:$0xf] %vm285_vm3, %v263_v49  ;;  %v1015_v53 = vsel %vm5035_vm6, %v1013_v42, %v1014_v43  ;;  %v1012_v58 = vsel %vm5035_vm6, %v4185_v47, %v1011_v33 }
  0x5d   : > { %v902_v51 = vld [vmem:[%s4880_s22 + $0x50] sm:$0x1]  ;;  %v266_v52 = vld [vmem:[%s4880_s22 + $0x4c] sm:$0xf]  ;;  %v1020_v54 = vrot.slane %v1018_v44, 4  ;;  %v1021_v55 = vrot.slane %v899_v40, 5 }
  0x5e   : > { %1099 = vrot.lane.b32.xlu1 %v994_v17, %s4824_s24  ;;  %v1025_v56 = vrot.slane %v901_v48, 5  ;;  %299 = vst.msk [vmem:[#allocation2 + $0x34] sm:$0xf] %vm285_vm3, %v266_v52  ;;  %v265_v57 = vld [vmem:[%s4880_s22 + $0x48] sm:$0xf]  ;;  %v4186_v59 = vrot.slane %v897_v50, 9 }
  0x5f   : > { %1097 = vrot.lane.b32.xlu0 %v991_v21, %s4824_s24  ;;  %v904_v60 = vld [vmem:[%s4880_s22 + $0x58] sm:$0xf]  ;;  %298 = vst.msk [vmem:[#allocation2 + $0x30] sm:$0xf] %vm285_vm3, %v265_v57  ;;  %v900_v63 = vld [vmem:[%s4880_s22 + $0x48] sm:$0xe]  ;;  %v1022_v5 = vsel %vm5035_vm6, %v1020_v54, %v1021_v55 }
  0x60   : > { %v268_v61 = vld [vmem:[%s4880_s22 + $0x58] sm:$0xf]  ;;  %v905_v0 = vld [vmem:[%s4880_s22 + $0x5c] sm:$0x1]  ;;  %v267_v1 = vld [vmem:[%s4880_s22 + $0x54] sm:$0xf]  ;;  %v1019_v10 = vsel %vm5035_vm6, %v4186_v59, %v1018_v44 }
  0x61   : > { %301 = vst.msk [vmem:[#allocation2 + $0x3c] sm:$0xf] %vm285_vm3, %v268_v61  ;;  %v1028_v2 = vrot.slane %v902_v51, 5  ;;  %300 = vst.msk [vmem:[#allocation2 + $0x38] sm:$0xf] %vm285_vm3, %v267_v1  ;;  %v1027_v6 = vrot.slane %v1025_v56, 4 }
  0x62   : > { %1103 = vrot.lane.b32.xlu1 %v1001_v29, %s4824_s24  ;;  %v270_v3 = vld [vmem:[%s4880_s22 + $0x64] sm:$0xf]  ;;  %v269_v4 = vld [vmem:[%s4880_s22 + $0x60] sm:$0xf]  ;;  %v1032_v7 = vrot.slane %v904_v60, 5  ;;  %v4187_v11 = vrot.slane %v900_v63, 9 }
  0x63   : > { %1101 = vrot.lane.b32.xlu0 %v998_v34, %s4824_s24  ;;  %303 = vst.msk [vmem:[#allocation2 + $0x44] sm:$0xf] %vm285_vm3, %v270_v3  ;;  %302 = vst.msk [vmem:[#allocation2 + $0x40] sm:$0xf] %vm285_vm3, %v269_v4  ;;  %v272_v8 = vld [vmem:[%s4880_s22 + $0x70] sm:$0xf]  ;;  %v1029_v19 = vsel %vm5035_vm6, %v1027_v6, %v1028_v2 }
  0x64   : > { %v271_v9 = vld [vmem:[%s4880_s22 + $0x6c] sm:$0xf]  ;;  %v907_v12 = vld [vmem:[%s4880_s22 + $0x64] sm:$0xf]  ;;  %305 = vst.msk [vmem:[#allocation2 + $0x4c] sm:$0xf] %vm285_vm3, %v272_v8  ;;  %v1026_v24 = vsel %vm5035_vm6, %v4187_v11, %v1025_v56 }
  0x65   : > { %304 = vst.msk [vmem:[#allocation2 + $0x48] sm:$0xf] %vm285_vm3, %v271_v9  ;;  %v274_v13 = vld [vmem:[%s4880_s22 + $0x7c] sm:$0xf]  ;;  %v903_v14 = vld [vmem:[%s4880_s22 + $0x54] sm:$0xe] }
  0x66   : > { %1107 = vrot.lane.b32.xlu1 %v1008_v41, %s4824_s24  ;;  %307 = vst.msk [vmem:[#allocation2 + $0x54] sm:$0xf] %vm285_vm3, %v274_v13  ;;  %v273_v15 = vld [vmem:[%s4880_s22 + $0x78] sm:$0xf]  ;;  %v1035_v16 = vrot.slane %v905_v0, 5  ;;  %v1034_v20 = vrot.slane %v1032_v7, 4 }
  0x67   : > { %1105 = vrot.lane.b32.xlu0 %v1005_v46, %s4824_s24  ;;  %306 = vst.msk [vmem:[#allocation2 + $0x50] sm:$0xf] %vm285_vm3, %v273_v15  ;;  %v276_v17 = vld [vmem:[%s4880_s22 + $0x88] sm:$0xf]  ;;  %v275_v18 = vld [vmem:[%s4880_s22 + $0x84] sm:$0xf] }
  0x68   : > { %v1039_v21 = vrot.slane %v907_v12, 5  ;;  %309 = vst.msk [vmem:[#allocation2 + $0x5c] sm:$0xf] %vm285_vm3, %v276_v17  ;;  %308 = vst.msk [vmem:[#allocation2 + $0x58] sm:$0xf] %vm285_vm3, %v275_v18  ;;  %v4188_v25 = vrot.slane %v903_v14, 9  ;;  %v1036_v32 = vsel %vm5035_vm6, %v1034_v20, %v1035_v16 }
  0x69   : > { %v278_v22 = vld [vmem:[%s4880_s22 + $0x94] sm:$0xf]  ;;  %v277_v23 = vld [vmem:[%s4880_s22 + $0x90] sm:$0xf]  ;;  %v908_v26 = vld [vmem:[%s4880_s22 + $0x68] sm:$0x1] }
  0x6a   : > { %1111 = vrot.lane.b32.xlu1 %v1015_v53, %s4824_s24  ;;  %v910_v28 = vld [vmem:[%s4880_s22 + $0x70] sm:$0xf]  ;;  %311 = vst.msk [vmem:[#allocation2 + $0x64] sm:$0xf] %vm285_vm3, %v278_v22  ;;  %310 = vst.msk [vmem:[#allocation2 + $0x60] sm:$0xf] %vm285_vm3, %v277_v23  ;;  %v1033_v36 = vsel %vm5035_vm6, %v4188_v25, %v1032_v7 }
  0x6b   : > { %1109 = vrot.lane.b32.xlu0 %v1012_v58, %s4824_s24  ;;  %v906_v29 = vld [vmem:[%s4880_s22 + $0x60] sm:$0xe]  ;;  %v279_v31 = vld [vmem:[%s4880_s22 + $0x9c] sm:$0xf]  ;;  %v1041_v33 = vrot.slane %v1039_v21, 4  ;;  %v1042_v34 = vrot.slane %v908_v26, 5 }
  0x6c   : > { %v280_v30 = vld [vmem:[%s4880_s22 + $0xa0] sm:$0xf]  ;;  %v1046_v35 = vrot.slane %v910_v28, 5  ;;  %312 = vst.msk [vmem:[#allocation2 + $0x68] sm:$0xf] %vm285_vm3, %v279_v31  ;;  %v4189_v37 = vrot.slane %v906_v29, 9 }
  0x6d   : > { %313 = vst.msk [vmem:[#allocation2 + $0x6c] sm:$0xf] %vm285_vm3, %v280_v30  ;;  %v911_v38 = vld [vmem:[%s4880_s22 + $0x74] sm:$0x1]  ;;  %v913_v39 = vld [vmem:[%s4880_s22 + $0x7c] sm:$0xf]  ;;  %v1043_v43 = vsel %vm5035_vm6, %v1041_v33, %v1042_v34 }
  0x6e   : > { %1115 = vrot.lane.b32.xlu1 %v1022_v5, %s4824_s24  ;;  %v909_v40 = vld [vmem:[%s4880_s22 + $0x6c] sm:$0xe]  ;;  %v281_v42 = vld [vmem:[%s4880_s22 + $0xa8] sm:$0xf]  ;;  %v1048_v44 = vrot.slane %v1046_v35, 4  ;;  %v1049_v45 = vrot.slane %v911_v38, 5  ;;  %v1040_v48 = vsel %vm5035_vm6, %v4189_v37, %v1039_v21 }
  0x6f   : > { %1113 = vrot.lane.b32.xlu0 %v1019_v10, %s4824_s24  ;;  %v282_v41 = vld [vmem:[%s4880_s22 + $0xac] sm:$0xf]  ;;  %314 = vst.msk [vmem:[#allocation2 + $0x70] sm:$0xf] %vm285_vm3, %v281_v42  ;;  %v914_v46 = vld [vmem:[%s4880_s22 + $0x80] sm:$0x1] }
  0x70   : > { %315 = vst.msk [vmem:[#allocation2 + $0x74] sm:$0xf] %vm285_vm3, %v282_v41  ;;  %v1053_v47 = vrot.slane %v913_v39, 5  ;;  %v4190_v49 = vrot.slane %v909_v40, 9  ;;  %v916_v50 = vld [vmem:[%s4880_s22 + $0x88] sm:$0xf]  ;;  %v1050_v54 = vsel %vm5035_vm6, %v1048_v44, %v1049_v45 }
  0x71   : > { %v284_v51 = vld [vmem:[%s4880_s22 + $0xb8] sm:$0xf]  ;;  %v283_v53 = vld [vmem:[%s4880_s22 + $0xb4] sm:$0xf]  ;;  %v1056_v56 = vrot.slane %v914_v46, 5  ;;  %v1060_v57 = vrot.slane %v916_v50, 5 }
  0x72   : > { %1119 = vrot.lane.b32.xlu1 %v1029_v19, %s4824_s24  ;;  %v912_v52 = vld [vmem:[%s4880_s22 + $0x78] sm:$0xe]  ;;  %317 = vst.msk [vmem:[#allocation2 + $0x7c] sm:$0xf] %vm285_vm3, %v284_v51  ;;  %316 = vst.msk [vmem:[#allocation2 + $0x78] sm:$0xf] %vm285_vm3, %v283_v53  ;;  %v1047_v58 = vsel %vm5035_vm6, %v4190_v49, %v1046_v35 }
  0x73   : > { %1117 = vrot.lane.b32.xlu0 %v1026_v24, %s4824_s24  ;;  %v1055_v55 = vrot.slane %v1053_v47, 4  ;;  %v4191_v59 = vrot.slane %v912_v52, 9  ;;  %v917_v60 = vld [vmem:[%s4880_s22 + $0x8c] sm:$0x1]  ;;  %v919_v61 = vld [vmem:[%s4880_s22 + $0x94] sm:$0xf] }
  0x74   : > { %v915_v63 = vld [vmem:[%s4880_s22 + $0x84] sm:$0xe]  ;;  %v1062_v1 = vrot.slane %v1060_v57, 4  ;;  %v1063_v2 = vrot.slane %v917_v60, 5  ;;  %v1067_v3 = vrot.slane %v919_v61, 5 }
  0x75   : > { %v1057_v0 = vsel %vm5035_vm6, %v1055_v55, %v1056_v56  ;;  %v1054_v4 = vsel %vm5035_vm6, %v4191_v59, %v1053_v47  ;;  %v4192_v5 = vrot.slane %v915_v63, 9  ;;  %v920_v6 = vld [vmem:[%s4880_s22 + $0x98] sm:$0x1]  ;;  %v922_v7 = vld [vmem:[%s4880_s22 + $0xa0] sm:$0xf] }
  0x76   : > { %1123 = vrot.lane.b32.xlu1 %v1036_v32, %s4824_s24  ;;  %v918_v8 = vld [vmem:[%s4880_s22 + $0x90] sm:$0xe]  ;;  %v1064_v9 = vsel %vm5035_vm6, %v1062_v1, %v1063_v2  ;;  %v1069_v10 = vrot.slane %v1067_v3, 4  ;;  %v1070_v11 = vrot.slane %v920_v6, 5  ;;  %v1074_v12 = vrot.slane %v922_v7, 5 }
  0x77   : > { %1121 = vrot.lane.b32.xlu0 %v1033_v36, %s4824_s24  ;;  %v1061_v13 = vsel %vm5035_vm6, %v4192_v5, %v1060_v57  ;;  %v4193_v14 = vrot.slane %v918_v8, 9  ;;  %v923_v15 = vld [vmem:[%s4880_s22 + $0xa4] sm:$0x1]  ;;  %v925_v16 = vld [vmem:[%s4880_s22 + $0xac] sm:$0xf] }
  0x78   : > { %v921_v17 = vld [vmem:[%s4880_s22 + $0x9c] sm:$0xe]  ;;  %v1071_v18 = vsel %vm5035_vm6, %v1069_v10, %v1070_v11  ;;  %v1076_v19 = vrot.slane %v1074_v12, 4  ;;  %v1077_v20 = vrot.slane %v923_v15, 5  ;;  %v1081_v21 = vrot.slane %v925_v16, 5 }
  0x79   : > { %v1068_v22 = vsel %vm5035_vm6, %v4193_v14, %v1067_v3  ;;  %v4194_v23 = vrot.slane %v921_v17, 9  ;;  %v926_v24 = vld [vmem:[%s4880_s22 + $0xb0] sm:$0x1]  ;;  %v928_v25 = vld [vmem:[%s4880_s22 + $0xb8] sm:$0xf] }
  0x7a   : > { %1127 = vrot.lane.b32.xlu1 %v1043_v43, %s4824_s24  ;;  %v924_v26 = vld [vmem:[%s4880_s22 + $0xa8] sm:$0xe]  ;;  %v1078_v28 = vsel %vm5035_vm6, %v1076_v19, %v1077_v20  ;;  %v1083_v29 = vrot.slane %v1081_v21, 4  ;;  %v1084_v30 = vrot.slane %v926_v24, 5  ;;  %v1088_v31 = vrot.slane %v928_v25, 5 }
  0x7b   : > { %1125 = vrot.lane.b32.xlu0 %v1040_v48, %s4824_s24  ;;  %v1075_v33 = vsel %vm5035_vm6, %v4194_v23, %v1074_v12  ;;  %v4195_v34 = vrot.slane %v924_v26, 9  ;;  %v929_v35 = vld [vmem:[%s4880_s22 + $0xbc] sm:$0x1]  ;;  %v927_v37 = vld [vmem:[%s4880_s22 + $0xb4] sm:$0xe] }
  0x7c   : > { %v1085_v38 = vsel %vm5035_vm6, %v1083_v29, %v1084_v30  ;;  %v1090_v39 = vrot.slane %v1088_v31, 4  ;;  %v1091_v40 = vrot.slane %v929_v35, 5  ;;  %v4196_v43 = vrot.slane %v927_v37, 9  ;;  %v4198_v49 = vld [vmem:[%s4880_s22 + $0x10] sm:$0xf] }
  0x7d   : > { %v1082_v42 = vsel %vm5035_vm6, %v4195_v34, %v1081_v21  ;;  %v4197_v51 = vld [vmem:[%s4880_s22 + $0xc] sm:$0xf]  ;;  %v4200_v53 = vld [vmem:[%s4880_s22 + $0x1c] sm:$0xf]  ;;  %v4199_v55 = vld [vmem:[%s4880_s22 + $0x18] sm:$0xf] }
  0x7e   : > { %1131 = vrot.lane.b32.xlu1 %v1050_v54, %s4824_s24  ;;  %v1092_v45 = vsel %vm5035_vm6, %v1090_v39, %v1091_v40  ;;  %v1089_v47 = vsel %vm5035_vm6, %v4196_v43, %v1088_v31  ;;  %v4202_v57 = vld [vmem:[%s4880_s22 + $0x28] sm:$0xf]  ;;  %v4201_v59 = vld [vmem:[%s4880_s22 + $0x24] sm:$0xf]  ;;  %v4204_v61 = vld [vmem:[%s4880_s22 + $0x34] sm:$0xf] }
  0x7f   : > { %1129 = vrot.lane.b32.xlu0 %v1047_v58, %s4824_s24  ;;  %v4206_v2 = vld [vmem:[%s4880_s22 + $0x40] sm:$0xf]  ;;  %v4230_v5 = vld [vmem:[%s4880_s22 + $0x10] sm:$0xf]  ;;  %v4229_v7 = vld [vmem:[%s4880_s22 + $0xc] sm:$0xf] }
  0x80   : > { %v4208_v8 = vld [vmem:[%s4880_s22 + $0x4c] sm:$0xf]  ;;  %v1481_v10 = vshrl.u32 %v4230_v5, 16  ;;  %v4207_v12 = vld [vmem:[%s4880_s22 + $0x48] sm:$0xf]  ;;  %v1471_v14 = vshll.u32 %v4229_v7, 16 }
  0x81   : > { %v4233_v15 = vld [vmem:[%s4880_s22 + $0x1c] sm:$0xf]  ;;  %v4232_v17 = vld [vmem:[%s4880_s22 + $0x18] sm:$0xf]  ;;  %v4209_v19 = vld [vmem:[%s4880_s22 + $0x54] sm:$0xf] }
  0x82   : > { %1135 = vrot.lane.b32.xlu1 %v1057_v0, %s4824_s24  ;;  %v4203_v0 = vld [vmem:[%s4880_s22 + $0x30] sm:$0xf]  ;;  %v1483_v21 = vrot.slane %v1481_v10, 4  ;;  %v1505_v23 = vshrl.u32 %v4233_v15, 16  ;;  %v4231_v25 = vld [vmem:[%s4880_s22 + $0x14] sm:$0x1] }
  0x83   : > { %1133 = vrot.lane.b32.xlu0 %v1054_v4, %s4824_s24  ;;  %v4205_v4 = vld [vmem:[%s4880_s22 + $0x3c] sm:$0xf]  ;;  %v1492_v29 = vshrl.u32 %v4232_v17, 16  ;;  %v1495_v30 = vshll.u32 %v4232_v17, 16  ;;  %v1487_v34 = vshll.u32 %v4231_v25, 16 }
  0x84   : > { %v4234_v40 = vld [vmem:[%s4880_s22 + $0x20] sm:$0x1] }
  0x86   : > { %1139 = vrot.lane.b32.xlu1 %v1064_v9, %s4824_s24  ;;  %v1477_v9 = vshll.u32 %v4230_v5, 16 }
  0x87   : > { %1137 = vrot.lane.b32.xlu0 %v1061_v13, %s4824_s24  ;;  %v1468_v13 = vshrl.u32 %v4229_v7, 16  ;;  %v4282_v7 = vld [vmem:[%s4880_s22 + $0x20] sm:$0x1] }
  0x88   : > { %v1479_v20 = vrot.slane %v1477_v9, 5 }
  0x89   : > { %v1470_v26 = vrot.slane %v1468_v13, 4  ;;  %v4280_v13 = vld [vmem:[%s4880_s22 + $0x18] sm:$0xe] }
  0x8a   : > { %1143 = vrot.lane.b32.xlu1 %v1071_v18, %s4824_s24  ;;  %v4210_v18 = vld [vmem:[%s4880_s22 + $0x58] sm:$0xf] }
  0x8b   : > { %1141 = vrot.lane.b32.xlu0 %v1068_v22, %s4824_s24  ;;  %v1501_v22 = vshll.u32 %v4233_v15, 16 }
  0x8c   : > { %v758_v32 = vpop.permute.xlu1 %757 }
  0x8d   : > { %852 = vst.msk [vmem:[#allocation2 + $0x8] sm:$0xf] %vm849_vm7, %v758_v32  ;;  %v754_v36 = vpop.permute.xlu0 %753  ;;  %v4212_v32 = vld [vmem:[%s4880_s22 + $0x64] sm:$0xf]  ;;  %v1503_v35 = vrot.slane %v1501_v22, 5 }
  0x8e   : > { %850 = vst.msk [vmem:[#allocation2] sm:$0xf] %vm849_vm7, %v754_v36  ;;  %1147 = vrot.lane.b32.xlu1 %v1078_v28, %s4824_s24  ;;  %v1473_v28 = vrot.slane %v1471_v14, 5  ;;  %v1507_v36 = vrot.slane %v1505_v23, 4  ;;  %v4373_v14 = vld [vmem:[%s4880_s22 + $0x18] sm:$0xf] }
  0x8f   : > { %1145 = vrot.lane.b32.xlu0 %v1075_v33, %s4824_s24  ;;  %v1484_v33 = vor.u32 %v1483_v21, %v1479_v20  ;;  %v4326_v23 = vrot.slane %v4280_v13, 9  ;;  %v2566_v25 = vshll.u32 %v4373_v14, 16  ;;  %v5388_v13 = vld [vmem:[%s4880_s22 + $0x28] sm:$0xf] }
  0x90   : > { %v760_v41 = vpop.permute.xlu1 %759  ;;  %v1474_v39 = vor.u32 %v1473_v28, %v1470_v26  ;;  %v4376_v26 = vld [vmem:[%s4880_s22 + $0x24] sm:$0xf] }
  0x91   : > { %853 = vst.msk [vmem:[#allocation2 + $0xc] sm:$0xf] %vm849_vm7, %v760_v41  ;;  %v756_v44 = vpop.permute.xlu0 %755  ;;  %v1494_v41 = vrot.slane %v1492_v29, 4 }
  0x92   : > { %851 = vst.msk [vmem:[#allocation2 + $0x4] sm:$0xf] %vm849_vm7, %v756_v44  ;;  %1151 = vrot.lane.b32.xlu1 %v1085_v38, %s4824_s24  ;;  %v4211_v38 = vld [vmem:[%s4880_s22 + $0x60] sm:$0xf]  ;;  %v4214_v44 = vld [vmem:[%s4880_s22 + $0x70] sm:$0xf] }
  0x93   : > { %1149 = vrot.lane.b32.xlu0 %v1082_v42, %s4824_s24  ;;  %v1497_v42 = vrot.slane %v1495_v30, 5 }
  0x94   : > { %v764_v46 = vpop.permute.xlu1 %763 }
  0x95   : > { %855 = vst.msk [vmem:[#allocation2 + $0x14] sm:$0xf] %vm849_vm7, %v764_v46  ;;  %v762_v48 = vpop.permute.xlu0 %761  ;;  %v1489_v46 = vrot.slane %v1487_v34, 5  ;;  %v2587_v34 = vshrl.u32 %v4376_v26, 16 }
  0x96   : > { %854 = vst.msk [vmem:[#allocation2 + $0x10] sm:$0xf] %vm849_vm7, %v762_v48  ;;  %1155 = vrot.lane.b32.xlu1 %v1092_v45, %s4824_s24  ;;  %v1485_v45 = vrot.slane %v1484_v33, 4  ;;  %v1511_v48 = vshll.u32 %v4234_v40, 16  ;;  %v2568_v40 = vrot.slane %v2566_v25, 5  ;;  %v4781_v25 = vld [vmem:[%s6360_s1 + $0x8] sm:$0xff]  }
  0x97   : > { %1153 = vrot.lane.b32.xlu0 %v1089_v47, %s4824_s24  ;;  %v1508_v47 = vor.u32 %v1507_v36, %v1503_v35  ;;  %s246_s24 = scalar_lea.vmem %s6363_s4, %s6373_s15 }
  0x98   : > { %v768_v50 = vpop.permute.xlu1 %767 }
  0x99   : > { %857 = vst.msk [vmem:[#allocation2 + $0x1c] sm:$0xf] %vm849_vm7, %v768_v50  ;;  %v766_v52 = vpop.permute.xlu0 %765  ;;  %v4213_v50 = vld [vmem:[%s4880_s22 + $0x6c] sm:$0xf] }
  0x9a   : > { %856 = vst.msk [vmem:[#allocation2 + $0x18] sm:$0xf] %vm849_vm7, %v766_v52  ;;  %1292 = vrot.lane.b32.xlu1 %v4198_v49, %s4825_s25  ;;  %v1498_v52 = vor.u32 %v1497_v42, %v1494_v41  ;;  %v4378_v42 = vld [vmem:[%s4880_s22 + $0x2c] sm:$0x1] }
  0x9b   : > { %1290 = vrot.lane.b32.xlu0 %v4197_v51, %s4825_s25  ;;  %v1475_v51 = vrot.slane %v1474_v39, 4 }
  0x9c   : > { %v772_v54 = vpop.permute.xlu1 %771 }
  0x9d   : > { %859 = vst.msk [vmem:[#allocation2 + $0x24] sm:$0xf] %vm849_vm7, %v772_v54  ;;  %v770_v56 = vpop.permute.xlu0 %769 }
  0x9e   : > { %858 = vst.msk [vmem:[#allocation2 + $0x20] sm:$0xf] %vm849_vm7, %v770_v56  ;;  %1296 = vrot.lane.b32.xlu1 %v4200_v53, %s4825_s25  ;;  %v4278_v53 = vld [vmem:[%s4880_s22 + $0x10] sm:$0xf]  ;;  %v1509_v56 = vrot.slane %v1508_v47, 4 }
  0x9f   : > { %1294 = vrot.lane.b32.xlu0 %v4199_v55, %s4825_s25  ;;  %v1490_v55 = vsel %vm4891_vm2, %v1485_v45, %v1489_v46  ;;  %v4342_v45 = vld [vmem:[%s4880_s22 + $0x1c] sm:$0xf] }
  0xa0   : > { %v776_v58 = vpop.permute.xlu1 %775 }
  0xa1   : > { %861 = vst.msk [vmem:[#allocation2 + $0x2c] sm:$0xf] %vm849_vm7, %v776_v58  ;;  %v774_v60 = vpop.permute.xlu0 %773  ;;  %v2078_v58 = vrot.slane %v4278_v53, 5 }
  0xa2   : > { %860 = vst.msk [vmem:[#allocation2 + $0x28] sm:$0xf] %vm849_vm7, %v774_v60  ;;  %1300 = vrot.lane.b32.xlu1 %v4202_v57, %s4825_s25  ;;  %v1513_v57 = vrot.slane %v1511_v48, 5  ;;  %v2589_v48 = vrot.slane %v2587_v34, 4 }
  0xa3   : > { %1298 = vrot.lane.b32.xlu0 %v4201_v59, %s4825_s25  ;;  %v4281_v59 = vld [vmem:[%s4880_s22 + $0x1c] sm:$0xf]  ;;  %v2080_v5 = vrot.slane %v2078_v58, 4 }
  0xa4   : > { %v780_v63 = vpop.permute.xlu1 %779 }
  0xa5   : > { %863 = vst.msk [vmem:[#allocation2 + $0x34] sm:$0xf] %vm849_vm7, %v780_v63  ;;  %v778_v1 = vpop.permute.xlu0 %777  ;;  %v1499_v63 = vrot.slane %v1498_v52, 4 }
  0xa6   : > { %862 = vst.msk [vmem:[#allocation2 + $0x30] sm:$0xf] %vm849_vm7, %v778_v1  ;;  %1304 = vrot.lane.b32.xlu1 %v4204_v61, %s4825_s25  ;;  %v1480_v61 = vsel %vm4891_vm2, %v1475_v51, %v1479_v20  ;;  %v4377_v20 = vld [vmem:[%s4880_s22 + $0x28] sm:$0xf]  ;;  %v4341_v51 = vld [vmem:[%s4880_s22 + $0x18] sm:$0xf] }
  0xa7   : > { %1302 = vrot.lane.b32.xlu0 %v4203_v0, %s4825_s25  ;;  %v4279_v0 = vld [vmem:[%s4880_s22 + $0x14] sm:$0x1]  ;;  %v1504_v9 = vsel %vm4891_vm2, %v1499_v63, %v1503_v35  ;;  %v2596_v30 = vshll.u32 %v4377_v20, 16  ;;  %v2590_v35 = vshll.u32 %v4376_v26, 16 }
  0xa8   : > { %v784_v3 = vpop.permute.xlu1 %783 }
  0xa9   : > { %865 = vst.msk [vmem:[#allocation2 + $0x3c] sm:$0xf] %vm849_vm7, %v784_v3  ;;  %v782_v6 = vpop.permute.xlu0 %781  ;;  %v2085_v3 = vrot.slane %v4281_v59, 5 }
  0xaa   : > { %864 = vst.msk [vmem:[#allocation2 + $0x38] sm:$0xf] %vm849_vm7, %v782_v6  ;;  %1308 = vrot.lane.b32.xlu1 %v4206_v2, %s4825_s25  ;;  %v4277_v2 = vld [vmem:[%s4880_s22 + $0xc] sm:$0xe]  ;;  %v2081_v6 = vrot.slane %v4279_v0, 5 }
  0xab   : > { %1306 = vrot.lane.b32.xlu0 %v4205_v4, %s4825_s25  ;;  %v1514_v4 = vsel %vm4891_vm2, %v1509_v56, %v1513_v57  ;;  %v4325_v10 = vrot.slane %v4277_v2, 9  ;;  %v2087_v15 = vrot.slane %v2085_v3, 4  ;;  %v4343_v0 = vld [vmem:[%s4880_s22 + $0x24] sm:$0xf]  ;;  %v5373_v2 = vld [vmem:[%s4880_s22 + $0x20] sm:$0x1] }
  0xac   : > { %v788_v11 = vpop.permute.xlu1 %787  ;;  %v2082_v17 = vsel %vm5035_vm6, %v2080_v5, %v2081_v6  ;;  %v4235_v5 = vld [vmem:[%s4880_s22 + $0x24] sm:$0xf]  ;;  %v4780_v6 = vld [vmem:[%s6360_s1 + $0x10] ss:$0 sps:$4 sm:$0x33]  }
  0xad   : > { %867 = vst.msk [vmem:[#allocation2 + $0x44] sm:$0xf] %vm849_vm7, %v788_v11  ;;  %v786_v16 = vpop.permute.xlu0 %785  ;;  %v4374_v11 = vld [vmem:[%s4880_s22 + $0x1c] sm:$0xf]  ;;  %v2079_v22 = vsel %vm5035_vm6, %v4325_v10, %v2078_v58  ;;  %4745 = vmatprep.subr.msk.bf16.mxu0 %vm3593_vm9, %v4780_v6  ;;  %4746 = vmatprep.subr.msk.bf16.mxu1 %vm3593_vm9, %v4780_v6 }
  0xae   : > { %866 = vst.msk [vmem:[#allocation2 + $0x40] sm:$0xf] %vm849_vm7, %v786_v16  ;;  %1312 = vrot.lane.b32.xlu1 %v4208_v8, %s4825_s25  ;;  %v2088_v16 = vrot.slane %v4282_v7, 5 }
  0xaf   : > { %1310 = vrot.lane.b32.xlu0 %v4207_v12, %s4825_s25 }
  0xb0   : > { %v792_v24 = vpop.permute.xlu1 %791  ;;  %v2089_v29 = vsel %vm5035_vm6, %v2087_v15, %v2088_v16  ;;  %v3595_v15 = vsel %vm3593_vm9, %v4780_v6, 0  ;;  %v4284_v6 = vld [vmem:[%s4880_s22 + $0x28] sm:$0xf] }
  0xb1   : > { %869 = vst.msk [vmem:[#allocation2 + $0x4c] sm:$0xf] %vm849_vm7, %v792_v24  ;;  %v790_v31 = vpop.permute.xlu0 %789  ;;  %v2563_v24 = vshrl.u32 %v4373_v14, 16  ;;  %4702 = vmatpush3.bf16.msra.mxu0 %v3595_v15  ;;  %4742 = vmatpush3.bf16.msra.mxu1 %v3595_v15 }
  0xb2   : > { %868 = vst.msk [vmem:[#allocation2 + $0x48] sm:$0xf] %vm849_vm7, %v790_v31  ;;  %1316 = vrot.lane.b32.xlu1 %v4210_v18, %s4825_s25  ;;  %v2572_v18 = vshll.u32 %v4374_v11, 16  ;;  %v2600_v31 = vshrl.u32 %v4377_v20, 16  ;;  %v4239_v20 = vld [vmem:[%s4880_s22 + $0x34] sm:$0xf]  ;;  %4703 = vmatprep.subr.bf16.mxu0 %v4781_v25 }
  0xb3   : > { %1314 = vrot.lane.b32.xlu0 %v4209_v19, %s4825_s25  ;;  %v2576_v19 = vshrl.u32 %v4374_v11, 16  ;;  %v2565_v39 = vrot.slane %v2563_v24, 4  ;;  %v4238_v24 = vld [vmem:[%s4880_s22 + $0x30] sm:$0xf]  ;;  %v1549_v34 = vshll.u32 %v4239_v20, 16  ;;  %4740 = vmatprep.subr.bf16.mxu1 %v4781_v25 }
  0xb4   : > { %v796_v37 = vpop.permute.xlu1 %795 }
  0xb5   : > { %871 = vst.msk [vmem:[#allocation2 + $0x54] sm:$0xf] %vm849_vm7, %v796_v37  ;;  %v794_v43 = vpop.permute.xlu0 %793  ;;  %v2578_v33 = vrot.slane %v2576_v19, 4  ;;  %v2086_v37 = vsel %vm5035_vm6, %v4326_v23, %v2085_v3  ;;  %v2569_v52 = vor.u32 %v2568_v40, %v2565_v39  ;;  %v1519_v19 = vshll.u32 %v4235_v5, 16  ;;  %4704 = vmatpush3.bf16.msra.mxu0 %v4781_v25  ;;  %4743 = vmatpush3.bf16.msra.mxu1 %v4781_v25 }
  0xb6   : > { %870 = vst.msk [vmem:[#allocation2 + $0x50] sm:$0xf] %vm849_vm7, %v794_v43  ;;  %1320 = vrot.lane.b32.xlu1 %v4212_v32, %s4825_s25  ;;  %v5346_v32 = vrot.slane %v2572_v18, 5  ;;  %v5355_v43 = vrot.slane %v2596_v30, 5  ;;  %v1516_v18 = vshrl.u32 %v4235_v5, 16  ;;  %v1540_v40 = vshrl.u32 %v4238_v24, 16 }
  0xb7   : > { %1318 = vrot.lane.b32.xlu0 %v4211_v38, %s4825_s25  ;;  %v4375_v38 = vld [vmem:[%s4880_s22 + $0x20] sm:$0x1]  ;;  %v1521_v39 = vrot.slane %v1519_v19, 5 }
  0xb8   : > { %v800_v49 = vpop.permute.xlu1 %799  ;;  %v2579_v46 = vor.u32 %v2578_v33, %v5346_v32  ;;  %v2582_v47 = vshll.u32 %v4375_v38, 16  ;;  %v1518_v38 = vrot.slane %v1516_v18, 4  ;;  %v4283_v18 = vld [vmem:[%s4880_s22 + $0x24] sm:$0xe] }
  0xb9   : > { %873 = vst.msk [vmem:[#allocation2 + $0x5c] sm:$0xf] %vm849_vm7, %v800_v49  ;;  %v798_v54 = vpop.permute.xlu0 %797  ;;  %v2592_v49 = vrot.slane %v2590_v35, 5  ;;  %v1553_v35 = vshrl.u32 %v4239_v20, 16 }
  0xba   : > { %872 = vst.msk [vmem:[#allocation2 + $0x58] sm:$0xf] %vm849_vm7, %v798_v54  ;;  %1324 = vrot.lane.b32.xlu1 %v4214_v44, %s4825_s25  ;;  %v2602_v44 = vrot.slane %v2600_v31, 4  ;;  %v2606_v54 = vshll.u32 %v4378_v42, 16  ;;  %v2580_v57 = vrot.slane %v2579_v46, 4  ;;  %v2584_v58 = vrot.slane %v2582_v47, 5 }
  0xbb   : > { %1322 = vrot.lane.b32.xlu0 %v4213_v50, %s4825_s25  ;;  %v2593_v59 = vor.u32 %v2592_v49, %v2589_v48 }
  0xbc   : > { %v804_v60 = vpop.permute.xlu1 %803  ;;  %v2603_v56 = vor.u32 %v2602_v44, %v5355_v43  ;;  %v2585_v11 = vsel %vm4891_vm2, %v2580_v57, %v2584_v58  ;;  %v4424_v44 = vld [vmem:[%s4880_s22 + $0x24] sm:$0xe]  ;;  %v1542_v57 = vrot.slane %v1540_v40, 4 }
  0xbd   : > { %875 = vst.msk [vmem:[#allocation2 + $0x64] sm:$0xf] %vm849_vm7, %v804_v60  ;;  %v802_v1 = vpop.permute.xlu0 %801  ;;  %v5368_v60 = vld [vmem:[%s4880_s22 + $0x1c] sm:$0xf] }
  0xbe   : > { %874 = vst.msk [vmem:[#allocation2 + $0x60] sm:$0xf] %vm849_vm7, %v802_v1  ;;  %1853 = vrot.lane.b32.xlu1 %v1490_v55, %s4826_s26  ;;  %v4344_v55 = vld [vmem:[%s4880_s22 + $0x28] sm:$0xf]  ;;  %v2570_v1 = vrot.slane %v2569_v52, 4  ;;  %v2604_v7 = vrot.slane %v2603_v56, 4 }
  0xbf   : > { %1851 = vrot.lane.b32.xlu0 %v1480_v61, %s4826_s26  ;;  %v4236_v61 = vld [vmem:[%s4880_s22 + $0x28] sm:$0xf]  ;;  %v1555_v52 = vrot.slane %v1553_v35, 4  ;;  %v4240_v56 = vld [vmem:[%s4880_s22 + $0x38] sm:$0x1] }
  0xc0   : > { %v808_v8 = vpop.permute.xlu1 %807  ;;  %v1525_v10 = vshll.u32 %v4236_v61, 16  ;;  %v1529_v14 = vshrl.u32 %v4236_v61, 16 }
  0xc1   : > { %877 = vst.msk [vmem:[#allocation2 + $0x6c] sm:$0xf] %vm849_vm7, %v808_v8  ;;  %v806_v12 = vpop.permute.xlu0 %805  ;;  %v3173_v8 = vrot.slane %v5368_v60, 5 }
  0xc2   : > { %876 = vst.msk [vmem:[#allocation2 + $0x68] sm:$0xf] %vm849_vm7, %v806_v12  ;;  %1857 = vrot.lane.b32.xlu1 %v1514_v4, %s4826_s26  ;;  %v2608_v4 = vrot.slane %v2606_v54, 5  ;;  %v2594_v12 = vrot.slane %v2593_v59, 4  ;;  %v5405_v30 = vrot.slane %v1525_v10, 5  ;;  %v1531_v33 = vrot.slane %v1529_v14, 4 }
  0xc3   : > { %1855 = vrot.lane.b32.xlu0 %v1504_v9, %s4826_s26  ;;  %v4421_v9 = vld [vmem:[%s4880_s22 + $0x18] sm:$0xe]  ;;  %v4470_v54 = vrot.slane %v4424_v44, 9 }
  0xc4   : > { %v812_v21 = vpop.permute.xlu1 %811  ;;  %v4469_v23 = vrot.slane %v4421_v9, 9  ;;  %v2609_v26 = vsel %vm4891_vm2, %v2604_v7, %v2608_v4  ;;  %v2599_v31 = vsel %vm4891_vm2, %v2594_v12, %v5355_v43  ;;  %v4782_v43 = vld [vmem:[%s6360_s1] sm:$0xff]   ;;  %v1532_v49 = vor.u32 %v1531_v33, %v5405_v30  ;;  %v4287_v12 = vld [vmem:[%s4880_s22 + $0x34] sm:$0xf] }
  0xc5   : > { %879 = vst.msk [vmem:[#allocation2 + $0x74] sm:$0xf] %vm849_vm7, %v812_v21  ;;  %v810_v28 = vpop.permute.xlu0 %809  ;;  %4705 = vmatprep.subr.bf16.mxu0 %v4782_v43  ;;  %4741 = vmatprep.subr.bf16.mxu1 %v4782_v43  ;;  %v2099_v19 = vrot.slane %v4287_v12, 5 }
  0xc6   : > { %878 = vst.msk [vmem:[#allocation2 + $0x70] sm:$0xf] %vm849_vm7, %v810_v28  ;;  %2190 = vrot.lane.b32.xlu1 %v2082_v17, %s4827_s27  ;;  %v2575_v17 = vsel %vm4891_vm2, %v2570_v1, %v5346_v32  ;;  %v3175_v28 = vrot.slane %v3173_v8, 4  ;;  %v4426_v32 = vld [vmem:[%s4880_s22 + $0x2c] sm:$0x1]  ;;  %v3174_v46 = vsel %vm5035_vm6, %v4469_v23, %v3173_v8  ;;  %4706 = vmatpush3.bf16.msra.mxu0 %v4782_v43  ;;  %v1533_v61 = vrot.slane %v1532_v49, 4 }
  0xc7   : > { %2188 = vrot.lane.b32.xlu0 %v2079_v22, %s4827_s27  ;;  %v3176_v22 = vrot.slane %v5373_v2, 5  ;;  %v3183_v48 = vrot.slane %v4426_v32, 5  ;;  %4744 = vmatpush3.bf16.msra.mxu1 %v4782_v43  ;;  %v1559_v1 = vshll.u32 %v4240_v56, 16  ;;  %v4288_v23 = vld [vmem:[%s4880_s22 + $0x38] sm:$0x1]  ;;  %v2101_v32 = vrot.slane %v2099_v19, 4 }
  0xc8   : > { %v816_v36 = vpop.permute.xlu1 %815  ;;  %v2102_v33 = vrot.slane %v4288_v23, 5 }
  0xc9   : > { %881 = vst.msk [vmem:[#allocation2 + $0x7c] sm:$0xf] %vm849_vm7, %v816_v36  ;;  %v814_v41 = vpop.permute.xlu0 %813  ;;  %v1561_v10 = vrot.slane %v1559_v1, 5 }
  0xca   : > { %880 = vst.msk [vmem:[#allocation2 + $0x78] sm:$0xf] %vm849_vm7, %v814_v41  ;;  %2194 = vrot.lane.b32.xlu1 %v2089_v29, %s4827_s27  ;;  %v3180_v29 = vrot.slane %v5388_v13, 5  ;;  %v1543_v41 = vshll.u32 %v4238_v24, 16  ;;  %v2103_v49 = vsel %vm5035_vm6, %v2101_v32, %v2102_v33 }
  0xcb   : > { %2192 = vrot.lane.b32.xlu0 %v2086_v37, %s4827_s27  ;;  %v4237_v37 = vld [vmem:[%s4880_s22 + $0x2c] sm:$0x1] }
  0xcc   : > { %v1096_v50 = vpop.permute.xlu1 %1095  ;;  %v3182_v47 = vrot.slane %v3180_v29, 4  ;;  %v1545_v58 = vrot.slane %v1543_v41, 5 }
  0xcd   : > { %1191 = vst.msk [vmem:[#allocation2 + $0x4] sm:$0xf] %vm1189_vm8, %v1096_v50  ;;  %v1094_v53 = vpop.permute.xlu0 %1093  ;;  %v1535_v50 = vshll.u32 %v4237_v37, 16  ;;  %v4383_v37 = vld [vmem:[%s4880_s22 + $0x40] sm:$0xf] }
  0xce   : > { %1190 = vst.msk [vmem:[#allocation2] sm:$0xf] %vm1189_vm8, %v1094_v53  ;;  %2387 = vrot.lane.b32.xlu1 %v4342_v45, %s4828_s28  ;;  %v3177_v45 = vsel %vm5035_vm6, %v3175_v28, %v3176_v22  ;;  %v3184_v60 = vsel %vm5035_vm6, %v3182_v47, %v3183_v48  ;;  %v1546_v5 = vor.u32 %v1545_v58, %v1542_v57  ;;  %v4380_v28 = vld [vmem:[%s4880_s22 + $0x34] sm:$0xf] }
  0xcf   : > { %2385 = vrot.lane.b32.xlu0 %v4341_v51, %s4828_s28  ;;  %v5426_v51 = vrot.slane %v1549_v34, 5  ;;  %v2620_v35 = vshll.u32 %v4380_v28, 16 }
  0xd0   : > { %v1100_v63 = vpop.permute.xlu1 %1099  ;;  %v1547_v15 = vrot.slane %v1546_v5, 4 }
  0xd1   : > { %1193 = vst.msk [vmem:[#allocation2 + $0xc] sm:$0xf] %vm1189_vm8, %v1100_v63  ;;  %v1098_v3 = vpop.permute.xlu0 %1097  ;;  %v1537_v63 = vrot.slane %v1535_v50, 5  ;;  %v5480_v50 = vrot.slane %v2620_v35, 5  ;;  %v4245_v35 = vld [vmem:[%s4880_s22 + $0x4c] sm:$0xf] }
  0xd2   : > { %1192 = vst.msk [vmem:[#allocation2 + $0x8] sm:$0xf] %vm1189_vm8, %v1098_v3  ;;  %2391 = vrot.lane.b32.xlu1 %v4344_v55, %s4828_s28  ;;  %v1522_v55 = vor.u32 %v1521_v39, %v1518_v38  ;;  %v3181_v3 = vsel %vm5035_vm6, %v4470_v54, %v3180_v29  ;;  %v1552_v25 = vsel %vm4891_vm2, %v1547_v15, %v5426_v51  ;;  %v4382_v38 = vld [vmem:[%s4880_s22 + $0x3c] sm:$0xf]  ;;  %v4381_v54 = vld [vmem:[%s4880_s22 + $0x38] sm:$0x1] }
  0xd3   : > { %2389 = vrot.lane.b32.xlu0 %v4343_v0, %s4828_s28  ;;  %v1556_v0 = vor.u32 %v1555_v52, %v5426_v51  ;;  %v1538_v8 = vsel %vm4891_vm2, %v1533_v61, %v1537_v63  ;;  %v2635_v47 = vshrl.u32 %v4382_v38, 16  ;;  %v2638_v48 = vshll.u32 %v4382_v38, 16  ;;  %v4346_v63 = vld [vmem:[%s4880_s22 + $0x34] sm:$0xf]  ;;  %v4347_v15 = vld [vmem:[%s4880_s22 + $0x3c] sm:$0xf] }
  0xd4   : > { %v1104_v16 = vpop.permute.xlu1 %1103  ;;  %v1523_v4 = vrot.slane %v1522_v55, 4  ;;  %v2630_v1 = vshll.u32 %v4381_v54, 16 }
  0xd5   : > { %1195 = vst.msk [vmem:[#allocation2 + $0x14] sm:$0xf] %vm1189_vm8, %v1104_v16  ;;  %v1102_v21 = vpop.permute.xlu0 %1101  ;;  %v1557_v9 = vrot.slane %v1556_v0, 4  ;;  %v4285_v16 = vld [vmem:[%s4880_s22 + $0x2c] sm:$0x1]  ;;  %v2640_v61 = vrot.slane %v2638_v48, 5 }
  0xd6   : > { %1194 = vst.msk [vmem:[#allocation2 + $0x10] sm:$0xf] %vm1189_vm8, %v1102_v21  ;;  %2948 = vrot.lane.b32.xlu1 %v2585_v11, %s4829_s7  ;;  %v2092_v11 = vrot.slane %v4284_v6, 5  ;;  %v1528_v14 = vsel %vm4891_vm2, %v1523_v4, %v5405_v30  ;;  %v2095_v22 = vrot.slane %v4285_v16, 5  ;;  %v4286_v30 = vld [vmem:[%s4880_s22 + $0x30] sm:$0xe] }
  0xd7   : > { %2946 = vrot.lane.b32.xlu0 %v2575_v17, %s4829_s7  ;;  %v1562_v20 = vsel %vm4891_vm2, %v1557_v9, %v1561_v10  ;;  %v4328_v41 = vrot.slane %v4286_v30, 9  ;;  %v4345_v4 = vld [vmem:[%s4880_s22 + $0x30] sm:$0xf]  ;;  %v4428_v10 = vld [vmem:[%s4880_s22 + $0x34] sm:$0xf]  ;;  %v1601_v48 = vshrl.u32 %v4245_v35, 16 }
  0xd8   : > { %v1108_v36 = vpop.permute.xlu1 %1107  ;;  %v2094_v21 = vrot.slane %v2092_v11, 4 }
  0xd9   : > { %1197 = vst.msk [vmem:[#allocation2 + $0x1c] sm:$0xf] %vm1189_vm8, %v1108_v36  ;;  %v1106_v42 = vpop.permute.xlu0 %1105  ;;  %v2624_v36 = vshrl.u32 %v4380_v28, 16  ;;  %v5514_v28 = vld [vmem:[%s4880_s22 + $0x40] sm:$0xf] }
  0xda   : > { %1196 = vst.msk [vmem:[#allocation2 + $0x18] sm:$0xf] %vm1189_vm8, %v1106_v42  ;;  %2952 = vrot.lane.b32.xlu1 %v2609_v26, %s4829_s7  ;;  %v4327_v26 = vrot.slane %v4283_v18, 9  ;;  %v2096_v34 = vsel %vm5035_vm6, %v2094_v21, %v2095_v22 }
  0xdb   : > { %2950 = vrot.lane.b32.xlu0 %v2599_v31, %s4829_s7  ;;  %v4379_v31 = vld [vmem:[%s4880_s22 + $0x30] sm:$0xf]  ;;  %v2626_v51 = vrot.slane %v2624_v36, 4 }
  0xdc   : > { %v1112_v53 = vpop.permute.xlu1 %1111  ;;  %v2093_v40 = vsel %vm5035_vm6, %v4327_v26, %v2092_v11  ;;  %v2611_v42 = vshrl.u32 %v4379_v31, 16  ;;  %v2614_v44 = vshll.u32 %v4379_v31, 16  ;;  %v4348_v11 = vld [vmem:[%s4880_s22 + $0x40] sm:$0xf]  ;;  %v4427_v26 = vld [vmem:[%s4880_s22 + $0x30] sm:$0xe] }
  0xdd   : > { %1199 = vst.msk [vmem:[#allocation2 + $0x24] sm:$0xf] %vm1189_vm8, %v1112_v53  ;;  %v1110_v59 = vpop.permute.xlu0 %1109  ;;  %v2100_v53 = vsel %vm5035_vm6, %v4328_v41, %v2099_v19  ;;  %v2627_v0 = vor.u32 %v2626_v51, %v5480_v50  ;;  %v3187_v19 = vrot.slane %v4428_v10, 5 }
  0xde   : > { %1198 = vst.msk [vmem:[#allocation2 + $0x20] sm:$0xf] %vm1189_vm8, %v1110_v59  ;;  %3285 = vrot.lane.b32.xlu1 %v3177_v45, %s4830_s10  ;;  %v2644_v45 = vshll.u32 %v4383_v37, 16  ;;  %v2613_v55 = vrot.slane %v2611_v42, 4  ;;  %v2616_v56 = vrot.slane %v2614_v44, 5  ;;  %v4471_v42 = vrot.slane %v4427_v26, 9 }
  0xdf   : > { %3283 = vrot.lane.b32.xlu0 %v3174_v46, %s4830_s10  ;;  %v2648_v46 = vshrl.u32 %v4383_v37, 16  ;;  %v2628_v12 = vrot.slane %v2627_v0, 4  ;;  %v3189_v37 = vrot.slane %v3187_v19, 4  ;;  %v3194_v44 = vrot.slane %v5514_v28, 5 }
  0xe0   : > { %v1116_v2 = vpop.permute.xlu1 %1115  ;;  %v5488_v58 = vrot.slane %v2644_v45, 5  ;;  %v2617_v5 = vor.u32 %v2616_v56, %v2613_v55  ;;  %v4430_v56 = vld [vmem:[%s4880_s22 + $0x3c] sm:$0xe] }
  0xe1   : > { %1201 = vst.msk [vmem:[#allocation2 + $0x2c] sm:$0xf] %vm1189_vm8, %v1116_v2  ;;  %v1114_v7 = vpop.permute.xlu0 %1113  ;;  %v2650_v59 = vrot.slane %v2648_v46, 4  ;;  %v4384_v2 = vld [vmem:[%s4880_s22 + $0x44] sm:$0x1] }
  0xe2   : > { %1200 = vst.msk [vmem:[#allocation2 + $0x28] sm:$0xf] %vm1189_vm8, %v1114_v7  ;;  %3289 = vrot.lane.b32.xlu1 %v3184_v60, %s4830_s10  ;;  %v2637_v60 = vrot.slane %v2635_v47, 4  ;;  %v2618_v16 = vrot.slane %v2617_v5, 4  ;;  %v1597_v47 = vshll.u32 %v4245_v35, 16 }
  0xe3   : > { %3287 = vrot.lane.b32.xlu0 %v3181_v3, %s4830_s10  ;;  %v2651_v7 = vor.u32 %v2650_v59, %v5488_v58  ;;  %v3196_v59 = vrot.slane %v3194_v44, 4  ;;  %v4246_v5 = vld [vmem:[%s4880_s22 + $0x50] sm:$0x1] }
  0xe4   : > { %v1120_v13 = vpop.permute.xlu1 %1119  ;;  %v2641_v9 = vor.u32 %v2640_v61, %v2637_v60  ;;  %v2623_v32 = vsel %vm4891_vm2, %v2618_v16, %v5480_v50  ;;  %v4243_v50 = vld [vmem:[%s4880_s22 + $0x44] sm:$0x1]  ;;  %v1599_v0 = vrot.slane %v1597_v47, 5 }
  0xe5   : > { %1203 = vst.msk [vmem:[#allocation2 + $0x34] sm:$0xf] %vm1189_vm8, %v1120_v13  ;;  %v1118_v17 = vpop.permute.xlu0 %1117  ;;  %v2632_v13 = vrot.slane %v2630_v1, 5  ;;  %v2652_v21 = vrot.slane %v2651_v7, 4  ;;  %v1603_v1 = vrot.slane %v1601_v48, 4 }
  0xe6   : > { %1202 = vst.msk [vmem:[#allocation2 + $0x30] sm:$0xf] %vm1189_vm8, %v1118_v17  ;;  %1861 = vrot.lane.b32.xlu1 %v1538_v8, %s4826_s26  ;;  %v2654_v8 = vshll.u32 %v4384_v2, 16  ;;  %v4242_v17 = vld [vmem:[%s4880_s22 + $0x40] sm:$0xf]  ;;  %v2642_v23 = vrot.slane %v2641_v9, 4 }
  0xe7   : > { %1859 = vrot.lane.b32.xlu0 %v1528_v14, %s4826_s26  ;;  %v1577_v30 = vshrl.u32 %v4242_v17, 16 }
  0xe8   : > { %v1124_v24 = vpop.permute.xlu1 %1123  ;;  %v2656_v22 = vrot.slane %v2654_v8, 5  ;;  %v2647_v41 = vsel %vm4891_vm2, %v2642_v23, %v5488_v58  ;;  %v3188_v58 = vsel %vm5035_vm6, %v4471_v42, %v3187_v19  ;;  %v4292_v42 = vld [vmem:[%s4880_s22 + $0x48] sm:$0xe] }
  0xe9   : > { %1205 = vst.msk [vmem:[#allocation2 + $0x3c] sm:$0xf] %vm1189_vm8, %v1124_v24  ;;  %v1122_v29 = vpop.permute.xlu0 %1121  ;;  %v4429_v24 = vld [vmem:[%s4880_s22 + $0x38] sm:$0x1]  ;;  %v1579_v46 = vrot.slane %v1577_v30, 4 }
  0xea   : > { %1204 = vst.msk [vmem:[#allocation2 + $0x38] sm:$0xf] %vm1189_vm8, %v1122_v29  ;;  %1865 = vrot.lane.b32.xlu1 %v1562_v20, %s4826_s26  ;;  %v4241_v20 = vld [vmem:[%s4880_s22 + $0x3c] sm:$0xf]  ;;  %v1573_v29 = vshll.u32 %v4242_v17, 16  ;;  %v3190_v38 = vrot.slane %v4429_v24, 5 }
  0xeb   : > { %1863 = vrot.lane.b32.xlu0 %v1552_v25, %s4826_s26  ;;  %v2633_v25 = vsel %vm4891_vm2, %v2628_v12, %v2632_v13  ;;  %v1564_v33 = vshrl.u32 %v4241_v20, 16  ;;  %v1604_v12 = vor.u32 %v1603_v1, %v1599_v0  ;;  %v1607_v13 = vshll.u32 %v4246_v5, 16  ;;  %v4293_v24 = vld [vmem:[%s4880_s22 + $0x4c] sm:$0xf] }
  0xec   : > { %v1128_v39 = vpop.permute.xlu1 %1127  ;;  %v5532_v45 = vrot.slane %v1573_v29, 5  ;;  %v4291_v29 = vld [vmem:[%s4880_s22 + $0x44] sm:$0x1] }
  0xed   : > { %1207 = vst.msk [vmem:[#allocation2 + $0x44] sm:$0xf] %vm1189_vm8, %v1128_v39  ;;  %v1126_v43 = vpop.permute.xlu0 %1125  ;;  %v4244_v39 = vld [vmem:[%s4880_s22 + $0x48] sm:$0xf]  ;;  %v1566_v51 = vrot.slane %v1564_v33, 4  ;;  %v2109_v35 = vrot.slane %v4291_v29, 5 }
  0xee   : > { %1206 = vst.msk [vmem:[#allocation2 + $0x40] sm:$0xf] %vm1189_vm8, %v1126_v43  ;;  %2198 = vrot.lane.b32.xlu1 %v2096_v34, %s4827_s27  ;;  %v1567_v34 = vshll.u32 %v4241_v20, 16  ;;  %v4432_v43 = vld [vmem:[%s4880_s22 + $0x44] sm:$0x1]  ;;  %v1591_v54 = vshll.u32 %v4244_v39, 16  ;;  %v1580_v61 = vor.u32 %v1579_v46, %v5532_v45 }
  0xef   : > { %2196 = vrot.lane.b32.xlu0 %v2093_v40, %s4827_s27  ;;  %v2657_v40 = vsel %vm4891_vm2, %v2652_v21, %v2656_v22  ;;  %v3197_v60 = vrot.slane %v4432_v43, 5  ;;  %v1605_v21 = vrot.slane %v1604_v12, 4  ;;  %v1609_v22 = vrot.slane %v1607_v13, 5 }
  0xf0   : > { %v1132_v52 = vpop.permute.xlu1 %1131  ;;  %v1593_v7 = vrot.slane %v1591_v54, 5  ;;  %v1581_v10 = vrot.slane %v1580_v61, 4 }
  0xf1   : > { %1209 = vst.msk [vmem:[#allocation2 + $0x4c] sm:$0xf] %vm1189_vm8, %v1132_v52  ;;  %v1130_v57 = vpop.permute.xlu0 %1129  ;;  %v1569_v52 = vrot.slane %v1567_v34, 5  ;;  %v3198_v9 = vsel %vm5035_vm6, %v3196_v59, %v3197_v60  ;;  %v1610_v33 = vsel %vm4891_vm2, %v1605_v21, %v1609_v22  ;;  %v4434_v22 = vld [vmem:[%s4880_s22 + $0x4c] sm:$0xf] }
  0xf2   : > { %1208 = vst.msk [vmem:[#allocation2 + $0x48] sm:$0xf] %vm1189_vm8, %v1130_v57  ;;  %2202 = vrot.lane.b32.xlu1 %v2103_v49, %s4827_s27  ;;  %v3191_v57 = vsel %vm5035_vm6, %v3189_v37, %v3190_v38 }
  0xf3   : > { %2200 = vrot.lane.b32.xlu0 %v2100_v53, %s4827_s27  ;;  %v1588_v53 = vshrl.u32 %v4244_v39, 16 }
  0xf4   : > { %v1136_v3 = vpop.permute.xlu1 %1135 }
  0xf5   : > { %1211 = vst.msk [vmem:[#allocation2 + $0x54] sm:$0xf] %vm1189_vm8, %v1136_v3  ;;  %v1134_v6 = vpop.permute.xlu0 %1133  ;;  %v4472_v3 = vrot.slane %v4430_v56, 9 }
  0xf6   : > { %1210 = vst.msk [vmem:[#allocation2 + $0x50] sm:$0xf] %vm1189_vm8, %v1134_v6  ;;  %2395 = vrot.lane.b32.xlu1 %v4346_v63, %s4828_s28  ;;  %v1583_v63 = vshll.u32 %v4243_v50, 16  ;;  %v1590_v6 = vrot.slane %v1588_v53, 4  ;;  %v4388_v50 = vld [vmem:[%s4880_s22 + $0x54] sm:$0xf] }
  0xf7   : > { %2393 = vrot.lane.b32.xlu0 %v4345_v4, %s4828_s28  ;;  %v1570_v4 = vor.u32 %v1569_v52, %v1566_v51  ;;  %v4330_v53 = vrot.slane %v4292_v42, 9  ;;  %v2683_v59 = vshrl.u32 %v4388_v50, 16  ;;  %v2686_v60 = vshll.u32 %v4388_v50, 16 }
  0xf8   : > { %v1140_v14 = vpop.permute.xlu1 %1139  ;;  %v1594_v17 = vor.u32 %v1593_v7, %v1590_v6 }
  0xf9   : > { %1213 = vst.msk [vmem:[#allocation2 + $0x5c] sm:$0xf] %vm1189_vm8, %v1140_v14  ;;  %v1138_v18 = vpop.permute.xlu0 %1137  ;;  %v1571_v16 = vrot.slane %v1570_v4, 4 }
  0xfa   : > { %1212 = vst.msk [vmem:[#allocation2 + $0x58] sm:$0xf] %vm1189_vm8, %v1138_v18  ;;  %2399 = vrot.lane.b32.xlu1 %v4348_v11, %s4828_s28  ;;  %v1585_v11 = vrot.slane %v1583_v63, 5  ;;  %v4290_v18 = vld [vmem:[%s4880_s22 + $0x40] sm:$0xf]  ;;  %v1595_v28 = vrot.slane %v1594_v17, 4 }
  0xfb   : > { %2397 = vrot.lane.b32.xlu0 %v4347_v15, %s4828_s28  ;;  %v3195_v15 = vsel %vm5035_vm6, %v4472_v3, %v3194_v44  ;;  %v2106_v23 = vrot.slane %v4290_v18, 5  ;;  %v1576_v26 = vsel %vm4891_vm2, %v1571_v16, %v5532_v45  ;;  %v4385_v44 = vld [vmem:[%s4880_s22 + $0x48] sm:$0xf]  ;;  %v4387_v3 = vld [vmem:[%s4880_s22 + $0x50] sm:$0x1] }
  0xfc   : > { %v1144_v31 = vpop.permute.xlu1 %1143  ;;  %v1586_v20 = vsel %vm4891_vm2, %v1581_v10, %v1585_v11  ;;  %v1600_v38 = vsel %vm4891_vm2, %v1595_v28, %v1599_v0  ;;  %v2659_v54 = vshrl.u32 %v4385_v44, 16  ;;  %v2688_v10 = vrot.slane %v2686_v60, 5  ;;  %v4350_v11 = vld [vmem:[%s4880_s22 + $0x4c] sm:$0xf]  ;;  %v4349_v16 = vld [vmem:[%s4880_s22 + $0x48] sm:$0xf] }
  0xfd   : > { %1215 = vst.msk [vmem:[#allocation2 + $0x64] sm:$0xf] %vm1189_vm8, %v1144_v31  ;;  %v1142_v36 = vpop.permute.xlu0 %1141  ;;  %v4289_v31 = vld [vmem:[%s4880_s22 + $0x3c] sm:$0xe]  ;;  %v2108_v34 = vrot.slane %v2106_v23, 4  ;;  %v2678_v13 = vshll.u32 %v4387_v3, 16 }
  0xfe   : > { %1214 = vst.msk [vmem:[#allocation2 + $0x60] sm:$0xf] %vm1189_vm8, %v1142_v36  ;;  %2956 = vrot.lane.b32.xlu1 %v2633_v25, %s4829_s7  ;;  %v4294_v36 = vld [vmem:[%s4880_s22 + $0x50] sm:$0x1]  ;;  %v4329_v39 = vrot.slane %v4289_v31, 9  ;;  %v2661_v4 = vrot.slane %v2659_v54, 4 }
  0xff   : > { %2954 = vrot.lane.b32.xlu0 %v2623_v32, %s4829_s7  ;;  %v2113_v32 = vrot.slane %v4293_v24, 5  ;;  %v2116_v45 = vrot.slane %v4294_v36, 5  ;;  %v2110_v46 = vsel %vm5035_vm6, %v2108_v34, %v2109_v35  ;;  %v4351_v28 = vld [vmem:[%s4880_s22 + $0x54] sm:$0xf] }
 0x100   : > { %v1148_v49 = vpop.permute.xlu1 %1147  ;;  %v2107_v52 = vsel %vm5035_vm6, %v4329_v39, %v2106_v23  ;;  %v4352_v23 = vld [vmem:[%s4880_s22 + $0x58] sm:$0xf]  ;;  %v4433_v39 = vld [vmem:[%s4880_s22 + $0x48] sm:$0xe] }
 0x101   : > { %1217 = vst.msk [vmem:[#allocation2 + $0x6c] sm:$0xf] %vm1189_vm8, %v1148_v49  ;;  %v1146_v55 = vpop.permute.xlu0 %1145  ;;  %v2115_v43 = vrot.slane %v2113_v32, 4  ;;  %v4389_v49 = vld [vmem:[%s4880_s22 + $0x58] sm:$0xf]  ;;  %v4473_v54 = vrot.slane %v4433_v39, 9 }
 0x102   : > { %1216 = vst.msk [vmem:[#allocation2 + $0x68] sm:$0xf] %vm1189_vm8, %v1146_v55  ;;  %2960 = vrot.lane.b32.xlu1 %v2657_v40, %s4829_s7  ;;  %v4386_v40 = vld [vmem:[%s4880_s22 + $0x4c] sm:$0xf]  ;;  %v2662_v55 = vshll.u32 %v4385_v44, 16 }
 0x103   : > { %2958 = vrot.lane.b32.xlu0 %v2647_v41, %s4829_s7  ;;  %v2668_v47 = vshll.u32 %v4386_v40, 16  ;;  %v2672_v48 = vshrl.u32 %v4386_v40, 16  ;;  %v2117_v61 = vsel %vm5035_vm6, %v2115_v43, %v2116_v45  ;;  %v5629_v40 = vld [vmem:[%s4880_s22 + $0x58] sm:$0xf] }
 0x104   : > { %v1152_v2 = vpop.permute.xlu1 %1151  ;;  %v2664_v5 = vrot.slane %v2662_v55, 5  ;;  %v3208_v55 = vrot.slane %v5629_v40, 5 }
 0x105   : > { %1219 = vst.msk [vmem:[#allocation2 + $0x74] sm:$0xf] %vm1189_vm8, %v1152_v2  ;;  %v1150_v8 = vpop.permute.xlu0 %1149  ;;  %v5595_v63 = vrot.slane %v2668_v47, 5  ;;  %v2674_v0 = vrot.slane %v2672_v48, 4  ;;  %v2114_v2 = vsel %vm5035_vm6, %v4330_v53, %v2113_v32  ;;  %v3201_v32 = vrot.slane %v4434_v22, 5 }
 0x106   : > { %1218 = vst.msk [vmem:[#allocation2 + $0x70] sm:$0xf] %vm1189_vm8, %v1150_v8  ;;  %3293 = vrot.lane.b32.xlu1 %v3191_v57, %s4830_s10  ;;  %v2692_v57 = vshll.u32 %v4389_v49, 16  ;;  %v2665_v17 = vor.u32 %v2664_v5, %v2661_v4  ;;  %v4251_v47 = vld [vmem:[%s4880_s22 + $0x64] sm:$0xf] }
 0x107   : > { %3291 = vrot.lane.b32.xlu0 %v3188_v58, %s4830_s10  ;;  %v2696_v58 = vshrl.u32 %v4389_v49, 16  ;;  %v2675_v12 = vor.u32 %v2674_v0, %v5595_v63  ;;  %v3203_v49 = vrot.slane %v3201_v32, 4  ;;  %v1649_v60 = vshrl.u32 %v4251_v47, 16  ;;  %v4436_v5 = vld [vmem:[%s4880_s22 + $0x54] sm:$0xe] }
 0x108   : > { %v1156_v14 = vpop.permute.xlu1 %1155  ;;  %v5603_v7 = vrot.slane %v2692_v57, 5  ;;  %v2666_v29 = vrot.slane %v2665_v17, 4  ;;  %v4252_v17 = vld [vmem:[%s4880_s22 + $0x68] sm:$0x1] }
 0x109   : > { %1221 = vst.msk [vmem:[#allocation2 + $0x7c] sm:$0xf] %vm1189_vm8, %v1156_v14  ;;  %v1154_v19 = vpop.permute.xlu0 %1153  ;;  %v2698_v8 = vrot.slane %v2696_v58, 4  ;;  %v4390_v14 = vld [vmem:[%s4880_s22 + $0x5c] sm:$0x1]  ;;  %v2676_v24 = vrot.slane %v2675_v12, 4 }
 0x10a   : > { %1220 = vst.msk [vmem:[#allocation2 + $0x78] sm:$0xf] %vm1189_vm8, %v1154_v19  ;;  %3297 = vrot.lane.b32.xlu1 %v3198_v9, %s4830_s10  ;;  %v2685_v9 = vrot.slane %v2683_v59, 4  ;;  %v2671_v43 = vsel %vm4891_vm2, %v2666_v29, %v5595_v63  ;;  %v1645_v59 = vshll.u32 %v4251_v47, 16  ;;  %v4249_v63 = vld [vmem:[%s4880_s22 + $0x5c] sm:$0x1] }
 0x10b   : > { %3295 = vrot.lane.b32.xlu0 %v3195_v15, %s4830_s10  ;;  %v2699_v19 = vor.u32 %v2698_v8, %v5603_v7  ;;  %v3210_v8 = vrot.slane %v3208_v55, 4 }
 0x10c   : > { %v1293_v25 = vpop.permute.xlu1 %1292  ;;  %v2689_v21 = vor.u32 %v2688_v10, %v2685_v9  ;;  %v5660_v12 = vrot.slane %v1645_v59, 5 }
 0x10d   : > { %1388 = vst.msk [vmem:[#allocation2 + $0x4] sm:$0xf] %vm1386_vm10, %v1293_v25  ;;  %v1291_v30 = vpop.permute.xlu0 %1290  ;;  %v2680_v25 = vrot.slane %v2678_v13, 5  ;;  %v2700_v34 = vrot.slane %v2699_v19, 4  ;;  %v1651_v13 = vrot.slane %v1649_v60, 4 }
 0x10e   : > { %1387 = vst.msk [vmem:[#allocation2] sm:$0xf] %vm1386_vm10, %v1291_v30  ;;  %1869 = vrot.lane.b32.xlu1 %v1586_v20, %s4826_s26  ;;  %v2702_v20 = vshll.u32 %v4390_v14, 16  ;;  %v4248_v30 = vld [vmem:[%s4880_s22 + $0x58] sm:$0xf]  ;;  %v2690_v36 = vrot.slane %v2689_v21, 4 }
 0x10f   : > { %1867 = vrot.lane.b32.xlu0 %v1576_v26, %s4826_s26  ;;  %v1625_v42 = vshrl.u32 %v4248_v30, 16 }
 0x110   : > { %v1297_v37 = vpop.permute.xlu1 %1296  ;;  %v2704_v35 = vrot.slane %v2702_v20, 5  ;;  %v2695_v53 = vsel %vm4891_vm2, %v2690_v36, %v5603_v7  ;;  %v3202_v7 = vsel %vm5035_vm6, %v4473_v54, %v3201_v32 }
 0x111   : > { %1390 = vst.msk [vmem:[#allocation2 + $0xc] sm:$0xf] %vm1386_vm10, %v1297_v37  ;;  %v1295_v41 = vpop.permute.xlu0 %1294  ;;  %v4435_v37 = vld [vmem:[%s4880_s22 + $0x50] sm:$0x1]  ;;  %v1627_v58 = vrot.slane %v1625_v42, 4 }
 0x112   : > { %1389 = vst.msk [vmem:[#allocation2 + $0x8] sm:$0xf] %vm1386_vm10, %v1295_v41  ;;  %1873 = vrot.lane.b32.xlu1 %v1610_v33, %s4826_s26  ;;  %v4247_v33 = vld [vmem:[%s4880_s22 + $0x54] sm:$0xf]  ;;  %v1621_v41 = vshll.u32 %v4248_v30, 16  ;;  %v3204_v50 = vrot.slane %v4435_v37, 5 }
 0x113   : > { %1871 = vrot.lane.b32.xlu0 %v1600_v38, %s4826_s26  ;;  %v2681_v38 = vsel %vm4891_vm2, %v2676_v24, %v2680_v25  ;;  %v1612_v45 = vshrl.u32 %v4247_v33, 16  ;;  %v1652_v24 = vor.u32 %v1651_v13, %v5660_v12  ;;  %v1655_v25 = vshll.u32 %v4252_v17, 16  ;;  %v4299_v37 = vld [vmem:[%s4880_s22 + $0x64] sm:$0xf]  ;;  %v4393_v13 = vld [vmem:[%s4880_s22 + $0x68] sm:$0x1] }
 0x114   : > { %v1301_v51 = vpop.permute.xlu1 %1300  ;;  %v5647_v57 = vrot.slane %v1621_v41, 5  ;;  %v4297_v41 = vld [vmem:[%s4880_s22 + $0x5c] sm:$0x1] }
 0x115   : > { %1392 = vst.msk [vmem:[#allocation2 + $0x14] sm:$0xf] %vm1386_vm10, %v1301_v51  ;;  %v1299_v56 = vpop.permute.xlu0 %1298  ;;  %v4250_v51 = vld [vmem:[%s4880_s22 + $0x60] sm:$0xf]  ;;  %v1614_v0 = vrot.slane %v1612_v45, 4  ;;  %v2123_v47 = vrot.slane %v4297_v41, 5 }
 0x116   : > { %1391 = vst.msk [vmem:[#allocation2 + $0x10] sm:$0xf] %vm1386_vm10, %v1299_v56  ;;  %2206 = vrot.lane.b32.xlu1 %v2110_v46, %s4827_s27  ;;  %v1615_v46 = vshll.u32 %v4247_v33, 16  ;;  %v4438_v56 = vld [vmem:[%s4880_s22 + $0x5c] sm:$0x1]  ;;  %v1639_v3 = vshll.u32 %v4250_v51, 16  ;;  %v1628_v10 = vor.u32 %v1627_v58, %v5647_v57 }
 0x117   : > { %2204 = vrot.lane.b32.xlu0 %v2107_v52, %s4827_s27  ;;  %v2705_v52 = vsel %vm4891_vm2, %v2700_v34, %v2704_v35  ;;  %v3211_v9 = vrot.slane %v4438_v56, 5  ;;  %v1653_v34 = vrot.slane %v1652_v24, 4  ;;  %v1657_v35 = vrot.slane %v1655_v25, 5  ;;  %v4353_v25 = vld [vmem:[%s4880_s22 + $0x60] sm:$0xf] }
 0x118   : > { %v1305_v1 = vpop.permute.xlu1 %1304  ;;  %v1641_v19 = vrot.slane %v1639_v3, 5  ;;  %v1629_v22 = vrot.slane %v1628_v10, 4  ;;  %v4395_v3 = vld [vmem:[%s4880_s22 + $0x70] sm:$0xf] }
 0x119   : > { %1394 = vst.msk [vmem:[#allocation2 + $0x1c] sm:$0xf] %vm1386_vm10, %v1305_v1  ;;  %v1303_v6 = vpop.permute.xlu0 %1302  ;;  %v1617_v1 = vrot.slane %v1615_v46, 5  ;;  %v3212_v21 = vsel %vm5035_vm6, %v3210_v8, %v3211_v9  ;;  %v1658_v45 = vsel %vm4891_vm2, %v1653_v34, %v1657_v35  ;;  %v2740_v10 = vshll.u32 %v4395_v3, 16 }
 0x11a   : > { %1393 = vst.msk [vmem:[#allocation2 + $0x18] sm:$0xf] %vm1386_vm10, %v1303_v6  ;;  %2210 = vrot.lane.b32.xlu1 %v2117_v61, %s4827_s27  ;;  %v3205_v6 = vsel %vm5035_vm6, %v3203_v49, %v3204_v50  ;;  %v4298_v49 = vld [vmem:[%s4880_s22 + $0x60] sm:$0xe] }
 0x11b   : > { %2208 = vrot.lane.b32.xlu0 %v2114_v2, %s4827_s27  ;;  %v1636_v2 = vshrl.u32 %v4250_v51, 16  ;;  %v4332_v58 = vrot.slane %v4298_v49, 9  ;;  %v4443_v49 = vld [vmem:[%s4880_s22 + $0x70] sm:$0xf] }
 0x11c   : > { %v1309_v15 = vpop.permute.xlu1 %1308 }
 0x11d   : > { %1396 = vst.msk [vmem:[#allocation2 + $0x24] sm:$0xf] %vm1386_vm10, %v1309_v15  ;;  %v1307_v18 = vpop.permute.xlu0 %1306  ;;  %v4474_v15 = vrot.slane %v4436_v5, 9  ;;  %v4394_v5 = vld [vmem:[%s4880_s22 + $0x6c] sm:$0xf] }
 0x11e   : > { %1395 = vst.msk [vmem:[#allocation2 + $0x20] sm:$0xf] %vm1386_vm10, %v1307_v18  ;;  %2403 = vrot.lane.b32.xlu1 %v4350_v11, %s4828_s28  ;;  %v1631_v11 = vshll.u32 %v4249_v63, 16  ;;  %v1638_v18 = vrot.slane %v1636_v2, 4  ;;  %v2734_v17 = vshll.u32 %v4394_v5, 16 }
 0x11f   : > { %2401 = vrot.lane.b32.xlu0 %v4349_v16, %s4828_s28  ;;  %v1618_v16 = vor.u32 %v1617_v1, %v1614_v0 }
 0x120   : > { %v1313_v26 = vpop.permute.xlu1 %1312  ;;  %v1642_v30 = vor.u32 %v1641_v19, %v1638_v18  ;;  %v4354_v19 = vld [vmem:[%s4880_s22 + $0x64] sm:$0xf] }
 0x121   : > { %1398 = vst.msk [vmem:[#allocation2 + $0x2c] sm:$0xf] %vm1386_vm10, %v1313_v26  ;;  %v1311_v31 = vpop.permute.xlu0 %1310  ;;  %v1619_v29 = vrot.slane %v1618_v16, 4  ;;  %v2731_v16 = vshrl.u32 %v4394_v5, 16 }
 0x122   : > { %1397 = vst.msk [vmem:[#allocation2 + $0x28] sm:$0xf] %vm1386_vm10, %v1311_v31  ;;  %2407 = vrot.lane.b32.xlu1 %v4352_v23, %s4828_s28  ;;  %v1633_v23 = vrot.slane %v1631_v11, 5  ;;  %v4296_v31 = vld [vmem:[%s4880_s22 + $0x58] sm:$0xf]  ;;  %v1643_v40 = vrot.slane %v1642_v30, 4 }
 0x123   : > { %2405 = vrot.lane.b32.xlu0 %v4351_v28, %s4828_s28  ;;  %v3209_v28 = vsel %vm5035_vm6, %v4474_v15, %v3208_v55  ;;  %v2120_v36 = vrot.slane %v4296_v31, 5  ;;  %v1624_v39 = vsel %vm4891_vm2, %v1619_v29, %v5647_v57  ;;  %v4391_v55 = vld [vmem:[%s4880_s22 + $0x60] sm:$0xf]  ;;  %v2744_v11 = vshrl.u32 %v4395_v3, 16 }
 0x124   : > { %v1317_v44 = vpop.permute.xlu1 %1316  ;;  %v1634_v33 = vsel %vm4891_vm2, %v1629_v22, %v1633_v23  ;;  %v1648_v51 = vsel %vm4891_vm2, %v1643_v40, %v5660_v12  ;;  %v2707_v1 = vshrl.u32 %v4391_v55, 16  ;;  %v2710_v2 = vshll.u32 %v4391_v55, 16 }
 0x125   : > { %1400 = vst.msk [vmem:[#allocation2 + $0x34] sm:$0xf] %vm1386_vm10, %v1317_v44  ;;  %v1315_v48 = vpop.permute.xlu0 %1314  ;;  %v4295_v44 = vld [vmem:[%s4880_s22 + $0x54] sm:$0xe]  ;;  %v2122_v46 = vrot.slane %v2120_v36, 4  ;;  %v5725_v22 = vrot.slane %v2740_v10, 5 }
 0x126   : > { %1399 = vst.msk [vmem:[#allocation2 + $0x30] sm:$0xf] %vm1386_vm10, %v1315_v48  ;;  %2964 = vrot.lane.b32.xlu1 %v2681_v38, %s4829_s7  ;;  %v4300_v48 = vld [vmem:[%s4880_s22 + $0x68] sm:$0x1]  ;;  %v2712_v15 = vrot.slane %v2710_v2, 5  ;;  %v2746_v23 = vrot.slane %v2744_v11, 4 }
 0x127   : > { %2962 = vrot.lane.b32.xlu0 %v2671_v43, %s4829_s7  ;;  %v2127_v43 = vrot.slane %v4299_v37, 5  ;;  %v2130_v57 = vrot.slane %v4300_v48, 5  ;;  %v2124_v59 = vsel %vm5035_vm6, %v2122_v46, %v2123_v47  ;;  %v2733_v29 = vrot.slane %v2731_v16, 4  ;;  %v4439_v48 = vld [vmem:[%s4880_s22 + $0x60] sm:$0xe] }
 0x128   : > { %v1321_v61 = vpop.permute.xlu1 %1320  ;;  %v2736_v30 = vrot.slane %v2734_v17, 5 }
 0x129   : > { %1402 = vst.msk [vmem:[#allocation2 + $0x3c] sm:$0xf] %vm1386_vm10, %v1321_v61  ;;  %v1319_v4 = vpop.permute.xlu0 %1318  ;;  %v2129_v56 = vrot.slane %v2127_v43, 4 }
 0x12a   : > { %1401 = vst.msk [vmem:[#allocation2 + $0x38] sm:$0xf] %vm1386_vm10, %v1319_v4  ;;  %2968 = vrot.lane.b32.xlu1 %v2705_v52, %s4829_s7  ;;  %v4331_v52 = vrot.slane %v4295_v44, 9  ;;  %v2737_v41 = vor.u32 %v2736_v30, %v2733_v29 }
 0x12b   : > { %2966 = vrot.lane.b32.xlu0 %v2695_v53, %s4829_s7  ;;  %v4392_v53 = vld [vmem:[%s4880_s22 + $0x64] sm:$0xf] }
 0x12c   : > { %v1325_v14 = vpop.permute.xlu1 %1324  ;;  %v2716_v60 = vshll.u32 %v4392_v53, 16  ;;  %v2720_v61 = vshrl.u32 %v4392_v53, 16  ;;  %v2121_v0 = vsel %vm5035_vm6, %v4331_v52, %v2120_v36  ;;  %v2747_v36 = vor.u32 %v2746_v23, %v5725_v22  ;;  %v4254_v53 = vld [vmem:[%s4880_s22 + $0x70] sm:$0xf] }
 0x12d   : > { %1404 = vst.msk [vmem:[#allocation2 + $0x44] sm:$0xf] %vm1386_vm10, %v1325_v14  ;;  %v1323_v20 = vpop.permute.xlu0 %1322  ;;  %v2709_v14 = vrot.slane %v2707_v1, 4  ;;  %v2738_v52 = vrot.slane %v2737_v41, 4  ;;  %v1673_v1 = vshrl.u32 %v4254_v53, 16 }
 0x12e   : > { %1403 = vst.msk [vmem:[#allocation2 + $0x40] sm:$0xf] %vm1386_vm10, %v1323_v20  ;;  %3301 = vrot.lane.b32.xlu1 %v3205_v6, %s4830_s10  ;;  %v2131_v6 = vsel %vm5035_vm6, %v2129_v56, %v2130_v57  ;;  %v5716_v8 = vrot.slane %v2716_v60, 5  ;;  %v2722_v9 = vrot.slane %v2720_v61, 4  ;;  %v2748_v46 = vrot.slane %v2747_v36, 4 }
 0x12f   : > { %3299 = vrot.lane.b32.xlu0 %v3202_v7, %s4830_s10  ;;  %v2128_v7 = vsel %vm5035_vm6, %v4332_v58, %v2127_v43  ;;  %v4441_v43 = vld [vmem:[%s4880_s22 + $0x68] sm:$0x1]  ;;  %v4253_v57 = vld [vmem:[%s4880_s22 + $0x6c] sm:$0xf]  ;;  %v4475_v58 = vrot.slane %v4439_v48, 9  ;;  %v2743_v3 = vsel %vm4891_vm2, %v2738_v52, %v5725_v22 }
 0x130   : > { %v1854_v26 = vpop.permute.xlu1 %1853  ;;  %v2723_v20 = vor.u32 %v2722_v9, %v5716_v8  ;;  %v3218_v56 = vrot.slane %v4441_v43, 5  ;;  %v4444_v61 = vld [vmem:[%s4880_s22 + $0x74] sm:$0x1]  ;;  %v1663_v5 = vshll.u32 %v4253_v57, 16  ;;  %v4256_v9 = vld [vmem:[%s4880_s22 + $0x78] sm:$0xf] }
 0x131   : > { %1949 = vst.msk [vmem:[#allocation2 + $0x4] sm:$0xf] %vm1947_vm11, %v1854_v26  ;;  %v1852_v32 = vpop.permute.xlu0 %1851  ;;  %v2713_v26 = vor.u32 %v2712_v15, %v2709_v14  ;;  %v1675_v15 = vrot.slane %v1673_v1, 4  ;;  %v1684_v22 = vshrl.u32 %v4256_v9, 16  ;;  %v1687_v23 = vshll.u32 %v4256_v9, 16 }
 0x132   : > { %1948 = vst.msk [vmem:[#allocation2] sm:$0xf] %vm1947_vm11, %v1852_v32  ;;  %3305 = vrot.lane.b32.xlu1 %v3212_v21, %s4830_s10  ;;  %v2726_v21 = vshll.u32 %v4393_v13, 16  ;;  %v4440_v32 = vld [vmem:[%s4880_s22 + $0x64] sm:$0xf]  ;;  %v2724_v34 = vrot.slane %v2723_v20, 4 }
 0x133   : > { %3303 = vrot.lane.b32.xlu0 %v3209_v28, %s4830_s10  ;;  %v4396_v28 = vld [vmem:[%s4880_s22 + $0x74] sm:$0x1]  ;;  %v2714_v40 = vrot.slane %v2713_v26, 4  ;;  %v3215_v44 = vrot.slane %v4440_v32, 5  ;;  %v1689_v36 = vrot.slane %v1687_v23, 5 }
 0x134   : > { %v1858_v38 = vpop.permute.xlu1 %1857  ;;  %v2728_v35 = vrot.slane %v2726_v21, 5  ;;  %v2750_v37 = vshll.u32 %v4396_v28, 16  ;;  %v1665_v21 = vrot.slane %v1663_v5, 5  ;;  %v4302_v48 = vld [vmem:[%s4880_s22 + $0x70] sm:$0xf] }
 0x135   : > { %1951 = vst.msk [vmem:[#allocation2 + $0xc] sm:$0xf] %vm1947_vm11, %v1858_v38  ;;  %v1856_v42 = vpop.permute.xlu0 %1855  ;;  %v3217_v55 = vrot.slane %v3215_v44, 4  ;;  %v3216_v10 = vsel %vm5035_vm6, %v4475_v58, %v3215_v44  ;;  %v4400_v23 = vld [vmem:[%s4880_s22 + $0x84] sm:$0xf] }
 0x136   : > { %1950 = vst.msk [vmem:[#allocation2 + $0x8] sm:$0xf] %vm1947_vm11, %v1856_v42  ;;  %1877 = vrot.lane.b32.xlu1 %v1634_v33, %s4826_s26  ;;  %v4356_v33 = vld [vmem:[%s4880_s22 + $0x70] sm:$0xf]  ;;  %v2752_v47 = vrot.slane %v2750_v37, 5 }
 0x137   : > { %1875 = vrot.lane.b32.xlu0 %v1624_v39, %s4826_s26  ;;  %v4355_v39 = vld [vmem:[%s4880_s22 + $0x6c] sm:$0xf] }
 0x138   : > { %v2191_v50 = vpop.permute.xlu1 %2190  ;;  %v2753_v60 = vsel %vm4891_vm2, %v2748_v46, %v2752_v47 }
 0x139   : > { %2286 = vst.msk [vmem:[#allocation2 + $0x4] sm:$0xf] %vm2284_vm12, %v2191_v50  ;;  %v2189_v54 = vpop.permute.xlu0 %2188 }
 0x13a   : > { %2285 = vst.msk [vmem:[#allocation2] sm:$0xf] %vm2284_vm12, %v2189_v54  ;;  %1881 = vrot.lane.b32.xlu1 %v1658_v45, %s4826_s26  ;;  %v2729_v45 = vsel %vm4891_vm2, %v2724_v34, %v2728_v35  ;;  %v4258_v34 = vld [vmem:[%s4880_s22 + $0x80] sm:$0x1]  ;;  %v1686_v35 = vrot.slane %v1684_v22, 4 }
 0x13b   : > { %1879 = vrot.lane.b32.xlu0 %v1648_v51, %s4826_s26  ;;  %v2719_v51 = vsel %vm4891_vm2, %v2714_v40, %v5716_v8  ;;  %v3219_v8 = vsel %vm5035_vm6, %v3217_v55, %v3218_v56  ;;  %v4215_v40 = vld [vmem:[%s4880_s22 + $0x78] sm:$0xf]  ;;  %v1703_v43 = vshll.u32 %v4258_v34, 16  ;;  %v4305_v55 = vld [vmem:[%s4880_s22 + $0x7c] sm:$0xf] }
 0x13c   : > { %v2195_v63 = vpop.permute.xlu1 %2194  ;;  %v1690_v47 = vor.u32 %v1689_v36, %v1686_v35  ;;  %v2779_v35 = vshrl.u32 %v4400_v23, 16  ;;  %v2782_v36 = vshll.u32 %v4400_v23, 16 }
 0x13d   : > { %2288 = vst.msk [vmem:[#allocation2 + $0xc] sm:$0xf] %vm2284_vm12, %v2195_v63  ;;  %v2193_v4 = vpop.permute.xlu0 %2192  ;;  %v4442_v63 = vld [vmem:[%s4880_s22 + $0x6c] sm:$0xe] }
 0x13e   : > { %2287 = vst.msk [vmem:[#allocation2 + $0x8] sm:$0xf] %vm2284_vm12, %v2193_v4  ;;  %2214 = vrot.lane.b32.xlu1 %v2124_v59, %s4827_s27  ;;  %v3222_v59 = vrot.slane %v4443_v49, 5  ;;  %v1660_v4 = vshrl.u32 %v4253_v57, 16  ;;  %v4476_v13 = vrot.slane %v4442_v63, 9  ;;  %v1691_v58 = vrot.slane %v1690_v47, 4 }
 0x13f   : > { %2212 = vrot.lane.b32.xlu0 %v2121_v0, %s4827_s27  ;;  %v1669_v0 = vshll.u32 %v4254_v53, 16  ;;  %v1705_v53 = vrot.slane %v1703_v43, 5  ;;  %v2141_v63 = vrot.slane %v4305_v55, 5  ;;  %v4357_v43 = vld [vmem:[%s4880_s22 + $0x78] sm:$0xf]  ;;  %v2781_v47 = vrot.slane %v2779_v35, 4 }
 0x140   : > { %v2388_v12 = vpop.permute.xlu1 %2387  ;;  %v3224_v11 = vrot.slane %v3222_v59, 4  ;;  %v1662_v20 = vrot.slane %v1660_v4, 4  ;;  %v3223_v32 = vsel %vm5035_vm6, %v4476_v13, %v3222_v59  ;;  %v4303_v59 = vld [vmem:[%s4880_s22 + $0x74] sm:$0x1]  ;;  %v4304_v4 = vld [vmem:[%s4880_s22 + $0x78] sm:$0xe] }
 0x141   : > { %2483 = vst.msk [vmem:[#allocation2 + $0x4] sm:$0xf] %vm2481_vm13, %v2388_v12  ;;  %v2386_v18 = vpop.permute.xlu0 %2385  ;;  %v3225_v12 = vrot.slane %v4444_v61, 5  ;;  %v5772_v14 = vrot.slane %v1669_v0, 5  ;;  %v4301_v61 = vld [vmem:[%s4880_s22 + $0x6c] sm:$0xe] }
 0x142   : > { %2482 = vst.msk [vmem:[#allocation2] sm:$0xf] %vm2481_vm13, %v2386_v18  ;;  %2218 = vrot.lane.b32.xlu1 %v2131_v6, %s4827_s27  ;;  %v4257_v6 = vld [vmem:[%s4880_s22 + $0x7c] sm:$0xf]  ;;  %v4334_v13 = vrot.slane %v4304_v4, 9 }
 0x143   : > { %2216 = vrot.lane.b32.xlu0 %v2128_v7, %s4827_s27  ;;  %v1693_v16 = vshll.u32 %v4257_v6, 16  ;;  %v1697_v17 = vshrl.u32 %v4257_v6, 16  ;;  %v1676_v26 = vor.u32 %v1675_v15, %v5772_v14  ;;  %v4262_v35 = vld [vmem:[%s4880_s22 + $0x90] sm:$0xf] }
 0x144   : > { %v2392_v24 = vpop.permute.xlu1 %2391 }
 0x145   : > { %2485 = vst.msk [vmem:[#allocation2 + $0xc] sm:$0xf] %vm2481_vm13, %v2392_v24  ;;  %v2390_v31 = vpop.permute.xlu0 %2389  ;;  %v5782_v29 = vrot.slane %v1693_v16, 5  ;;  %v1699_v30 = vrot.slane %v1697_v17, 4  ;;  %v1677_v41 = vrot.slane %v1676_v26, 4 }
 0x146   : > { %2484 = vst.msk [vmem:[#allocation2 + $0x8] sm:$0xf] %vm2481_vm13, %v2390_v31  ;;  %2411 = vrot.lane.b32.xlu1 %v4354_v19, %s4828_s28  ;;  %v4255_v19 = vld [vmem:[%s4880_s22 + $0x74] sm:$0x1] }
 0x147   : > { %2409 = vrot.lane.b32.xlu0 %v4353_v25, %s4828_s28  ;;  %v3226_v25 = vsel %vm5035_vm6, %v3224_v11, %v3225_v12  ;;  %v1679_v28 = vshll.u32 %v4255_v19, 16  ;;  %v1700_v44 = vor.u32 %v1699_v30, %v5782_v29  ;;  %v1696_v6 = vsel %vm4891_vm2, %v1691_v58, %v5782_v29 }
 0x148   : > { %v2949_v38 = vpop.permute.xlu1 %2948  ;;  %v2143_v11 = vrot.slane %v2141_v63, 4 }
 0x149   : > { %3044 = vst.msk [vmem:[#allocation2 + $0x4] sm:$0xf] %vm3042_vm14, %v2949_v38  ;;  %v2947_v42 = vpop.permute.xlu0 %2946  ;;  %v1701_v52 = vrot.slane %v1700_v44, 4 }
 0x14a   : > { %3043 = vst.msk [vmem:[#allocation2] sm:$0xf] %vm3042_vm14, %v2947_v42  ;;  %2415 = vrot.lane.b32.xlu1 %v4356_v33, %s4828_s28  ;;  %v1666_v33 = vor.u32 %v1665_v21, %v1662_v20  ;;  %v1681_v42 = vrot.slane %v1679_v28, 5  ;;  %v4401_v21 = vld [vmem:[%s4880_s22 + $0x88] sm:$0xf] }
 0x14b   : > { %2413 = vrot.lane.b32.xlu0 %v4355_v39, %s4828_s28  ;;  %v4216_v39 = vld [vmem:[%s4880_s22 + $0x7c] sm:$0xf]  ;;  %v1706_v0 = vsel %vm4891_vm2, %v1701_v52, %v1705_v53  ;;  %v2788_v29 = vshll.u32 %v4401_v21, 16  ;;  %v2792_v30 = vshrl.u32 %v4401_v21, 16 }
 0x14c   : > { %v2953_v50 = vpop.permute.xlu1 %2952  ;;  %v1667_v46 = vrot.slane %v1666_v33, 4 }
 0x14d   : > { %3046 = vst.msk [vmem:[#allocation2 + $0xc] sm:$0xf] %vm3042_vm14, %v2953_v50  ;;  %v2951_v54 = vpop.permute.xlu0 %2950 }
 0x14e   : > { %3045 = vst.msk [vmem:[#allocation2 + $0x8] sm:$0xf] %vm3042_vm14, %v2951_v54  ;;  %2972 = vrot.lane.b32.xlu1 %v2729_v45, %s4829_s7  ;;  %v2134_v54 = vrot.slane %v4302_v48, 5  ;;  %v1672_v57 = vsel %vm4891_vm2, %v1667_v46, %v5772_v14  ;;  %v4402_v46 = vld [vmem:[%s4880_s22 + $0x8c] sm:$0x1]  ;;  %v2784_v48 = vrot.slane %v2782_v36, 5 }
 0x14f   : > { %2970 = vrot.lane.b32.xlu0 %v2719_v51, %s4829_s7  ;;  %v1682_v51 = vsel %vm4891_vm2, %v1677_v41, %v1681_v42  ;;  %v2790_v41 = vrot.slane %v2788_v29, 5  ;;  %v2794_v42 = vrot.slane %v2792_v30, 4 }
 0x150   : > { %v3286_v2 = vpop.permute.xlu1 %3285  ;;  %v2136_v1 = vrot.slane %v2134_v54, 4  ;;  %v2785_v58 = vor.u32 %v2784_v48, %v2781_v47  ;;  %v1735_v47 = vshll.u32 %v4262_v35, 16 }
 0x151   : > { %3381 = vst.msk [vmem:[#allocation2 + $0x4] sm:$0xf] %vm3379_vm15, %v3286_v2  ;;  %v3284_v7 = vpop.permute.xlu0 %3283  ;;  %v2137_v2 = vrot.slane %v4303_v59, 5  ;;  %v2795_v53 = vor.u32 %v2794_v42, %v2790_v41  ;;  %v4446_v59 = vld [vmem:[%s4880_s22 + $0x7c] sm:$0xf] }
 0x152   : > { %3380 = vst.msk [vmem:[#allocation2] sm:$0xf] %vm3379_vm15, %v3284_v7  ;;  %2976 = vrot.lane.b32.xlu1 %v2753_v60, %s4829_s7  ;;  %v4333_v7 = vrot.slane %v4301_v61, 9 }
 0x153   : > { %2974 = vrot.lane.b32.xlu0 %v2743_v3, %s4829_s7  ;;  %v4306_v3 = vld [vmem:[%s4880_s22 + $0x80] sm:$0x1]  ;;  %v2138_v14 = vsel %vm5035_vm6, %v2136_v1, %v2137_v2  ;;  %v3229_v1 = vrot.slane %v4446_v59, 5  ;;  %v4449_v2 = vld [vmem:[%s4880_s22 + $0x88] sm:$0xf] }
 0x154   : > { %v3290_v18 = vpop.permute.xlu1 %3289  ;;  %v2144_v12 = vrot.slane %v4306_v3, 5 }
 0x155   : > { %3383 = vst.msk [vmem:[#allocation2 + $0xc] sm:$0xf] %vm3379_vm15, %v3290_v18  ;;  %v3288_v24 = vpop.permute.xlu0 %3287  ;;  %v2135_v18 = vsel %vm5035_vm6, %v4333_v7, %v2134_v54  ;;  %v2798_v54 = vshll.u32 %v4402_v46, 16  ;;  %v1732_v46 = vshrl.u32 %v4262_v35, 16 }
 0x156   : > { %3382 = vst.msk [vmem:[#allocation2 + $0x8] sm:$0xf] %vm3379_vm15, %v3288_v24  ;;  %3309 = vrot.lane.b32.xlu1 %v3219_v8, %s4830_s10  ;;  %v4398_v8 = vld [vmem:[%s4880_s22 + $0x7c] sm:$0xf]  ;;  %v2145_v24 = vsel %vm5035_vm6, %v2143_v11, %v2144_v12  ;;  %v3231_v11 = vrot.slane %v3229_v1, 4 }
 0x157   : > { %3307 = vrot.lane.b32.xlu0 %v3216_v10, %s4830_s10  ;;  %v4397_v10 = vld [vmem:[%s4880_s22 + $0x78] sm:$0xf]  ;;  %v2764_v15 = vshll.u32 %v4398_v8, 16  ;;  %v2768_v16 = vshrl.u32 %v4398_v8, 16  ;;  %v1734_v59 = vrot.slane %v1732_v46, 4 }
 0x158   : > { %v1862_v31 = vpop.permute.xlu1 %1861  ;;  %v2755_v19 = vshrl.u32 %v4397_v10, 16  ;;  %v2758_v20 = vshll.u32 %v4397_v10, 16  ;;  %v4445_v8 = vld [vmem:[%s4880_s22 + $0x78] sm:$0xe]  ;;  %v4406_v46 = vld [vmem:[%s4880_s22 + $0x9c] sm:$0xf] }
 0x159   : > { %1953 = vst.msk [vmem:[#allocation2 + $0x14] sm:$0xf] %vm1947_vm11, %v1862_v31  ;;  %v1860_v37 = vpop.permute.xlu0 %1859  ;;  %v4783_v38 = vld [vmem:[#allocation2] sm:$0xff]   ;;  %v2766_v26 = vrot.slane %v2764_v15, 5  ;;  %v2770_v28 = vrot.slane %v2768_v16, 4 }
 0x15a   : > { %1952 = vst.msk [vmem:[#allocation2 + $0x10] sm:$0xf] %vm1947_vm11, %v1860_v37  ;;  %3313 = vrot.lane.b32.xlu1 %v3226_v25, %s4830_s10  ;;  %4707 = vmatprep.mubr.msk.bf16.mxu0 %vm3544_vm0, %v4783_v38  ;;  %v2142_v25 = vsel %vm5035_vm6, %v4334_v13, %v2141_v63  ;;  %v2757_v33 = vrot.slane %v2755_v19, 4  ;;  %v2760_v34 = vrot.slane %v2758_v20, 5  ;;  %v4358_v38 = vld [vmem:[%s4880_s22 + $0x7c] sm:$0xf] }
 0x15b   : > { %3311 = vrot.lane.b32.xlu0 %v3223_v32, %s4830_s10  ;;  %v4399_v32 = vld [vmem:[%s4880_s22 + $0x80] sm:$0x1]  ;;  %v2796_v63 = vrot.slane %v2795_v53, 4  ;;  %v4450_v13 = vld [vmem:[%s4880_s22 + $0x8c] sm:$0x1] }
 0x15c   : > { %v1866_v45 = vpop.permute.xlu1 %1865  ;;  %v4259_v20 = vld [vmem:[%s4880_s22 + $0x84] sm:$0xf] }
 0x15d   : > { %1955 = vst.msk [vmem:[#allocation2 + $0x1c] sm:$0xf] %vm1947_vm11, %v1866_v45  ;;  %v1864_v49 = vpop.permute.xlu0 %1863  ;;  %v4784_v50 = vld [vmem:[#allocation2 + $0x8] sm:$0xff]   ;;  %v2761_v45 = vor.u32 %v2760_v34, %v2757_v33  ;;  %v1708_v30 = vshrl.u32 %v4259_v20, 16 }
 0x15e   : > { %1954 = vst.msk [vmem:[#allocation2 + $0x18] sm:$0xf] %vm1947_vm11, %v1864_v49  ;;  %1328 = vrot.lane.b32.xlu1 %v4216_v39, %s4825_s25  ;;  %4708 = vmatmul.mubr.msk.bf16.vlgmr.msra.gmra.mxu0 %vm3544_vm0, %v4784_v50  ;;  %v2771_v39 = vor.u32 %v2770_v28, %v2766_v26  ;;  %v4360_v50 = vld [vmem:[%s4880_s22 + $0x88] sm:$0xf] }
 0x15f   : > { %1326 = vrot.lane.b32.xlu0 %v4215_v40, %s4825_s25  ;;  %v2774_v40 = vshll.u32 %v4399_v32, 16  ;;  %v4263_v32 = vld [vmem:[%s4880_s22 + $0x94] sm:$0xf] }
 0x160   : > { %v2199_v56 = vpop.permute.xlu1 %2198  ;;  %v1745_v42 = vshrl.u32 %v4263_v32, 16 }
 0x161   : > { %2290 = vst.msk [vmem:[#allocation2 + $0x14] sm:$0xf] %vm2284_vm12, %v2199_v56  ;;  %v2197_v60 = vpop.permute.xlu0 %2196  ;;  %v2776_v52 = vrot.slane %v2774_v40, 5  ;;  %v4359_v56 = vld [vmem:[%s4880_s22 + $0x84] sm:$0xf] }
 0x162   : > { %2289 = vst.msk [vmem:[#allocation2 + $0x10] sm:$0xf] %vm2284_vm12, %v2197_v60  ;;  %1885 = vrot.lane.b32.xlu1 %v1682_v51, %s4826_s26  ;;  %v2772_v51 = vrot.slane %v2771_v39, 4 }
 0x163   : > { %1883 = vrot.lane.b32.xlu0 %v1672_v57, %s4826_s26  ;;  %v2762_v57 = vrot.slane %v2761_v45, 4 }
 0x164   : > { %v2203_v5 = vpop.permute.xlu1 %2202  ;;  %v2777_v61 = vsel %vm4891_vm2, %v2772_v51, %v2776_v52 }
 0x165   : > { %2292 = vst.msk [vmem:[#allocation2 + $0x1c] sm:$0xf] %vm2284_vm12, %v2203_v5  ;;  %v2201_v9 = vpop.permute.xlu0 %2200  ;;  %v2767_v4 = vsel %vm4891_vm2, %v2762_v57, %v2766_v26  ;;  %v2786_v5 = vrot.slane %v2785_v58, 4  ;;  %v4264_v58 = vld [vmem:[%s4880_s22 + $0x98] sm:$0x1] }
 0x166   : > { %2291 = vst.msk [vmem:[#allocation2 + $0x18] sm:$0xf] %vm2284_vm12, %v2201_v9  ;;  %1889 = vrot.lane.b32.xlu1 %v1706_v0, %s4826_s26  ;;  %v2800_v0 = vrot.slane %v2798_v54, 5  ;;  %v3236_v9 = vrot.slane %v4449_v2, 5  ;;  %v1747_v54 = vrot.slane %v1745_v42, 4 }
 0x167   : > { %1887 = vrot.lane.b32.xlu0 %v1696_v6, %s4826_s26  ;;  %v4447_v6 = vld [vmem:[%s4880_s22 + $0x80] sm:$0x1]  ;;  %v2791_v16 = vsel %vm4891_vm2, %v2786_v5, %v2790_v41  ;;  %v1741_v41 = vshll.u32 %v4263_v32, 16  ;;  %v4219_v5 = vld [vmem:[%s4880_s22 + $0x90] sm:$0xf] }
 0x168   : > { %v2396_v17 = vpop.permute.xlu1 %2395  ;;  %v2801_v10 = vsel %vm4891_vm2, %v2796_v63, %v2800_v0  ;;  %v3232_v12 = vrot.slane %v4447_v6, 5  ;;  %v3238_v21 = vrot.slane %v3236_v9, 4  ;;  %v4220_v63 = vld [vmem:[%s4880_s22 + $0x94] sm:$0xf] }
 0x169   : > { %2487 = vst.msk [vmem:[#allocation2 + $0x14] sm:$0xf] %vm2481_vm13, %v2396_v17  ;;  %v2394_v22 = vpop.permute.xlu0 %2393  ;;  %v4477_v17 = vrot.slane %v4445_v8, 9  ;;  %v1743_v53 = vrot.slane %v1741_v41, 5  ;;  %v4308_v8 = vld [vmem:[%s4880_s22 + $0x88] sm:$0xf] }
 0x16a   : > { %2486 = vst.msk [vmem:[#allocation2 + $0x10] sm:$0xf] %vm2481_vm13, %v2394_v22  ;;  %2222 = vrot.lane.b32.xlu1 %v2138_v14, %s4827_s27  ;;  %v4448_v14 = vld [vmem:[%s4880_s22 + $0x84] sm:$0xe]  ;;  %v3239_v22 = vrot.slane %v4450_v13, 5  ;;  %v2148_v13 = vrot.slane %v4308_v8, 5 }
 0x16b   : > { %2220 = vrot.lane.b32.xlu0 %v2135_v18, %s4827_s27  ;;  %v4260_v18 = vld [vmem:[%s4880_s22 + $0x88] sm:$0xf]  ;;  %v4478_v23 = vrot.slane %v4448_v14, 9  ;;  %v3230_v29 = vsel %vm5035_vm6, %v4477_v17, %v3229_v1  ;;  %v1748_v2 = vor.u32 %v1747_v54, %v1743_v53  ;;  %v4311_v14 = vld [vmem:[%s4880_s22 + $0x94] sm:$0xf] }
 0x16c   : > { %v2400_v31 = vpop.permute.xlu1 %2399  ;;  %v1721_v26 = vshrl.u32 %v4260_v18, 16  ;;  %v3240_v36 = vsel %vm5035_vm6, %v3238_v21, %v3239_v22  ;;  %v2155_v21 = vrot.slane %v4311_v14, 5  ;;  %v4405_v54 = vld [vmem:[%s4880_s22 + $0x98] sm:$0x1] }
 0x16d   : > { %2489 = vst.msk [vmem:[#allocation2 + $0x1c] sm:$0xf] %vm2481_vm13, %v2400_v31  ;;  %v2398_v37 = vpop.permute.xlu0 %2397  ;;  %v1711_v31 = vshll.u32 %v4259_v20, 16  ;;  %v4307_v20 = vld [vmem:[%s4880_s22 + $0x84] sm:$0xe] }
 0x16e   : > { %2488 = vst.msk [vmem:[#allocation2 + $0x18] sm:$0xf] %vm2481_vm13, %v2398_v37  ;;  %2226 = vrot.lane.b32.xlu1 %v2145_v24, %s4827_s27  ;;  %v3233_v24 = vsel %vm5035_vm6, %v3231_v11, %v3232_v12  ;;  %v3237_v37 = vsel %vm5035_vm6, %v4478_v23, %v3236_v9  ;;  %v1723_v40 = vrot.slane %v1721_v26, 4  ;;  %v1749_v11 = vrot.slane %v1748_v2, 4  ;;  %v4310_v26 = vld [vmem:[%s4880_s22 + $0x90] sm:$0xe] }
 0x16f   : > { %2224 = vrot.lane.b32.xlu0 %v2142_v25, %s4827_s27  ;;  %v1717_v25 = vshll.u32 %v4260_v18, 16  ;;  %v1713_v45 = vrot.slane %v1711_v31, 5  ;;  %v4309_v18 = vld [vmem:[%s4880_s22 + $0x8c] sm:$0x1]  ;;  %v2150_v23 = vrot.slane %v2148_v13, 4 }
 0x170   : > { %v2957_v44 = vpop.permute.xlu1 %2956  ;;  %v4404_v31 = vld [vmem:[%s4880_s22 + $0x94] sm:$0xf] }
 0x171   : > { %3048 = vst.msk [vmem:[#allocation2 + $0x14] sm:$0xf] %vm3042_vm14, %v2957_v44  ;;  %v2955_v49 = vpop.permute.xlu0 %2954  ;;  %v1719_v39 = vrot.slane %v1717_v25, 5  ;;  %v4312_v25 = vld [vmem:[%s4880_s22 + $0x98] sm:$0x1] }
 0x172   : > { %3047 = vst.msk [vmem:[#allocation2 + $0x10] sm:$0xf] %vm3042_vm14, %v2955_v49  ;;  %2419 = vrot.lane.b32.xlu1 %v4358_v38, %s4828_s28  ;;  %v4261_v38 = vld [vmem:[%s4880_s22 + $0x8c] sm:$0x1]  ;;  %v2158_v35 = vrot.slane %v4312_v25, 5 }
 0x173   : > { %2417 = vrot.lane.b32.xlu0 %v4357_v43, %s4828_s28  ;;  %v1710_v43 = vrot.slane %v1708_v30, 4  ;;  %v1724_v51 = vor.u32 %v1723_v40, %v1719_v39  ;;  %v1727_v52 = vshll.u32 %v4261_v38, 16  ;;  %v4335_v30 = vrot.slane %v4307_v20, 9 }
 0x174   : > { %v2961_v55 = vpop.permute.xlu1 %2960  ;;  %v2812_v38 = vshll.u32 %v4404_v31, 16 }
 0x175   : > { %3050 = vst.msk [vmem:[#allocation2 + $0x1c] sm:$0xf] %vm3042_vm14, %v2961_v55  ;;  %v2959_v60 = vpop.permute.xlu0 %2958  ;;  %v1714_v57 = vor.u32 %v1713_v45, %v1710_v43  ;;  %v1725_v0 = vrot.slane %v1724_v51, 4  ;;  %v1729_v1 = vrot.slane %v1727_v52, 5  ;;  %v2149_v41 = vsel %vm5035_vm6, %v4335_v30, %v2148_v13  ;;  %v4407_v43 = vld [vmem:[%s4880_s22 + $0xa0] sm:$0xf] }
 0x176   : > { %3049 = vst.msk [vmem:[#allocation2 + $0x18] sm:$0xf] %vm3042_vm14, %v2959_v60  ;;  %2423 = vrot.lane.b32.xlu1 %v4360_v50, %s4828_s28  ;;  %v4218_v50 = vld [vmem:[%s4880_s22 + $0x88] sm:$0xf]  ;;  %v1737_v60 = vrot.slane %v1735_v47, 5  ;;  %v2836_v51 = vshll.u32 %v4407_v43, 16 }
 0x177   : > { %2421 = vrot.lane.b32.xlu0 %v4359_v56, %s4828_s28  ;;  %v4217_v56 = vld [vmem:[%s4880_s22 + $0x84] sm:$0xf]  ;;  %v1715_v6 = vrot.slane %v1714_v57, 4  ;;  %v2840_v52 = vshrl.u32 %v4407_v43, 16  ;;  %v2827_v57 = vshrl.u32 %v4406_v46, 16 }
 0x178   : > { %v3294_v3 = vpop.permute.xlu1 %3293 }
 0x179   : > { %3385 = vst.msk [vmem:[#allocation2 + $0x14] sm:$0xf] %vm3379_vm15, %v3294_v3  ;;  %v3292_v7 = vpop.permute.xlu0 %3291  ;;  %v1751_v3 = vshll.u32 %v4264_v58, 16  ;;  %v2830_v58 = vshll.u32 %v4406_v46, 16 }
 0x17a   : > { %3384 = vst.msk [vmem:[#allocation2 + $0x10] sm:$0xf] %vm3379_vm15, %v3292_v7  ;;  %2980 = vrot.lane.b32.xlu1 %v2777_v61, %s4829_s7  ;;  %v1738_v7 = vor.u32 %v1737_v60, %v1734_v59  ;;  %v4362_v60 = vld [vmem:[%s4880_s22 + $0x94] sm:$0xf] }
 0x17b   : > { %2978 = vrot.lane.b32.xlu0 %v2767_v4, %s4829_s7  ;;  %v1753_v12 = vrot.slane %v1751_v3, 5  ;;  %v4361_v3 = vld [vmem:[%s4880_s22 + $0x90] sm:$0xf] }
 0x17c   : > { %v3298_v15 = vpop.permute.xlu1 %3297  ;;  %v1739_v17 = vrot.slane %v1738_v7, 4  ;;  %v2832_v7 = vrot.slane %v2830_v58, 5  ;;  %v4268_v58 = vld [vmem:[%s4880_s22 + $0xa8] sm:$0xf] }
 0x17d   : > { %3387 = vst.msk [vmem:[#allocation2 + $0x1c] sm:$0xf] %vm3379_vm15, %v3298_v15  ;;  %v3296_v19 = vpop.permute.xlu0 %3295  ;;  %v1754_v22 = vsel %vm4891_vm2, %v1749_v11, %v1753_v12 }
 0x17e   : > { %3386 = vst.msk [vmem:[#allocation2 + $0x18] sm:$0xf] %vm3379_vm15, %v3296_v19  ;;  %2984 = vrot.lane.b32.xlu1 %v2801_v10, %s4829_s7  ;;  %v1730_v10 = vsel %vm4891_vm2, %v1725_v0, %v1729_v1  ;;  %v5960_v0 = vrot.slane %v2836_v51, 5  ;;  %v2842_v1 = vrot.slane %v2840_v52, 4 }
 0x17f   : > { %2982 = vrot.lane.b32.xlu0 %v2791_v16, %s4829_s7  ;;  %v1720_v16 = vsel %vm4891_vm2, %v1715_v6, %v1719_v39  ;;  %v2816_v39 = vshrl.u32 %v4404_v31, 16  ;;  %v2829_v6 = vrot.slane %v2827_v57, 4 }
 0x180   : > { %v1870_v28 = vpop.permute.xlu1 %1869  ;;  %v2843_v12 = vor.u32 %v2842_v1, %v5960_v0 }
 0x181   : > { %1957 = vst.msk [vmem:[#allocation2 + $0x24] sm:$0xf] %vm1947_vm11, %v1870_v28  ;;  %v1868_v33 = vpop.permute.xlu0 %1867  ;;  %v4785_v34 = vld [vmem:[#allocation2 + $0x10] sm:$0xff]  }
 0x182   : > { %1956 = vst.msk [vmem:[#allocation2 + $0x20] sm:$0xf] %vm1947_vm11, %v1868_v33  ;;  %3317 = vrot.lane.b32.xlu1 %v3233_v24, %s4830_s10  ;;  %4711 = vmatprep.mubr.msk.bf16.mxu0 %vm3544_vm0, %v4785_v34  ;;  %v2151_v24 = vrot.slane %v4309_v18, 5  ;;  %v4403_v33 = vld [vmem:[%s4880_s22 + $0x90] sm:$0xf]  ;;  %v2157_v34 = vrot.slane %v2155_v21, 4 }
 0x183   : > { %3315 = vrot.lane.b32.xlu0 %v3230_v29, %s4830_s10  ;;  %v1744_v29 = vsel %vm4891_vm2, %v1739_v17, %v1743_v53  ;;  %v2803_v42 = vshrl.u32 %v4403_v33, 16  ;;  %v2833_v17 = vor.u32 %v2832_v7, %v2829_v6  ;;  %v4452_v18 = vld [vmem:[%s4880_s22 + $0x94] sm:$0xf]  ;;  %v1780_v6 = vshrl.u32 %v4268_v58, 16 }
 0x184   : > { %v1874_v44 = vpop.permute.xlu1 %1873  ;;  %v2159_v47 = vsel %vm5035_vm6, %v2157_v34, %v2158_v35  ;;  %v1783_v7 = vshll.u32 %v4268_v58, 16 }
 0x185   : > { %1959 = vst.msk [vmem:[#allocation2 + $0x2c] sm:$0xf] %vm1947_vm11, %v1874_v44  ;;  %v1872_v48 = vpop.permute.xlu0 %1871  ;;  %v4786_v49 = vld [vmem:[#allocation2 + $0x18] sm:$0xff]   ;;  %v2806_v44 = vshll.u32 %v4403_v33, 16 }
 0x186   : > { %1958 = vst.msk [vmem:[#allocation2 + $0x28] sm:$0xf] %vm1947_vm11, %v1872_v48  ;;  %3321 = vrot.lane.b32.xlu1 %v3240_v36, %s4830_s10  ;;  %4712 = vmatmul.mubr.msk.bf16.gmra.mxu0 %vm3544_vm0, %v4786_v49  ;;  %v4336_v36 = vrot.slane %v4310_v26, 9  ;;  %v2814_v49 = vrot.slane %v2812_v38, 5  ;;  %v4454_v38 = vld [vmem:[%s4880_s22 + $0x9c] sm:$0xe] }
 0x187   : > { %3319 = vrot.lane.b32.xlu0 %v3237_v37, %s4830_s10  ;;  %v2152_v37 = vsel %vm5035_vm6, %v2150_v23, %v2151_v24  ;;  %v3243_v23 = vrot.slane %v4452_v18, 5  ;;  %v4455_v24 = vld [vmem:[%s4880_s22 + $0xa0] sm:$0xf]  ;;  %v1782_v18 = vrot.slane %v1780_v6, 4 }
 0x188   : > { %v2207_v55 = vpop.permute.xlu1 %2206  ;;  %v2156_v48 = vsel %vm5035_vm6, %v4336_v36, %v2155_v21  ;;  %v2844_v21 = vrot.slane %v2843_v12, 4  ;;  %v3250_v33 = vrot.slane %v4455_v24, 5 }
 0x189   : > { %2294 = vst.msk [vmem:[#allocation2 + $0x24] sm:$0xf] %vm2284_vm12, %v2207_v55  ;;  %v2205_v61 = vpop.permute.xlu0 %2204  ;;  %v2805_v55 = vrot.slane %v2803_v42, 4  ;;  %v3245_v35 = vrot.slane %v3243_v23, 4  ;;  %v4266_v42 = vld [vmem:[%s4880_s22 + $0xa0] sm:$0xf] }
 0x18a   : > { %2293 = vst.msk [vmem:[#allocation2 + $0x20] sm:$0xf] %vm2284_vm12, %v2205_v61  ;;  %1332 = vrot.lane.b32.xlu1 %v4218_v50, %s4825_s25  ;;  %v2818_v50 = vrot.slane %v2816_v39, 4  ;;  %v3252_v46 = vrot.slane %v3250_v33, 4  ;;  %v1769_v51 = vshrl.u32 %v4266_v42, 16 }
 0x18b   : > { %1330 = vrot.lane.b32.xlu0 %v4217_v56, %s4825_s25  ;;  %v2808_v56 = vrot.slane %v2806_v44, 5 }
 0x18c   : > { %v2211_v4 = vpop.permute.xlu1 %2210  ;;  %v2819_v61 = vor.u32 %v2818_v50, %v2814_v49  ;;  %v1765_v50 = vshll.u32 %v4266_v42, 16 }
 0x18d   : > { %2296 = vst.msk [vmem:[#allocation2 + $0x2c] sm:$0xf] %vm2284_vm12, %v2211_v4  ;;  %v2209_v9 = vpop.permute.xlu0 %2208  ;;  %v2809_v4 = vor.u32 %v2808_v56, %v2805_v55  ;;  %v4269_v56 = vld [vmem:[%s4880_s22 + $0xac] sm:$0xf] }
 0x18e   : > { %2295 = vst.msk [vmem:[#allocation2 + $0x28] sm:$0xf] %vm2284_vm12, %v2209_v9  ;;  %1336 = vrot.lane.b32.xlu1 %v4220_v63, %s4825_s25  ;;  %v2822_v63 = vshll.u32 %v4405_v54, 16  ;;  %v4364_v9 = vld [vmem:[%s4880_s22 + $0xa0] sm:$0xf]  ;;  %v1793_v1 = vshrl.u32 %v4269_v56, 16 }
 0x18f   : > { %1334 = vrot.lane.b32.xlu0 %v4219_v5, %s4825_s25  ;;  %v4408_v5 = vld [vmem:[%s4880_s22 + $0xa4] sm:$0x1] }
 0x190   : > { %v2404_v15 = vpop.permute.xlu1 %2403  ;;  %v2824_v11 = vrot.slane %v2822_v63, 5  ;;  %v2846_v13 = vshll.u32 %v4408_v5, 16  ;;  %v1771_v63 = vrot.slane %v1769_v51, 4 }
 0x191   : > { %2491 = vst.msk [vmem:[#allocation2 + $0x24] sm:$0xf] %vm2481_vm13, %v2404_v15  ;;  %v2402_v19 = vpop.permute.xlu0 %2401  ;;  %v4363_v15 = vld [vmem:[%s4880_s22 + $0x9c] sm:$0xf] }
 0x192   : > { %2490 = vst.msk [vmem:[#allocation2 + $0x20] sm:$0xf] %vm2481_vm13, %v2402_v19  ;;  %1893 = vrot.lane.b32.xlu1 %v1730_v10, %s4826_s26  ;;  %v2820_v10 = vrot.slane %v2819_v61, 4  ;;  %v1767_v61 = vrot.slane %v1765_v50, 5 }
 0x193   : > { %1891 = vrot.lane.b32.xlu0 %v1720_v16, %s4826_s26  ;;  %v2810_v16 = vrot.slane %v2809_v4, 4 }
 0x194   : > { %v2408_v28 = vpop.permute.xlu1 %2407  ;;  %v2825_v20 = vsel %vm4891_vm2, %v2820_v10, %v2824_v11  ;;  %v1772_v10 = vor.u32 %v1771_v63, %v1767_v61 }
 0x195   : > { %2493 = vst.msk [vmem:[#allocation2 + $0x2c] sm:$0xf] %vm2481_vm13, %v2408_v28  ;;  %v2406_v32 = vpop.permute.xlu0 %2405  ;;  %v2815_v26 = vsel %vm4891_vm2, %v2810_v16, %v2814_v49  ;;  %v2834_v28 = vrot.slane %v2833_v17, 4  ;;  %v4270_v17 = vld [vmem:[%s4880_s22 + $0xb0] sm:$0x1] }
 0x196   : > { %2492 = vst.msk [vmem:[#allocation2 + $0x28] sm:$0xf] %vm2481_vm13, %v2406_v32  ;;  %1897 = vrot.lane.b32.xlu1 %v1754_v22, %s4826_s26  ;;  %v2848_v22 = vrot.slane %v2846_v13, 5  ;;  %v4451_v32 = vld [vmem:[%s4880_s22 + $0x90] sm:$0xe]  ;;  %v1795_v13 = vrot.slane %v1793_v1, 4 }
 0x197   : > { %1895 = vrot.lane.b32.xlu0 %v1744_v29, %s4826_s26  ;;  %v4453_v29 = vld [vmem:[%s4880_s22 + $0x98] sm:$0x1] }
 0x198   : > { %v2965_v40 = vpop.permute.xlu1 %2964  ;;  %v2849_v34 = vsel %vm4891_vm2, %v2844_v21, %v2848_v22  ;;  %v3246_v36 = vrot.slane %v4453_v29, 5  ;;  %v4224_v21 = vld [vmem:[%s4880_s22 + $0xac] sm:$0xf]  ;;  %v1773_v22 = vrot.slane %v1772_v10, 4 }
 0x199   : > { %3052 = vst.msk [vmem:[#allocation2 + $0x24] sm:$0xf] %vm3042_vm14, %v2965_v40  ;;  %v2963_v45 = vpop.permute.xlu0 %2962  ;;  %v2839_v40 = vsel %vm4891_vm2, %v2834_v28, %v5960_v0  ;;  %v1789_v0 = vshll.u32 %v4269_v56, 16  ;;  %v4223_v28 = vld [vmem:[%s4880_s22 + $0xa8] sm:$0xf] }
 0x19a   : > { %3051 = vst.msk [vmem:[#allocation2 + $0x20] sm:$0xf] %vm3042_vm14, %v2963_v45  ;;  %2230 = vrot.lane.b32.xlu1 %v2152_v37, %s4827_s27  ;;  %v4456_v37 = vld [vmem:[%s4880_s22 + $0xa4] sm:$0x1]  ;;  %v4265_v45 = vld [vmem:[%s4880_s22 + $0x9c] sm:$0xf]  ;;  %v3247_v49 = vsel %vm5035_vm6, %v3245_v35, %v3246_v36 }
 0x19b   : > { %2228 = vrot.lane.b32.xlu0 %v2149_v41, %s4827_s27  ;;  %v4479_v41 = vrot.slane %v4451_v32, 9  ;;  %v1756_v54 = vshrl.u32 %v4265_v45, 16  ;;  %v1759_v55 = vshll.u32 %v4265_v45, 16  ;;  %v1791_v12 = vrot.slane %v1789_v0, 5 }
 0x19c   : > { %v2969_v53 = vpop.permute.xlu1 %2968 }
 0x19d   : > { %3054 = vst.msk [vmem:[#allocation2 + $0x2c] sm:$0xf] %vm3042_vm14, %v2969_v53  ;;  %v2967_v59 = vpop.permute.xlu0 %2966  ;;  %v3244_v53 = vsel %vm5035_vm6, %v4479_v41, %v3243_v23  ;;  %v1758_v4 = vrot.slane %v1756_v54, 4  ;;  %v1761_v5 = vrot.slane %v1759_v55, 5  ;;  %v1796_v24 = vor.u32 %v1795_v13, %v1791_v12  ;;  %v4315_v41 = vld [vmem:[%s4880_s22 + $0xa4] sm:$0x1] }
 0x19e   : > { %3053 = vst.msk [vmem:[#allocation2 + $0x28] sm:$0xf] %vm3042_vm14, %v2967_v59  ;;  %2234 = vrot.lane.b32.xlu1 %v2159_v47, %s4827_s27  ;;  %v3253_v47 = vrot.slane %v4456_v37, 5  ;;  %v4317_v37 = vld [vmem:[%s4880_s22 + $0xac] sm:$0xf] }
 0x19f   : > { %2232 = vrot.lane.b32.xlu0 %v2156_v48, %s4827_s27  ;;  %v4480_v48 = vrot.slane %v4454_v38, 9  ;;  %v1762_v16 = vor.u32 %v1761_v5, %v1758_v4  ;;  %v4409_v55 = vld [vmem:[%s4880_s22 + $0xa8] sm:$0xf]  ;;  %v4412_v5 = vld [vmem:[%s4880_s22 + $0xb4] sm:$0xf] }
 0x1a0   : > { %v3302_v2 = vpop.permute.xlu1 %3301  ;;  %v3254_v59 = vsel %vm5035_vm6, %v3252_v46, %v3253_v47  ;;  %v2165_v47 = vrot.slane %v4315_v41, 5  ;;  %v2851_v1 = vshrl.u32 %v4409_v55, 16  ;;  %v4411_v13 = vld [vmem:[%s4880_s22 + $0xb0] sm:$0x1] }
 0x1a1   : > { %3389 = vst.msk [vmem:[#allocation2 + $0x24] sm:$0xf] %vm3379_vm15, %v3302_v2  ;;  %v3300_v8 = vpop.permute.xlu0 %3299  ;;  %v1763_v29 = vrot.slane %v1762_v16, 4  ;;  %v2875_v16 = vshrl.u32 %v4412_v5, 16 }
 0x1a2   : > { %3388 = vst.msk [vmem:[#allocation2 + $0x20] sm:$0xf] %vm3379_vm15, %v3300_v8  ;;  %2427 = vrot.lane.b32.xlu1 %v4362_v60, %s4828_s28  ;;  %v3251_v60 = vsel %vm5035_vm6, %v4480_v48, %v3250_v33  ;;  %v4318_v48 = vld [vmem:[%s4880_s22 + $0xb0] sm:$0x1] }
 0x1a3   : > { %2425 = vrot.lane.b32.xlu0 %v4361_v3, %s4828_s28  ;;  %v4267_v3 = vld [vmem:[%s4880_s22 + $0xa4] sm:$0x1] }
 0x1a4   : > { %v3306_v14 = vpop.permute.xlu1 %3305  ;;  %v1775_v11 = vshll.u32 %v4267_v3, 16  ;;  %v4413_v3 = vld [vmem:[%s4880_s22 + $0xb8] sm:$0xf] }
 0x1a5   : > { %3391 = vst.msk [vmem:[#allocation2 + $0x2c] sm:$0xf] %vm3379_vm15, %v3306_v14  ;;  %v3304_v19 = vpop.permute.xlu0 %3303  ;;  %v2884_v10 = vshll.u32 %v4413_v3, 16 }
 0x1a6   : > { %3390 = vst.msk [vmem:[#allocation2 + $0x28] sm:$0xf] %vm3379_vm15, %v3304_v19  ;;  %2431 = vrot.lane.b32.xlu1 %v4364_v9, %s4828_s28  ;;  %v4222_v9 = vld [vmem:[%s4880_s22 + $0xa0] sm:$0xf]  ;;  %v1785_v19 = vrot.slane %v1783_v7, 5  ;;  %v1777_v23 = vrot.slane %v1775_v11, 5 }
 0x1a7   : > { %2429 = vrot.lane.b32.xlu0 %v4363_v15, %s4828_s28  ;;  %v4221_v15 = vld [vmem:[%s4880_s22 + $0x9c] sm:$0xf]  ;;  %v2888_v11 = vshrl.u32 %v4413_v3, 16 }
 0x1a8   : > { %v1878_v25 = vpop.permute.xlu1 %1877  ;;  %v1778_v33 = vsel %vm4891_vm2, %v1773_v22, %v1777_v23  ;;  %v2870_v22 = vshll.u32 %v4411_v13, 16  ;;  %v6082_v23 = vrot.slane %v2884_v10, 5 }
 0x1a9   : > { %1961 = vst.msk [vmem:[#allocation2 + $0x34] sm:$0xf] %vm1947_vm11, %v1878_v25  ;;  %v1876_v30 = vpop.permute.xlu0 %1875  ;;  %v4787_v31 = vld [vmem:[#allocation2 + $0x20] sm:$0xff]   ;;  %v1799_v25 = vshll.u32 %v4270_v17, 16  ;;  %v2878_v17 = vshll.u32 %v4412_v5, 16 }
 0x1aa   : > { %1960 = vst.msk [vmem:[#allocation2 + $0x30] sm:$0xf] %vm1947_vm11, %v1876_v30  ;;  %2988 = vrot.lane.b32.xlu1 %v2825_v20, %s4829_s7  ;;  %4715 = vmatprep.mubr.msk.bf16.mxu0 %vm3544_vm0, %v4787_v31  ;;  %v1786_v30 = vor.u32 %v1785_v19, %v1782_v18  ;;  %v4314_v31 = vld [vmem:[%s4880_s22 + $0xa0] sm:$0xf]  ;;  %v4366_v19 = vld [vmem:[%s4880_s22 + $0xac] sm:$0xf] }
 0x1ab   : > { %2986 = vrot.lane.b32.xlu0 %v2815_v26, %s4829_s7  ;;  %v1801_v35 = vrot.slane %v1799_v25, 5  ;;  %v2162_v36 = vrot.slane %v4314_v31, 5 }
 0x1ac   : > { %v1882_v39 = vpop.permute.xlu1 %1881 }
 0x1ad   : > { %1963 = vst.msk [vmem:[#allocation2 + $0x3c] sm:$0xf] %vm1947_vm11, %v1882_v39  ;;  %v1880_v44 = vpop.permute.xlu0 %1879  ;;  %v4788_v43 = vld [vmem:[#allocation2 + $0x28] sm:$0xff]   ;;  %v1768_v39 = vsel %vm4891_vm2, %v1763_v29, %v1767_v61  ;;  %v2164_v46 = vrot.slane %v2162_v36, 4  ;;  %v2877_v29 = vrot.slane %v2875_v16, 4 }
 0x1ae   : > { %1962 = vst.msk [vmem:[#allocation2 + $0x38] sm:$0xf] %vm1947_vm11, %v1880_v44  ;;  %2992 = vrot.lane.b32.xlu1 %v2849_v34, %s4829_s7  ;;  %4716 = vmatmul.mubr.msk.bf16.gmra.mxu0 %vm3544_vm0, %v4788_v43  ;;  %v1797_v34 = vrot.slane %v1796_v24, 4  ;;  %v4313_v44 = vld [vmem:[%s4880_s22 + $0x9c] sm:$0xe]  ;;  %v2169_v43 = vrot.slane %v4317_v37, 5 }
 0x1af   : > { %2990 = vrot.lane.b32.xlu0 %v2839_v40, %s4829_s7  ;;  %v1787_v40 = vrot.slane %v1786_v30, 4  ;;  %v2890_v24 = vrot.slane %v2888_v11, 4  ;;  %v2880_v30 = vrot.slane %v2878_v17, 5  ;;  %v4274_v17 = vld [vmem:[%s4880_s22 + $0xc0] sm:$0xf] }
 0x1b0   : > { %v2215_v52 = vpop.permute.xlu1 %2214  ;;  %v1802_v45 = vsel %vm4891_vm2, %v1797_v34, %v1801_v35  ;;  %v2171_v56 = vrot.slane %v2169_v43, 4  ;;  %v4367_v34 = vld [vmem:[%s4880_s22 + $0xb4] sm:$0xf] }
 0x1b1   : > { %2298 = vst.msk [vmem:[#allocation2 + $0x34] sm:$0xf] %vm2284_vm12, %v2215_v52  ;;  %v2213_v57 = vpop.permute.xlu0 %2212  ;;  %v1792_v51 = vsel %vm4891_vm2, %v1787_v40, %v1791_v12  ;;  %v4337_v52 = vrot.slane %v4313_v44, 9  ;;  %v2891_v37 = vor.u32 %v2890_v24, %v6082_v23  ;;  %v2881_v41 = vor.u32 %v2880_v30, %v2877_v29 }
 0x1b2   : > { %2297 = vst.msk [vmem:[#allocation2 + $0x30] sm:$0xf] %vm2284_vm12, %v2213_v57  ;;  %3325 = vrot.lane.b32.xlu1 %v3247_v49, %s4830_s10  ;;  %v4316_v49 = vld [vmem:[%s4880_s22 + $0xa8] sm:$0xe]  ;;  %v2172_v57 = vrot.slane %v4318_v48, 5  ;;  %v1828_v29 = vshrl.u32 %v4274_v17, 16 }
 0x1b3   : > { %3323 = vrot.lane.b32.xlu0 %v3244_v53, %s4830_s10  ;;  %v4410_v53 = vld [vmem:[%s4880_s22 + $0xac] sm:$0xf]  ;;  %v4338_v58 = vrot.slane %v4316_v49, 9  ;;  %v2163_v0 = vsel %vm5035_vm6, %v4337_v52, %v2162_v36  ;;  %v2872_v36 = vrot.slane %v2870_v22, 5  ;;  %v4461_v49 = vld [vmem:[%s4880_s22 + $0xb8] sm:$0xf] }
 0x1b4   : > { %v2219_v2 = vpop.permute.xlu1 %2218  ;;  %v2864_v61 = vshrl.u32 %v4410_v53, 16  ;;  %v2173_v6 = vsel %vm5035_vm6, %v2171_v56, %v2172_v57  ;;  %v2882_v52 = vrot.slane %v2881_v41, 4  ;;  %v3264_v56 = vrot.slane %v4461_v49, 5 }
 0x1b5   : > { %2300 = vst.msk [vmem:[#allocation2 + $0x3c] sm:$0xf] %vm2284_vm12, %v2219_v2  ;;  %v2217_v8 = vpop.permute.xlu0 %2216  ;;  %v2854_v2 = vshll.u32 %v4409_v55, 16  ;;  %v2170_v7 = vsel %vm5035_vm6, %v4338_v58, %v2169_v43  ;;  %v4457_v55 = vld [vmem:[%s4880_s22 + $0xa8] sm:$0xe]  ;;  %v1831_v30 = vshll.u32 %v4274_v17, 16 }
 0x1b6   : > { %2299 = vst.msk [vmem:[#allocation2 + $0x38] sm:$0xf] %vm2284_vm12, %v2217_v8  ;;  %3329 = vrot.lane.b32.xlu1 %v3254_v59, %s4830_s10  ;;  %v2166_v59 = vsel %vm5035_vm6, %v2164_v46, %v2165_v47  ;;  %v2892_v46 = vrot.slane %v2891_v37, 4  ;;  %v3266_v5 = vrot.slane %v3264_v56, 4  ;;  %v1830_v41 = vrot.slane %v1828_v29, 4 }
 0x1b7   : > { %3327 = vrot.lane.b32.xlu0 %v3251_v60, %s4830_s10  ;;  %v2860_v60 = vshll.u32 %v4410_v53, 16  ;;  %v4459_v53 = vld [vmem:[%s4880_s22 + $0xb0] sm:$0x1] }
 0x1b8   : > { %v2412_v14 = vpop.permute.xlu1 %2411 }
 0x1b9   : > { %2495 = vst.msk [vmem:[#allocation2 + $0x34] sm:$0xf] %vm2481_vm13, %v2412_v14  ;;  %v2410_v20 = vpop.permute.xlu0 %2409  ;;  %v6072_v8 = vrot.slane %v2860_v60, 5  ;;  %v2853_v14 = vrot.slane %v2851_v1, 4  ;;  %v4462_v60 = vld [vmem:[%s4880_s22 + $0xbc] sm:$0x1] }
 0x1ba   : > { %2494 = vst.msk [vmem:[#allocation2 + $0x30] sm:$0xf] %vm2481_vm13, %v2410_v20  ;;  %1340 = vrot.lane.b32.xlu1 %v4222_v9, %s4825_s25  ;;  %v2866_v9 = vrot.slane %v2864_v61, 4  ;;  %v4365_v20 = vld [vmem:[%s4880_s22 + $0xa8] sm:$0xf]  ;;  %v4481_v1 = vrot.slane %v4457_v55, 9 }
 0x1bb   : > { %1338 = vrot.lane.b32.xlu0 %v4221_v15, %s4825_s25  ;;  %v2856_v15 = vrot.slane %v2854_v2, 5  ;;  %v4460_v61 = vld [vmem:[%s4880_s22 + $0xb4] sm:$0xe]  ;;  %v4272_v2 = vld [vmem:[%s4880_s22 + $0xb8] sm:$0xf] }
 0x1bc   : > { %v2416_v26 = vpop.permute.xlu1 %2415  ;;  %v1817_v10 = vshrl.u32 %v4272_v2, 16 }
 0x1bd   : > { %2497 = vst.msk [vmem:[#allocation2 + $0x3c] sm:$0xf] %vm2481_vm13, %v2416_v26  ;;  %v2414_v32 = vpop.permute.xlu0 %2413  ;;  %v2857_v26 = vor.u32 %v2856_v15, %v2853_v14  ;;  %v4275_v15 = vld [vmem:[%s4880_s22 + $0xc4] sm:$0xf] }
 0x1be   : > { %2496 = vst.msk [vmem:[#allocation2 + $0x38] sm:$0xf] %vm2481_vm13, %v2414_v32  ;;  %1344 = vrot.lane.b32.xlu1 %v4224_v21, %s4825_s25  ;;  %v2867_v21 = vor.u32 %v2866_v9, %v6072_v8  ;;  %v1813_v9 = vshll.u32 %v4272_v2, 16  ;;  %v1837_v22 = vshll.u32 %v4275_v15, 16  ;;  %v4319_v2 = vld [vmem:[%s4880_s22 + $0xb4] sm:$0xe] }
 0x1bf   : > { %1342 = vrot.lane.b32.xlu0 %v4223_v28, %s4825_s25  ;;  %v4414_v28 = vld [vmem:[%s4880_s22 + $0xbc] sm:$0x1]  ;;  %v2858_v40 = vrot.slane %v2857_v26, 4 }
 0x1c0   : > { %v2973_v38 = vpop.permute.xlu1 %2972  ;;  %v2868_v35 = vrot.slane %v2867_v21, 4  ;;  %v1819_v21 = vrot.slane %v1817_v10, 4 }
 0x1c1   : > { %3056 = vst.msk [vmem:[#allocation2 + $0x34] sm:$0xf] %vm3042_vm14, %v2973_v38  ;;  %v2971_v42 = vpop.permute.xlu0 %2970  ;;  %v2894_v38 = vshll.u32 %v4414_v28, 16 }
 0x1c2   : > { %3055 = vst.msk [vmem:[#allocation2 + $0x30] sm:$0xf] %vm3042_vm14, %v2971_v42  ;;  %1901 = vrot.lane.b32.xlu1 %v1778_v33, %s4826_s26  ;;  %v4368_v33 = vld [vmem:[%s4880_s22 + $0xb8] sm:$0xf]  ;;  %v4458_v42 = vld [vmem:[%s4880_s22 + $0xac] sm:$0xf] }
 0x1c3   : > { %1899 = vrot.lane.b32.xlu0 %v1768_v39, %s4826_s26  ;;  %v2896_v47 = vrot.slane %v2894_v38, 5  ;;  %v3257_v48 = vrot.slane %v4458_v42, 5  ;;  %v4225_v38 = vld [vmem:[%s4880_s22 + $0xb4] sm:$0xf]  ;;  %v1833_v42 = vrot.slane %v1831_v30, 5 }
 0x1c4   : > { %v2977_v50 = vpop.permute.xlu1 %2976 }
 0x1c5   : > { %3058 = vst.msk [vmem:[#allocation2 + $0x3c] sm:$0xf] %vm3042_vm14, %v2977_v50  ;;  %v2975_v54 = vpop.permute.xlu0 %2974  ;;  %v2897_v57 = vsel %vm4891_vm2, %v2892_v46, %v2896_v47  ;;  %v3259_v58 = vrot.slane %v3257_v48, 4 }
 0x1c6   : > { %3057 = vst.msk [vmem:[#allocation2 + $0x38] sm:$0xf] %vm3042_vm14, %v2975_v54  ;;  %1905 = vrot.lane.b32.xlu1 %v1802_v45, %s4826_s26  ;;  %v2873_v45 = vsel %vm4891_vm2, %v2868_v35, %v2872_v36  ;;  %v1839_v35 = vrot.slane %v1837_v22, 5 }
 0x1c7   : > { %1903 = vrot.lane.b32.xlu0 %v1792_v51, %s4826_s26  ;;  %v2863_v51 = vsel %vm4891_vm2, %v2858_v40, %v6072_v8  ;;  %v4276_v40 = vld [vmem:[%s4880_s22 + $0xc8] sm:$0x1] }
 0x1c8   : > { %v3310_v63 = vpop.permute.xlu1 %3309 }
 0x1c9   : > { %3393 = vst.msk [vmem:[#allocation2 + $0x34] sm:$0xf] %vm3379_vm15, %v3310_v63  ;;  %v3308_v4 = vpop.permute.xlu0 %3307 }
 0x1ca   : > { %3392 = vst.msk [vmem:[#allocation2 + $0x30] sm:$0xf] %vm3379_vm15, %v3308_v4  ;;  %2238 = vrot.lane.b32.xlu1 %v2166_v59, %s4827_s27  ;;  %v3260_v59 = vrot.slane %v4459_v53, 5  ;;  %v4271_v4 = vld [vmem:[%s4880_s22 + $0xb4] sm:$0xf] }
 0x1cb   : > { %2236 = vrot.lane.b32.xlu0 %v2163_v0, %s4827_s27  ;;  %v2887_v0 = vsel %vm4891_vm2, %v2882_v52, %v6082_v23  ;;  %v1804_v13 = vshrl.u32 %v4271_v4, 16  ;;  %v1807_v14 = vshll.u32 %v4271_v4, 16  ;;  %v1841_v23 = vshrl.u32 %v4275_v15, 16  ;;  %v4320_v53 = vld [vmem:[%s4880_s22 + $0xb8] sm:$0xf] }
 0x1cc   : > { %v3314_v12 = vpop.permute.xlu1 %3313  ;;  %v3261_v8 = vsel %vm5035_vm6, %v3259_v58, %v3260_v59  ;;  %v1834_v52 = vor.u32 %v1833_v42, %v1830_v41  ;;  %v2176_v58 = vrot.slane %v4320_v53, 5  ;;  %v4323_v59 = vld [vmem:[%s4880_s22 + $0xc4] sm:$0xf] }
 0x1cd   : > { %3395 = vst.msk [vmem:[#allocation2 + $0x3c] sm:$0xf] %vm3379_vm15, %v3314_v12  ;;  %v3312_v18 = vpop.permute.xlu0 %3311  ;;  %v3258_v12 = vsel %vm5035_vm6, %v4481_v1, %v3257_v48  ;;  %v1806_v26 = vrot.slane %v1804_v13, 4  ;;  %v1809_v28 = vrot.slane %v1807_v14, 5  ;;  %v1843_v36 = vrot.slane %v1841_v23, 4 }
 0x1ce   : > { %3394 = vst.msk [vmem:[#allocation2 + $0x38] sm:$0xf] %vm3379_vm15, %v3312_v18  ;;  %2242 = vrot.lane.b32.xlu1 %v2173_v6, %s4827_s27  ;;  %v3267_v6 = vrot.slane %v4462_v60, 5  ;;  %v1847_v48 = vshll.u32 %v4276_v40, 16  ;;  %v4415_v14 = vld [vmem:[%s4880_s22 + $0xc0] sm:$0xf] }
 0x1cf   : > { %2240 = vrot.lane.b32.xlu0 %v2170_v7, %s4827_s27  ;;  %v4482_v7 = vrot.slane %v4460_v61, 9  ;;  %v1844_v47 = vor.u32 %v1843_v36, %v1839_v35  ;;  %v2899_v23 = vshrl.u32 %v4415_v14, 16 }
 0x1d0   : > { %v1329_v25 = vpop.permute.xlu1 %1328  ;;  %v3268_v18 = vsel %vm5035_vm6, %v3266_v5, %v3267_v6  ;;  %v2178_v5 = vrot.slane %v2176_v58, 4 }
 0x1d1   : > { %1406 = vst.msk [vmem:[#allocation2 + $0x4c] sm:$0xf] %vm1386_vm10, %v1329_v25  ;;  %v1327_v31 = vpop.permute.xlu0 %1326  ;;  %v4789_v32 = vld [vmem:[#allocation2 + $0x30] sm:$0xff]   ;;  %v4273_v25 = vld [vmem:[%s4880_s22 + $0xbc] sm:$0x1] }
 0x1d2   : > { %1405 = vst.msk [vmem:[#allocation2 + $0x48] sm:$0xf] %vm1386_vm10, %v1327_v31  ;;  %2435 = vrot.lane.b32.xlu1 %v4366_v19, %s4828_s28  ;;  %4719 = vmatprep.mubr.msk.bf16.mxu0 %vm3544_vm0, %v4789_v32  ;;  %v3265_v19 = vsel %vm5035_vm6, %v4482_v7, %v3264_v56  ;;  %v4226_v32 = vld [vmem:[%s4880_s22 + $0xb8] sm:$0xf]  ;;  %v1845_v56 = vrot.slane %v1844_v47, 4 }
 0x1d3   : > { %2433 = vrot.lane.b32.xlu0 %v4365_v20, %s4828_s28  ;;  %v1815_v20 = vrot.slane %v1813_v9, 5  ;;  %v4324_v7 = vld [vmem:[%s4880_s22 + $0xc8] sm:$0x1] }
 0x1d4   : > { %v1886_v39 = vpop.permute.xlu1 %1885 }
 0x1d5   : > { %1965 = vst.msk [vmem:[#allocation2 + $0x44] sm:$0xf] %vm1947_vm11, %v1886_v39  ;;  %v1884_v44 = vpop.permute.xlu0 %1883  ;;  %v4790_v43 = vld [vmem:[#allocation2 + $0x38] sm:$0xff]   ;;  %v1810_v39 = vor.u32 %v1809_v28, %v1806_v26  ;;  %v4418_v28 = vld [vmem:[%s4880_s22 + $0xcc] sm:$0xf] }
 0x1d6   : > { %1964 = vst.msk [vmem:[#allocation2 + $0x40] sm:$0xf] %vm1947_vm11, %v1884_v44  ;;  %2439 = vrot.lane.b32.xlu1 %v4368_v33, %s4828_s28  ;;  %4720 = vmatmul.mubr.msk.bf16.gmra.mxu0 %vm3544_vm0, %v4790_v43  ;;  %v1820_v33 = vor.u32 %v1819_v21, %v1815_v20  ;;  %v4228_v43 = vld [vmem:[%s4880_s22 + $0xc4] sm:$0xf]  ;;  %v2926_v40 = vshll.u32 %v4418_v28, 16 }
 0x1d7   : > { %2437 = vrot.lane.b32.xlu0 %v4367_v34, %s4828_s28  ;;  %v1823_v34 = vshll.u32 %v4273_v25, 16  ;;  %v4419_v25 = vld [vmem:[%s4880_s22 + $0xd0] sm:$0xf] }
 0x1d8   : > { %v1890_v50 = vpop.permute.xlu1 %1889  ;;  %v2928_v53 = vrot.slane %v2926_v40, 5 }
 0x1d9   : > { %1967 = vst.msk [vmem:[#allocation2 + $0x4c] sm:$0xf] %vm1947_vm11, %v1890_v50  ;;  %v1888_v54 = vpop.permute.xlu0 %1887  ;;  %v1825_v46 = vrot.slane %v1823_v34, 5  ;;  %v4227_v50 = vld [vmem:[%s4880_s22 + $0xc0] sm:$0xf]  ;;  %v2932_v34 = vshll.u32 %v4419_v25, 16 }
 0x1da   : > { %1966 = vst.msk [vmem:[#allocation2 + $0x48] sm:$0xf] %vm1947_vm11, %v1888_v54  ;;  %2996 = vrot.lane.b32.xlu1 %v2873_v45, %s4829_s7  ;;  %v1821_v45 = vrot.slane %v1820_v33, 4 }
 0x1db   : > { %2994 = vrot.lane.b32.xlu0 %v2863_v51, %s4829_s7  ;;  %v1811_v51 = vrot.slane %v1810_v39, 4  ;;  %v2923_v39 = vshrl.u32 %v4418_v28, 16  ;;  %v2934_v47 = vrot.slane %v2932_v34, 5 }
 0x1dc   : > { %v2223_v63 = vpop.permute.xlu1 %2222  ;;  %v1826_v55 = vsel %vm4891_vm2, %v1821_v45, %v1825_v46 }
 0x1dd   : > { %2302 = vst.msk [vmem:[#allocation2 + $0x44] sm:$0xf] %vm2284_vm12, %v2223_v63  ;;  %v2221_v3 = vpop.permute.xlu0 %2220  ;;  %v1816_v61 = vsel %vm4891_vm2, %v1811_v51, %v1815_v20  ;;  %v1835_v63 = vrot.slane %v1834_v52, 4  ;;  %v4420_v51 = vld [vmem:[%s4880_s22 + $0xd4] sm:$0x1]  ;;  %v2925_v52 = vrot.slane %v2923_v39, 4 }
 0x1de   : > { %2301 = vst.msk [vmem:[#allocation2 + $0x40] sm:$0xf] %vm2284_vm12, %v2221_v3  ;;  %3000 = vrot.lane.b32.xlu1 %v2897_v57, %s4829_s7  ;;  %v1849_v57 = vrot.slane %v1847_v48, 5  ;;  %v2183_v3 = vrot.slane %v4323_v59, 5 }
 0x1df   : > { %2998 = vrot.lane.b32.xlu0 %v2887_v0, %s4829_s7  ;;  %v4321_v0 = vld [vmem:[%s4880_s22 + $0xbc] sm:$0x1]  ;;  %v1840_v10 = vsel %vm4891_vm2, %v1835_v63, %v1839_v35  ;;  %v2936_v35 = vshrl.u32 %v4419_v25, 16  ;;  %v4371_v63 = vld [vmem:[%s4880_s22 + $0xcc] sm:$0xf] }
 0x1e0   : > { %v2227_v11 = vpop.permute.xlu1 %2226  ;;  %v1850_v4 = vsel %vm4891_vm2, %v1845_v56, %v1849_v57  ;;  %v2179_v6 = vrot.slane %v4321_v0, 5  ;;  %v2185_v15 = vrot.slane %v2183_v3, 4  ;;  %v4372_v56 = vld [vmem:[%s4880_s22 + $0xd0] sm:$0xf] }
 0x1e1   : > { %2304 = vst.msk [vmem:[#allocation2 + $0x4c] sm:$0xf] %vm2284_vm12, %v2227_v11  ;;  %v2225_v16 = vpop.permute.xlu0 %2224  ;;  %v4339_v11 = vrot.slane %v4319_v2, 9  ;;  %v2938_v48 = vrot.slane %v2936_v35, 4  ;;  %v4464_v2 = vld [vmem:[%s4880_s22 + $0xc4] sm:$0xf] }
 0x1e2   : > { %2303 = vst.msk [vmem:[#allocation2 + $0x48] sm:$0xf] %vm2284_vm12, %v2225_v16  ;;  %3333 = vrot.lane.b32.xlu1 %v3261_v8, %s4830_s10  ;;  %v4322_v8 = vld [vmem:[%s4880_s22 + $0xc0] sm:$0xe]  ;;  %v2186_v16 = vrot.slane %v4324_v7, 5  ;;  %v3271_v7 = vrot.slane %v4464_v2, 5 }
 0x1e3   : > { %3331 = vrot.lane.b32.xlu0 %v3258_v12, %s4830_s10  ;;  %v4416_v12 = vld [vmem:[%s4880_s22 + $0xc4] sm:$0xf]  ;;  %v4340_v17 = vrot.slane %v4322_v8, 9  ;;  %v2177_v22 = vsel %vm5035_vm6, %v4339_v11, %v2176_v58  ;;  %v2939_v59 = vor.u32 %v2938_v48, %v2934_v47  ;;  %v4465_v11 = vld [vmem:[%s4880_s22 + $0xc8] sm:$0x1] }
 0x1e4   : > { %v2420_v24 = vpop.permute.xlu1 %2419  ;;  %v2912_v20 = vshrl.u32 %v4416_v12, 16  ;;  %v2187_v29 = vsel %vm5035_vm6, %v2185_v15, %v2186_v16  ;;  %v3273_v16 = vrot.slane %v3271_v7, 4 }
 0x1e5   : > { %2499 = vst.msk [vmem:[#allocation2 + $0x44] sm:$0xf] %vm2481_vm13, %v2420_v24  ;;  %v2418_v31 = vpop.permute.xlu0 %2417  ;;  %v2902_v24 = vshll.u32 %v4415_v14, 16  ;;  %v2184_v30 = vsel %vm5035_vm6, %v4340_v17, %v2183_v3  ;;  %v4463_v14 = vld [vmem:[%s4880_s22 + $0xc0] sm:$0xe]  ;;  %v3274_v17 = vrot.slane %v4465_v11, 5 }
 0x1e6   : > { %2498 = vst.msk [vmem:[#allocation2 + $0x40] sm:$0xf] %vm2481_vm13, %v2418_v31  ;;  %3337 = vrot.lane.b32.xlu1 %v3268_v18, %s4830_s10  ;;  %v2180_v18 = vsel %vm5035_vm6, %v2178_v5, %v2179_v6  ;;  %v4417_v31 = vld [vmem:[%s4880_s22 + $0xc8] sm:$0x1]  ;;  %v2914_v33 = vrot.slane %v2912_v20, 4  ;;  %v2940_v5 = vrot.slane %v2939_v59, 4 }
 0x1e7   : > { %3335 = vrot.lane.b32.xlu0 %v3265_v19, %s4830_s10  ;;  %v2908_v19 = vshll.u32 %v4416_v12, 16  ;;  %v2918_v46 = vshll.u32 %v4417_v31, 16  ;;  %v4467_v12 = vld [vmem:[%s4880_s22 + $0xd0] sm:$0xf]  ;;  %v3275_v25 = vsel %vm5035_vm6, %v3273_v16, %v3274_v17 }
 0x1e8   : > { %v2424_v37 = vpop.permute.xlu1 %2423 }
 0x1e9   : > { %2501 = vst.msk [vmem:[#allocation2 + $0x4c] sm:$0xf] %vm2481_vm13, %v2424_v37  ;;  %v2422_v44 = vpop.permute.xlu0 %2421  ;;  %v2901_v37 = vrot.slane %v2899_v23, 4  ;;  %v2920_v58 = vrot.slane %v2918_v46, 5 }
 0x1ea   : > { %2500 = vst.msk [vmem:[#allocation2 + $0x48] sm:$0xf] %vm2481_vm13, %v2422_v44  ;;  %1348 = vrot.lane.b32.xlu1 %v4226_v32, %s4825_s25  ;;  %v6195_v32 = vrot.slane %v2908_v19, 5  ;;  %v4370_v44 = vld [vmem:[%s4880_s22 + $0xc4] sm:$0xf] }
 0x1eb   : > { %1346 = vrot.lane.b32.xlu0 %v4225_v38, %s4825_s25  ;;  %v2904_v38 = vrot.slane %v2902_v24, 5  ;;  %v4466_v24 = vld [vmem:[%s4880_s22 + $0xcc] sm:$0xe] }
 0x1ec   : > { %v2981_v49 = vpop.permute.xlu1 %2980  ;;  %v2915_v45 = vor.u32 %v2914_v33, %v6195_v32 }
 0x1ed   : > { %3060 = vst.msk [vmem:[#allocation2 + $0x44] sm:$0xf] %vm3042_vm14, %v2981_v49  ;;  %v2979_v54 = vpop.permute.xlu0 %2978 }
 0x1ee   : > { %3059 = vst.msk [vmem:[#allocation2 + $0x40] sm:$0xf] %vm3042_vm14, %v2979_v54  ;;  %1352 = vrot.lane.b32.xlu1 %v4228_v43, %s4825_s25  ;;  %v4369_v43 = vld [vmem:[%s4880_s22 + $0xc0] sm:$0xf]  ;;  %v2916_v57 = vrot.slane %v2915_v45, 4 }
 0x1ef   : > { %1350 = vrot.lane.b32.xlu0 %v4227_v50, %s4825_s25  ;;  %v2905_v50 = vor.u32 %v2904_v38, %v2901_v37 }
 0x1f0   : > { %v2985_v60 = vpop.permute.xlu1 %2984 }
 0x1f1   : > { %3062 = vst.msk [vmem:[#allocation2 + $0x4c] sm:$0xf] %vm3042_vm14, %v2985_v60  ;;  %v2983_v1 = vpop.permute.xlu0 %2982  ;;  %v2942_v60 = vshll.u32 %v4420_v51, 16  ;;  %v2906_v0 = vrot.slane %v2905_v50, 4 }
 0x1f2   : > { %3061 = vst.msk [vmem:[#allocation2 + $0x48] sm:$0xf] %vm3042_vm14, %v2983_v1  ;;  %1909 = vrot.lane.b32.xlu1 %v1826_v55, %s4826_s26  ;;  %v2929_v1 = vor.u32 %v2928_v53, %v2925_v52 }
 0x1f3   : > { %1907 = vrot.lane.b32.xlu0 %v1816_v61, %s4826_s26  ;;  %v2944_v6 = vrot.slane %v2942_v60, 5 }
 0x1f4   : > { %v3318_v9 = vpop.permute.xlu1 %3317 }
 0x1f5   : > { %3397 = vst.msk [vmem:[#allocation2 + $0x44] sm:$0xf] %vm3379_vm15, %v3318_v9  ;;  %v3316_v13 = vpop.permute.xlu0 %3315  ;;  %v2911_v9 = vsel %vm4891_vm2, %v2906_v0, %v6195_v32  ;;  %v2945_v15 = vsel %vm4891_vm2, %v2940_v5, %v2944_v6 }
 0x1f6   : > { %3396 = vst.msk [vmem:[#allocation2 + $0x40] sm:$0xf] %vm3379_vm15, %v3316_v13  ;;  %1913 = vrot.lane.b32.xlu1 %v1850_v4, %s4826_s26  ;;  %v2921_v4 = vsel %vm4891_vm2, %v2916_v57, %v2920_v58 }
 0x1f7   : > { %1911 = vrot.lane.b32.xlu0 %v1840_v10, %s4826_s26  ;;  %v2930_v10 = vrot.slane %v2929_v1, 4 }
 0x1f8   : > { %v3322_v21 = vpop.permute.xlu1 %3321 }
 0x1f9   : > { %3399 = vst.msk [vmem:[#allocation2 + $0x4c] sm:$0xf] %vm3379_vm15, %v3322_v21  ;;  %v3320_v26 = vpop.permute.xlu0 %3319  ;;  %v2935_v20 = vsel %vm4891_vm2, %v2930_v10, %v2934_v47  ;;  %v4483_v21 = vrot.slane %v4463_v14, 9 }
 0x1fa   : > { %3398 = vst.msk [vmem:[#allocation2 + $0x48] sm:$0xf] %vm3379_vm15, %v3320_v26  ;;  %2246 = vrot.lane.b32.xlu1 %v2180_v18, %s4827_s27  ;;  %v3278_v18 = vrot.slane %v4467_v12, 5 }
 0x1fb   : > { %2244 = vrot.lane.b32.xlu0 %v2177_v22, %s4827_s27  ;;  %v4468_v22 = vld [vmem:[%s4880_s22 + $0xd4] sm:$0x1]  ;;  %v3272_v27 = vsel %vm5035_vm6, %v4483_v21, %v3271_v7 }
 0x1fc   : > { %v1333_v36 = vpop.permute.xlu1 %1332  ;;  %v3280_v26 = vrot.slane %v3278_v18, 4  ;;  %v3281_v28 = vrot.slane %v4468_v22, 5 }
 0x1fd   : > { %1408 = vst.msk [vmem:[#allocation2 + $0x54] sm:$0xf] %vm1386_vm10, %v1333_v36  ;;  %v1331_v41 = vpop.permute.xlu0 %1330  ;;  %v4791_v42 = vld [vmem:[#allocation2 + $0x40] sm:$0xff]  }
 0x1fe   : > { %1407 = vst.msk [vmem:[#allocation2 + $0x50] sm:$0xf] %vm1386_vm10, %v1331_v41  ;;  %2250 = vrot.lane.b32.xlu1 %v2187_v29, %s4827_s27  ;;  %4723 = vmatprep.mubr.msk.bf16.mxu1 %vm3544_vm0, %v4791_v42  ;;  %v3282_v32 = vsel %vm5035_vm6, %v3280_v26, %v3281_v28 }
 0x1ff   : > { %2248 = vrot.lane.b32.xlu0 %v2184_v30, %s4827_s27  ;;  %v4484_v30 = vrot.slane %v4466_v24, 9 }
 0x200   : > { %v1337_v49 = vpop.permute.xlu1 %1336 }
 0x201   : > { %1410 = vst.msk [vmem:[#allocation2 + $0x5c] sm:$0xf] %vm1386_vm10, %v1337_v49  ;;  %v1335_v54 = vpop.permute.xlu0 %1334  ;;  %v4792_v55 = vld [vmem:[#allocation2 + $0x48] sm:$0xff]   ;;  %v3279_v34 = vsel %vm5035_vm6, %v4484_v30, %v3278_v18 }
 0x202   : > { %1409 = vst.msk [vmem:[#allocation2 + $0x58] sm:$0xf] %vm1386_vm10, %v1335_v54  ;;  %2443 = vrot.lane.b32.xlu1 %v4370_v44, %s4828_s28  ;;  %4724 = vmatmul.mubr.msk.bf16.vlgmr.msra.gmra.mxu1 %vm3544_vm0, %v4792_v55 }
 0x203   : > { %2441 = vrot.lane.b32.xlu0 %v4369_v43, %s4828_s28 }
 0x204   : > { %v1894_v61 = vpop.permute.xlu1 %1893 }
 0x205   : > { %1969 = vst.msk [vmem:[#allocation2 + $0x54] sm:$0xf] %vm1947_vm11, %v1894_v61  ;;  %v1892_v3 = vpop.permute.xlu0 %1891 }
 0x206   : > { %1968 = vst.msk [vmem:[#allocation2 + $0x50] sm:$0xf] %vm1947_vm11, %v1892_v3  ;;  %2447 = vrot.lane.b32.xlu1 %v4372_v56, %s4828_s28 }
 0x207   : > { %2445 = vrot.lane.b32.xlu0 %v4371_v63, %s4828_s28 }
 0x208   : > { %v1898_v8 = vpop.permute.xlu1 %1897 }
 0x209   : > { %1971 = vst.msk [vmem:[#allocation2 + $0x5c] sm:$0xf] %vm1947_vm11, %v1898_v8  ;;  %v1896_v13 = vpop.permute.xlu0 %1895 }
 0x20a   : > { %1970 = vst.msk [vmem:[#allocation2 + $0x58] sm:$0xf] %vm1947_vm11, %v1896_v13  ;;  %3004 = vrot.lane.b32.xlu1 %v2921_v4, %s4829_s7 }
 0x20b   : > { %3002 = vrot.lane.b32.xlu0 %v2911_v9, %s4829_s7 }
 0x20c   : > { %v2231_v19 = vpop.permute.xlu1 %2230 }
 0x20d   : > { %2306 = vst.msk [vmem:[#allocation2 + $0x54] sm:$0xf] %vm2284_vm12, %v2231_v19  ;;  %v2229_v23 = vpop.permute.xlu0 %2228 }
 0x20e   : > { %2305 = vst.msk [vmem:[#allocation2 + $0x50] sm:$0xf] %vm2284_vm12, %v2229_v23  ;;  %3008 = vrot.lane.b32.xlu1 %v2945_v15, %s4829_s7 }
 0x20f   : > { %3006 = vrot.lane.b32.xlu0 %v2935_v20, %s4829_s7 }
 0x210   : > { %v2235_v29 = vpop.permute.xlu1 %2234 }
 0x211   : > { %2308 = vst.msk [vmem:[#allocation2 + $0x5c] sm:$0xf] %vm2284_vm12, %v2235_v29  ;;  %v2233_v31 = vpop.permute.xlu0 %2232 }
 0x212   : > { %2307 = vst.msk [vmem:[#allocation2 + $0x58] sm:$0xf] %vm2284_vm12, %v2233_v31  ;;  %3341 = vrot.lane.b32.xlu1 %v3275_v25, %s4830_s10 }
 0x213   : > { %3339 = vrot.lane.b32.xlu0 %v3272_v27, %s4830_s10 }
 0x214   : > { %v2428_v33 = vpop.permute.xlu1 %2427 }
 0x215   : > { %2503 = vst.msk [vmem:[#allocation2 + $0x54] sm:$0xf] %vm2481_vm13, %v2428_v33  ;;  %v2426_v35 = vpop.permute.xlu0 %2425 }
 0x216   : > { %2502 = vst.msk [vmem:[#allocation2 + $0x50] sm:$0xf] %vm2481_vm13, %v2426_v35  ;;  %3345 = vrot.lane.b32.xlu1 %v3282_v32, %s4830_s10 }
 0x217   : > { %3343 = vrot.lane.b32.xlu0 %v3279_v34, %s4830_s10 }
 0x218   : > { %v2432_v36 = vpop.permute.xlu1 %2431 }
 0x219   : > { %2505 = vst.msk [vmem:[#allocation2 + $0x5c] sm:$0xf] %vm2481_vm13, %v2432_v36  ;;  %v2430_v37 = vpop.permute.xlu0 %2429 }
 0x21a   : > { %2504 = vst.msk [vmem:[#allocation2 + $0x58] sm:$0xf] %vm2481_vm13, %v2430_v37 }
 0x21c   : > { %v2989_v38 = vpop.permute.xlu1 %2988 }
 0x21d   : > { %3064 = vst.msk [vmem:[#allocation2 + $0x54] sm:$0xf] %vm3042_vm14, %v2989_v38  ;;  %v2987_v62 = vpop.permute.xlu0 %2986 }
 0x21e   : > { %3063 = vst.msk [vmem:[#allocation2 + $0x50] sm:$0xf] %vm3042_vm14, %v2987_v62  ;;  %v4709_v39 = vpop.f32.mrf.mxu0 }
 0x21f   : > { %v3958_v52 = vmul.f32 %v4709_v39, %v4709_v39 }
 0x220   : > { %v2993_v40 = vpop.permute.xlu1 %2992  ;;  %v3631_v42 = vpop.f32.mrf.mxu0 }
 0x221   : > { %3066 = vst.msk [vmem:[#allocation2 + $0x5c] sm:$0xf] %vm3042_vm14, %v2993_v40  ;;  %v2991_v41 = vpop.permute.xlu0 %2990  ;;  %v3956_v48 = vmul.f32 %v3631_v42, %v3631_v42 }
 0x222   : > { %3065 = vst.msk [vmem:[#allocation2 + $0x58] sm:$0xf] %vm3042_vm14, %v2991_v41  ;;  %v4710_v44 = vpop.f32.mrf.mxu0 }
 0x223   : > { %v4595_v43 = vpack.c.bf16 %v4710_v44, %v4709_v39  ;;  %v3959_v57 = vmul.f32 %v4710_v44, %v4710_v44 }
 0x224   : > { %v3326_v45 = vpop.permute.xlu1 %3325  ;;  %v3634_v47 = vpop.f32.mrf.mxu0 }
 0x225   : > { %3401 = vst.msk [vmem:[#allocation2 + $0x54] sm:$0xf] %vm3379_vm15, %v3326_v45  ;;  %v3324_v46 = vpop.permute.xlu0 %3323  ;;  %4667 = vst [vmem:[%s6266_s14 + $0x8] sm:$0xff] %v4595_v43   ;;  %v4590_v49 = vpack.c.bf16 %v3634_v47, %v3631_v42  ;;  %v3918_v50 = vadd.f32 %v3634_v47, %v3631_v42  ;;  %v3957_v51 = vmul.f32 %v3634_v47, %v3634_v47 }
 0x226   : > { %3400 = vst.msk [vmem:[#allocation2 + $0x50] sm:$0xf] %vm3379_vm15, %v3324_v46 }
 0x227   : > { %4591 = vst [vmem:[%s6266_s14] sm:$0xff] %v4590_v49   ;;  %v3919_v53 = vadd.f32 %v4709_v39, %v3918_v50  ;;  %v3988_v54 = vadd.f32 %v3957_v51, %v3956_v48 }
 0x228   : > { %v3330_v55 = vpop.permute.xlu1 %3329 }
 0x229   : > { %3403 = vst.msk [vmem:[#allocation2 + $0x5c] sm:$0xf] %vm3379_vm15, %v3330_v55  ;;  %v3328_v56 = vpop.permute.xlu0 %3327  ;;  %v3989_v58 = vadd.f32 %v3988_v54, %v3958_v52  ;;  %v3920_v59 = vadd.f32 %v4710_v44, %v3919_v53 }
 0x22a   : > { %3402 = vst.msk [vmem:[#allocation2 + $0x58] sm:$0xf] %vm3379_vm15, %v3328_v56 }
 0x22b   : > { %v3990_v61 = vadd.f32 %v3989_v58, %v3959_v57 }
 0x22c   : > { %v1341_v60 = vpop.permute.xlu1 %1340 }
 0x22d   : > { %1412 = vst.msk [vmem:[#allocation2 + $0x64] sm:$0xf] %vm1386_vm10, %v1341_v60  ;;  %v1339_v63 = vpop.permute.xlu0 %1338  ;;  %v4793_v0 = vld [vmem:[#allocation2 + $0x50] sm:$0xff]  }
 0x22e   : > { %1411 = vst.msk [vmem:[#allocation2 + $0x60] sm:$0xf] %vm1386_vm10, %v1339_v63  ;;  %4727 = vmatprep.mubr.msk.bf16.mxu1 %vm3544_vm0, %v4793_v0 }
 0x230   : > { %v1345_v1 = vpop.permute.xlu1 %1344 }
 0x231   : > { %1414 = vst.msk [vmem:[#allocation2 + $0x6c] sm:$0xf] %vm1386_vm10, %v1345_v1  ;;  %v1343_v2 = vpop.permute.xlu0 %1342  ;;  %v4794_v3 = vld [vmem:[#allocation2 + $0x58] sm:$0xff]  }
 0x232   : > { %1413 = vst.msk [vmem:[#allocation2 + $0x68] sm:$0xf] %vm1386_vm10, %v1343_v2  ;;  %4728 = vmatmul.mubr.msk.bf16.gmra.mxu1 %vm3544_vm0, %v4794_v3 }
 0x234   : > { %v1902_v4 = vpop.permute.xlu1 %1901 }
 0x235   : > { %1973 = vst.msk [vmem:[#allocation2 + $0x64] sm:$0xf] %vm1947_vm11, %v1902_v4  ;;  %v1900_v5 = vpop.permute.xlu0 %1899 }
 0x236   : > { %1972 = vst.msk [vmem:[#allocation2 + $0x60] sm:$0xf] %vm1947_vm11, %v1900_v5 }
 0x238   : > { %v1906_v6 = vpop.permute.xlu1 %1905 }
 0x239   : > { %1975 = vst.msk [vmem:[#allocation2 + $0x6c] sm:$0xf] %vm1947_vm11, %v1906_v6  ;;  %v1904_v7 = vpop.permute.xlu0 %1903 }
 0x23a   : > { %1974 = vst.msk [vmem:[#allocation2 + $0x68] sm:$0xf] %vm1947_vm11, %v1904_v7 }
 0x23c   : > { %v2239_v8 = vpop.permute.xlu1 %2238 }
 0x23d   : > { %2310 = vst.msk [vmem:[#allocation2 + $0x64] sm:$0xf] %vm2284_vm12, %v2239_v8  ;;  %v2237_v9 = vpop.permute.xlu0 %2236 }
 0x23e   : > { %2309 = vst.msk [vmem:[#allocation2 + $0x60] sm:$0xf] %vm2284_vm12, %v2237_v9 }
 0x240   : > { %v2243_v10 = vpop.permute.xlu1 %2242 }
 0x241   : > { %2312 = vst.msk [vmem:[#allocation2 + $0x6c] sm:$0xf] %vm2284_vm12, %v2243_v10  ;;  %v2241_v11 = vpop.permute.xlu0 %2240 }
 0x242   : > { %2311 = vst.msk [vmem:[#allocation2 + $0x68] sm:$0xf] %vm2284_vm12, %v2241_v11 }
 0x244   : > { %v2436_v12 = vpop.permute.xlu1 %2435 }
 0x245   : > { %2507 = vst.msk [vmem:[#allocation2 + $0x64] sm:$0xf] %vm2481_vm13, %v2436_v12  ;;  %v2434_v13 = vpop.permute.xlu0 %2433 }
 0x246   : > { %2506 = vst.msk [vmem:[#allocation2 + $0x60] sm:$0xf] %vm2481_vm13, %v2434_v13  ;;  %v4713_v14 = vpop.f32.mrf.mxu0 }
 0x247   : > { %v3962_v27 = vmul.f32 %v4713_v14, %v4713_v14 }
 0x248   : > { %v2440_v15 = vpop.permute.xlu1 %2439  ;;  %v3647_v17 = vpop.f32.mrf.mxu0 }
 0x249   : > { %2509 = vst.msk [vmem:[#allocation2 + $0x6c] sm:$0xf] %vm2481_vm13, %v2440_v15  ;;  %v2438_v16 = vpop.permute.xlu0 %2437  ;;  %v3921_v18 = vadd.f32 %v3920_v59, %v3647_v17  ;;  %v3960_v19 = vmul.f32 %v3647_v17, %v3647_v17 }
 0x24a   : > { %2508 = vst.msk [vmem:[#allocation2 + $0x68] sm:$0xf] %vm2481_vm13, %v2438_v16  ;;  %v4714_v20 = vpop.f32.mrf.mxu0 }
 0x24b   : > { %v3991_v21 = vadd.f32 %v3990_v61, %v3960_v19  ;;  %v4605_v22 = vpack.c.bf16 %v4714_v20, %v4713_v14  ;;  %v3963_v34 = vmul.f32 %v4714_v20, %v4714_v20 }
 0x24c   : > { %v2997_v23 = vpop.permute.xlu1 %2996  ;;  %v3650_v25 = vpop.f32.mrf.mxu0 }
 0x24d   : > { %3068 = vst.msk [vmem:[#allocation2 + $0x64] sm:$0xf] %vm3042_vm14, %v2997_v23  ;;  %v2995_v24 = vpop.permute.xlu0 %2994  ;;  %4669 = vst [vmem:[%s6266_s14 + $0x18] sm:$0xff] %v4605_v22   ;;  %v4600_v26 = vpack.c.bf16 %v3650_v25, %v3647_v17  ;;  %v3922_v28 = vadd.f32 %v3921_v18, %v3650_v25  ;;  %v3961_v29 = vmul.f32 %v3650_v25, %v3650_v25 }
 0x24e   : > { %3067 = vst.msk [vmem:[#allocation2 + $0x60] sm:$0xf] %vm3042_vm14, %v2995_v24 }
 0x24f   : > { %4668 = vst [vmem:[%s6266_s14 + $0x10] sm:$0xff] %v4600_v26   ;;  %v3923_v30 = vadd.f32 %v4713_v14, %v3922_v28  ;;  %v3992_v31 = vadd.f32 %v3991_v21, %v3961_v29 }
 0x250   : > { %v3001_v32 = vpop.permute.xlu1 %3000 }
 0x251   : > { %3070 = vst.msk [vmem:[#allocation2 + $0x6c] sm:$0xf] %vm3042_vm14, %v3001_v32  ;;  %v2999_v33 = vpop.permute.xlu0 %2998  ;;  %v3993_v35 = vadd.f32 %v3992_v31, %v3962_v27  ;;  %v3924_v36 = vadd.f32 %v4714_v20, %v3923_v30 }
 0x252   : > { %3069 = vst.msk [vmem:[#allocation2 + $0x68] sm:$0xf] %vm3042_vm14, %v2999_v33 }
 0x253   : > { %v3994_v38 = vadd.f32 %v3993_v35, %v3963_v34 }
 0x254   : > { %v3334_v37 = vpop.permute.xlu1 %3333 }
 0x255   : > { %3405 = vst.msk [vmem:[#allocation2 + $0x64] sm:$0xf] %vm3379_vm15, %v3334_v37  ;;  %v3332_v62 = vpop.permute.xlu0 %3331 }
 0x256   : > { %3404 = vst.msk [vmem:[#allocation2 + $0x60] sm:$0xf] %vm3379_vm15, %v3332_v62 }
 0x258   : > { %v3338_v39 = vpop.permute.xlu1 %3337 }
 0x259   : > { %3407 = vst.msk [vmem:[#allocation2 + $0x6c] sm:$0xf] %vm3379_vm15, %v3338_v39  ;;  %v3336_v40 = vpop.permute.xlu0 %3335 }
 0x25a   : > { %3406 = vst.msk [vmem:[#allocation2 + $0x68] sm:$0xf] %vm3379_vm15, %v3336_v40 }
 0x25c   : > { %v1349_v41 = vpop.permute.xlu1 %1348 }
 0x25d   : > { %1416 = vst.msk [vmem:[#allocation2 + $0x74] sm:$0xf] %vm1386_vm10, %v1349_v41  ;;  %v1347_v42 = vpop.permute.xlu0 %1346  ;;  %v4795_v44 = vld [vmem:[#allocation2 + $0x60] sm:$0xff]  }
 0x25e   : > { %1415 = vst.msk [vmem:[#allocation2 + $0x70] sm:$0xf] %vm1386_vm10, %v1347_v42  ;;  %4731 = vmatprep.mubr.msk.bf16.mxu1 %vm3544_vm0, %v4795_v44 }
 0x260   : > { %v1353_v43 = vpop.permute.xlu1 %1352 }
 0x261   : > { %1418 = vst.msk [vmem:[#allocation2 + $0x7c] sm:$0xf] %vm1386_vm10, %v1353_v43  ;;  %v1351_v45 = vpop.permute.xlu0 %1350  ;;  %v4796_v46 = vld [vmem:[#allocation2 + $0x68] sm:$0xff]  }
 0x262   : > { %1417 = vst.msk [vmem:[#allocation2 + $0x78] sm:$0xf] %vm1386_vm10, %v1351_v45  ;;  %4732 = vmatmul.mubr.msk.bf16.gmra.mxu1 %vm3544_vm0, %v4796_v46 }
 0x264   : > { %v1910_v47 = vpop.permute.xlu1 %1909 }
 0x265   : > { %1977 = vst.msk [vmem:[#allocation2 + $0x74] sm:$0xf] %vm1947_vm11, %v1910_v47  ;;  %v1908_v48 = vpop.permute.xlu0 %1907 }
 0x266   : > { %1976 = vst.msk [vmem:[#allocation2 + $0x70] sm:$0xf] %vm1947_vm11, %v1908_v48 }
 0x268   : > { %v1914_v49 = vpop.permute.xlu1 %1913 }
 0x269   : > { %1979 = vst.msk [vmem:[#allocation2 + $0x7c] sm:$0xf] %vm1947_vm11, %v1914_v49  ;;  %v1912_v50 = vpop.permute.xlu0 %1911 }
 0x26a   : > { %1978 = vst.msk [vmem:[#allocation2 + $0x78] sm:$0xf] %vm1947_vm11, %v1912_v50 }
 0x26c   : > { %v2247_v51 = vpop.permute.xlu1 %2246 }
 0x26d   : > { %2314 = vst.msk [vmem:[#allocation2 + $0x74] sm:$0xf] %vm2284_vm12, %v2247_v51  ;;  %v2245_v52 = vpop.permute.xlu0 %2244 }
 0x26e   : > { %2313 = vst.msk [vmem:[#allocation2 + $0x70] sm:$0xf] %vm2284_vm12, %v2245_v52  ;;  %v4717_v53 = vpop.f32.mrf.mxu0 }
 0x26f   : > { %v3966_v5 = vmul.f32 %v4717_v53, %v4717_v53 }
 0x270   : > { %v2251_v54 = vpop.permute.xlu1 %2250  ;;  %v3663_v56 = vpop.f32.mrf.mxu0 }
 0x271   : > { %2316 = vst.msk [vmem:[#allocation2 + $0x7c] sm:$0xf] %vm2284_vm12, %v2251_v54  ;;  %v2249_v55 = vpop.permute.xlu0 %2248  ;;  %v3925_v57 = vadd.f32 %v3924_v36, %v3663_v56  ;;  %v3964_v58 = vmul.f32 %v3663_v56, %v3663_v56 }
 0x272   : > { %2315 = vst.msk [vmem:[#allocation2 + $0x78] sm:$0xf] %vm2284_vm12, %v2249_v55  ;;  %v4718_v59 = vpop.f32.mrf.mxu0 }
 0x273   : > { %v3995_v60 = vadd.f32 %v3994_v38, %v3964_v58  ;;  %v4615_v61 = vpack.c.bf16 %v4718_v59, %v4717_v53  ;;  %v3967_v10 = vmul.f32 %v4718_v59, %v4718_v59 }
 0x274   : > { %v2444_v63 = vpop.permute.xlu1 %2443  ;;  %v3666_v1 = vpop.f32.mrf.mxu0 }
 0x275   : > { %2511 = vst.msk [vmem:[#allocation2 + $0x74] sm:$0xf] %vm2481_vm13, %v2444_v63  ;;  %v2442_v0 = vpop.permute.xlu0 %2441  ;;  %4671 = vst [vmem:[%s6266_s14 + $0x28] sm:$0xff] %v4615_v61   ;;  %v4610_v2 = vpack.c.bf16 %v3666_v1, %v3663_v56  ;;  %v3926_v3 = vadd.f32 %v3925_v57, %v3666_v1  ;;  %v3965_v4 = vmul.f32 %v3666_v1, %v3666_v1 }
 0x276   : > { %2510 = vst.msk [vmem:[#allocation2 + $0x70] sm:$0xf] %vm2481_vm13, %v2442_v0 }
 0x277   : > { %4670 = vst [vmem:[%s6266_s14 + $0x20] sm:$0xff] %v4610_v2   ;;  %v3927_v6 = vadd.f32 %v4717_v53, %v3926_v3  ;;  %v3996_v7 = vadd.f32 %v3995_v60, %v3965_v4 }
 0x278   : > { %v2448_v8 = vpop.permute.xlu1 %2447 }
 0x279   : > { %2513 = vst.msk [vmem:[#allocation2 + $0x7c] sm:$0xf] %vm2481_vm13, %v2448_v8  ;;  %v2446_v9 = vpop.permute.xlu0 %2445  ;;  %v3997_v11 = vadd.f32 %v3996_v7, %v3966_v5  ;;  %v3928_v12 = vadd.f32 %v4718_v59, %v3927_v6 }
 0x27a   : > { %2512 = vst.msk [vmem:[#allocation2 + $0x78] sm:$0xf] %vm2481_vm13, %v2446_v9 }
 0x27b   : > { %v3998_v14 = vadd.f32 %v3997_v11, %v3967_v10 }
 0x27c   : > { %v3005_v13 = vpop.permute.xlu1 %3004 }
 0x27d   : > { %3072 = vst.msk [vmem:[#allocation2 + $0x74] sm:$0xf] %vm3042_vm14, %v3005_v13  ;;  %v3003_v15 = vpop.permute.xlu0 %3002 }
 0x27e   : > { %3071 = vst.msk [vmem:[#allocation2 + $0x70] sm:$0xf] %vm3042_vm14, %v3003_v15 }
 0x280   : > { %v3009_v16 = vpop.permute.xlu1 %3008 }
 0x281   : > { %3074 = vst.msk [vmem:[#allocation2 + $0x7c] sm:$0xf] %vm3042_vm14, %v3009_v16  ;;  %v3007_v17 = vpop.permute.xlu0 %3006 }
 0x282   : > { %3073 = vst.msk [vmem:[#allocation2 + $0x78] sm:$0xf] %vm3042_vm14, %v3007_v17 }
 0x284   : > { %v3342_v18 = vpop.permute.xlu1 %3341 }
 0x285   : > { %3409 = vst.msk [vmem:[#allocation2 + $0x74] sm:$0xf] %vm3379_vm15, %v3342_v18  ;;  %v3340_v19 = vpop.permute.xlu0 %3339 }
 0x286   : > { %3408 = vst.msk [vmem:[#allocation2 + $0x70] sm:$0xf] %vm3379_vm15, %v3340_v19 }
 0x288   : > { %v3346_v20 = vpop.permute.xlu1 %3345 }
 0x289   : > { %3411 = vst.msk [vmem:[#allocation2 + $0x7c] sm:$0xf] %vm3379_vm15, %v3346_v20  ;;  %v3344_v21 = vpop.permute.xlu0 %3343 }
 0x28a   : > { %3410 = vst.msk [vmem:[#allocation2 + $0x78] sm:$0xf] %vm3379_vm15, %v3344_v21 }
 0x28d   : > { %v4797_v22 = vld [vmem:[#allocation2 + $0x70] sm:$0xff]  }
 0x28e   : > { %4735 = vmatprep.mubr.msk.bf16.mxu1 %vm3544_vm0, %v4797_v22 }
 0x291   : > { %v4798_v23 = vld [vmem:[#allocation2 + $0x78] sm:$0xff]  }
 0x292   : > { %4736 = vmatmul.mubr.msk.bf16.gmra.mxu1 %vm3544_vm0, %v4798_v23 }
 0x296   : > { %v4721_v24 = vpop.f32.mrf.mxu0 }
 0x297   : > { %v3970_v35 = vmul.f32 %v4721_v24, %v4721_v24 }
 0x298   : > { %v3679_v25 = vpop.f32.mrf.mxu0 }
 0x299   : > { %v3929_v26 = vadd.f32 %v3928_v12, %v3679_v25  ;;  %v3968_v28 = vmul.f32 %v3679_v25, %v3679_v25 }
 0x29a   : > { %v4722_v29 = vpop.f32.mrf.mxu0 }
 0x29b   : > { %v3999_v27 = vadd.f32 %v3998_v14, %v3968_v28  ;;  %v4625_v30 = vpack.c.bf16 %v4722_v29, %v4721_v24  ;;  %v3971_v38 = vmul.f32 %v4722_v29, %v4722_v29 }
 0x29c   : > { %v3682_v31 = vpop.f32.mrf.mxu0 }
 0x29d   : > { %4673 = vst [vmem:[%s6266_s14 + $0x38] sm:$0xff] %v4625_v30   ;;  %v4620_v32 = vpack.c.bf16 %v3682_v31, %v3679_v25  ;;  %v3930_v33 = vadd.f32 %v3929_v26, %v3682_v31  ;;  %v3969_v34 = vmul.f32 %v3682_v31, %v3682_v31 }
 0x29f   : > { %4672 = vst [vmem:[%s6266_s14 + $0x30] sm:$0xff] %v4620_v32   ;;  %v3931_v36 = vadd.f32 %v4721_v24, %v3930_v33  ;;  %v4000_v37 = vadd.f32 %v3999_v27, %v3969_v34 }
 0x2a1   : > { %v4001_v62 = vadd.f32 %v4000_v37, %v3970_v35  ;;  %v3932_v39 = vadd.f32 %v4722_v29, %v3931_v36 }
 0x2a3   : > { %v4002_v40 = vadd.f32 %v4001_v62, %v3971_v38 }
 0x2c2   : > { %v4725_v41 = vpop.f32.mrf.mxu1 }
 0x2c3   : > { %v3974_v52 = vmul.f32 %v4725_v41, %v4725_v41 }
 0x2c4   : > { %v3695_v42 = vpop.f32.mrf.mxu1 }
 0x2c5   : > { %v3933_v44 = vadd.f32 %v3932_v39, %v3695_v42  ;;  %v3972_v43 = vmul.f32 %v3695_v42, %v3695_v42 }
 0x2c6   : > { %v4726_v45 = vpop.f32.mrf.mxu1 }
 0x2c7   : > { %v4003_v46 = vadd.f32 %v4002_v40, %v3972_v43  ;;  %v4635_v47 = vpack.c.bf16 %v4726_v45, %v4725_v41  ;;  %v3975_v55 = vmul.f32 %v4726_v45, %v4726_v45 }
 0x2c8   : > { %v3698_v48 = vpop.f32.mrf.mxu1 }
 0x2c9   : > { %4675 = vst [vmem:[%s6266_s14 + $0x48] sm:$0xff] %v4635_v47   ;;  %v4630_v49 = vpack.c.bf16 %v3698_v48, %v3695_v42  ;;  %v3934_v50 = vadd.f32 %v3933_v44, %v3698_v48  ;;  %v3973_v51 = vmul.f32 %v3698_v48, %v3698_v48 }
 0x2cb   : > { %4674 = vst [vmem:[%s6266_s14 + $0x40] sm:$0xff] %v4630_v49   ;;  %v3935_v53 = vadd.f32 %v4725_v41, %v3934_v50  ;;  %v4004_v54 = vadd.f32 %v4003_v46, %v3973_v51 }
 0x2cd   : > { %v4005_v56 = vadd.f32 %v4004_v54, %v3974_v52  ;;  %v3936_v57 = vadd.f32 %v4726_v45, %v3935_v53 }
 0x2cf   : > { %v4006_v58 = vadd.f32 %v4005_v56, %v3975_v55 }
 0x2f2   : > { %v4729_v59 = vpop.f32.mrf.mxu1 }
 0x2f3   : > { %v3978_v7 = vmul.f32 %v4729_v59, %v4729_v59 }
 0x2f4   : > { %v3711_v60 = vpop.f32.mrf.mxu1 }
 0x2f5   : > { %v3937_v61 = vadd.f32 %v3936_v57, %v3711_v60  ;;  %v3976_v63 = vmul.f32 %v3711_v60, %v3711_v60 }
 0x2f6   : > { %v4730_v0 = vpop.f32.mrf.mxu1 }
 0x2f7   : > { %v4007_v1 = vadd.f32 %v4006_v58, %v3976_v63  ;;  %v4645_v2 = vpack.c.bf16 %v4730_v0, %v4729_v59  ;;  %v3979_v10 = vmul.f32 %v4730_v0, %v4730_v0 }
 0x2f8   : > { %v3714_v3 = vpop.f32.mrf.mxu1 }
 0x2f9   : > { %4677 = vst [vmem:[%s6266_s14 + $0x58] sm:$0xff] %v4645_v2   ;;  %v4640_v4 = vpack.c.bf16 %v3714_v3, %v3711_v60  ;;  %v3938_v5 = vadd.f32 %v3937_v61, %v3714_v3  ;;  %v3977_v6 = vmul.f32 %v3714_v3, %v3714_v3 }
 0x2fb   : > { %4676 = vst [vmem:[%s6266_s14 + $0x50] sm:$0xff] %v4640_v4   ;;  %v3939_v8 = vadd.f32 %v4729_v59, %v3938_v5  ;;  %v4008_v9 = vadd.f32 %v4007_v1, %v3977_v6 }
 0x2fd   : > { %v4009_v11 = vadd.f32 %v4008_v9, %v3978_v7  ;;  %v3940_v12 = vadd.f32 %v4730_v0, %v3939_v8 }
 0x2ff   : > { %v4010_v13 = vadd.f32 %v4009_v11, %v3979_v10 }
 0x322   : > { %v4733_v14 = vpop.f32.mrf.mxu1 }
 0x323   : > { %v3982_v26 = vmul.f32 %v4733_v14, %v4733_v14 }
 0x324   : > { %v3727_v15 = vpop.f32.mrf.mxu1 }
 0x325   : > { %v3980_v20 = vmul.f32 %v3727_v15, %v3727_v15  ;;  %v3941_v21 = vadd.f32 %v3940_v12, %v3727_v15 }
 0x326   : > { %v4734_v16 = vpop.f32.mrf.mxu1 }
 0x327   : > { %v4655_v17 = vpack.c.bf16 %v4734_v16, %v4733_v14  ;;  %v4011_v23 = vadd.f32 %v4010_v13, %v3980_v20  ;;  %v3983_v31 = vmul.f32 %v4734_v16, %v4734_v16 }
 0x328   : > { %v3730_v18 = vpop.f32.mrf.mxu1 }
 0x329   : > { %4679 = vst [vmem:[%s6266_s14 + $0x68] sm:$0xff] %v4655_v17   ;;  %v4650_v19 = vpack.c.bf16 %v3730_v18, %v3727_v15  ;;  %v3981_v22 = vmul.f32 %v3730_v18, %v3730_v18  ;;  %v3942_v24 = vadd.f32 %v3941_v21, %v3730_v18 }
 0x32b   : > { %4678 = vst [vmem:[%s6266_s14 + $0x60] sm:$0xff] %v4650_v19   ;;  %v4012_v25 = vadd.f32 %v4011_v23, %v3981_v22  ;;  %v3943_v28 = vadd.f32 %v4733_v14, %v3942_v24 }
 0x32d   : > { %v4013_v27 = vadd.f32 %v4012_v25, %v3982_v26  ;;  %v3944_v32 = vadd.f32 %v4734_v16, %v3943_v28 }
 0x32f   : > { %v4014_v36 = vadd.f32 %v4013_v27, %v3983_v31 }
 0x352   : > { %v4737_v29 = vpop.f32.mrf.mxu1 }
 0x353   : > { %v3986_v42 = vmul.f32 %v4737_v29, %v4737_v29 }
 0x354   : > { %v3743_v30 = vpop.f32.mrf.mxu1 }
 0x355   : > { %v3984_v33 = vmul.f32 %v3743_v30, %v3743_v30  ;;  %v3945_v35 = vadd.f32 %v3944_v32, %v3743_v30 }
 0x356   : > { %v4738_v34 = vpop.f32.mrf.mxu1 }
 0x357   : > { %v4665_v37 = vpack.c.bf16 %v4738_v34, %v4737_v29  ;;  %v4015_v62 = vadd.f32 %v4014_v36, %v3984_v33  ;;  %v3987_v45 = vmul.f32 %v4738_v34, %v4738_v34 }
 0x358   : > { %v3746_v38 = vpop.f32.mrf.mxu1 }
 0x359   : > { %4681 = vst [vmem:[%s6266_s14 + $0x78] sm:$0xff] %v4665_v37   ;;  %v4660_v39 = vpack.c.bf16 %v3746_v38, %v3743_v30  ;;  %v3946_v40 = vadd.f32 %v3945_v35, %v3746_v38  ;;  %v3985_v41 = vmul.f32 %v3746_v38, %v3746_v38 }
 0x35b   : > { %4680 = vst [vmem:[%s6266_s14 + $0x70] sm:$0xff] %v4660_v39   ;;  %v3947_v44 = vadd.f32 %v4737_v29, %v3946_v40  ;;  %v4016_v43 = vadd.f32 %v4015_v62, %v3985_v41 }
 0x35d   : > { %v3948_v46 = vadd.f32 %v4738_v34, %v3947_v44  ;;  %v4017_v47 = vadd.f32 %v4016_v43, %v3986_v42 }
 0x35f   : > { %v3949_v48 = vrot.slane %v3948_v46, 4  ;;  %v4018_v49 = vadd.f32 %v4017_v47, %v3987_v45 }
 0x361   : > { %v3950_v50 = vadd.f32 %v3949_v48, %v3948_v46  ;;  %v4019_v51 = vrot.slane %v4018_v49, 4 }
 0x363   : > { %v3951_v52 = vrot.slane %v3950_v50, 2  ;;  %v4020_v53 = vadd.f32 %v4019_v51, %v4018_v49 }
 0x365   : > { %v3952_v54 = vadd.f32 %v3951_v52, %v3950_v50  ;;  %v4021_v55 = vrot.slane %v4020_v53, 2 }
 0x367   : > { %v3953_v56 = vrot.slane %v3952_v54, 1  ;;  %v4022_v57 = vadd.f32 %v4021_v55, %v4020_v53 }
 0x369   : > { %v3954_v58 = vadd.f32 %v3953_v56, %v3952_v54  ;;  %v4023_v59 = vrot.slane %v4022_v57, 1 }
 0x36b   : > { %3955 = vst [vmem:[%s241_s21] sm:$0x1] %v3954_v58  ;;  %v4024_v60 = vadd.f32 %v4023_v59, %v4022_v57 }
 0x36d   : > { %4025 = vst [vmem:[%s246_s24] sm:$0x1] %v4024_v60 }
 0x36e PF: > { %s15_s17 = sadd.s32 1, %s4821_s17   ;;  %s6368_s15 = smov %s4817_s16 }
 0x36f   : > { %p12_p5 = scmp.ge.s32.totalorder %s15_s17, 4   ;;  %s6369_s16 = smov %s6371_s18 }
 0x371   :  { %14 = sbr.rel (!%p12_p5) target bundleno = 2 (0x2), region = 85 }

</bundles_post_ra>
